<compile_context>
chip_gen: v6e
topology: v6e:2x2x1
jax: 0.10.0
libtpu: 0.0.40
codegen_flags: <defaults>
</compile_context>

<pallas_src>
import functools

import jax
import jax.numpy as jnp
from jax.experimental import pallas as pl
from jax.experimental.pallas import tpu as pltpu


def _layernorm(x, gamma, beta, eps=1e-5):
    # PyTorch nn.LayerNorm semantics: biased variance over last dim, eps=1e-5.
    mu = jnp.mean(x, axis=-1, keepdims=True)
    var = jnp.mean((x - mu) ** 2, axis=-1, keepdims=True)
    return (x - mu) * jax.lax.rsqrt(var + eps) * gamma + beta


def perceiver_attn_kernel(x_ref, lat_ref, lnp_ref, wq_ref, wk_ref, wv_ref, wo_ref,
                          o_ref, *, tb, nx, nl, heads, dim_head):
    f32 = jnp.float32
    mxu_dtype = wq_ref.dtype
    exact_recip = mxu_dtype == jnp.float32       # tight validation path

    # ---- LayerNorms (f32 statistics) ---------------------------------------
    x = x_ref[...].astype(f32)                   # (tb*nx, D)
    lat = lat_ref[...].astype(f32)               # (tb*nl, D)
    lnp = lnp_ref[...].astype(f32)               # (4, D): [gm, bm, gl, bl]
    gm, bm, gl, bl = lnp[0:1], lnp[1:2], lnp[2:3], lnp[3:4]

    xn_m = _layernorm(x, gm, bm).astype(mxu_dtype)       # norm_media
    ln_m = _layernorm(lat, gl, bl).astype(mxu_dtype)     # norm_latents

    # ---- All-heads, lane-dense projections ----------------------------------
    # kv input = [norm_media ; norm_latents] stacked along the sublane (row) axis;
    # both row counts are multiples of 8, so the stack and later row-splits are aligned.
    kv_m = jnp.concatenate([xn_m, ln_m], axis=0)          # (tb*(nx+nl), D)

    q_all = jnp.dot(ln_m, wq_ref[...],
                    preferred_element_type=f32).astype(mxu_dtype)   # (tb*nl, H*dh)
    k_all = jnp.dot(kv_m, wk_ref[...],
                    preferred_element_type=f32).astype(mxu_dtype)   # (tb*(nx+nl), H*dh)
    v_all = jnp.dot(kv_m, wv_ref[...],
                    preferred_element_type=f32).astype(mxu_dtype)   # (tb*(nx+nl), H*dh)

    rx = tb * nx                                           # media rows in the kv stack

    # ---- Per-head attention --------------------------------------------------
    # After the fused projections the heads live in the lane dim ('(h d)' layout), so
    # per-head views are static lane slices (relayout work, off the MXU).  heads is
    # small and static; the Python loop only keeps one head's sim/p buffers live.
    o_heads = []
    for h in range(heads):
        sl = slice(h * dim_head, (h + 1) * dim_head)
        q3 = q_all[:, sl].reshape(tb, nl, dim_head)
        kx3 = k_all[:rx, sl].reshape(tb, nx, dim_head)
        kl3 = k_all[rx:, sl].reshape(tb, nl, dim_head)
        vx3 = v_all[:rx, sl].reshape(tb, nx, dim_head)
        vl3 = v_all[rx:, sl].reshape(tb, nl, dim_head)

        # Per-(b,t) batched scores; 1/sqrt(dim_head) is already folded into Wq.
        sim_x = jnp.einsum('bid,bjd->bij', q3, kx3,
                           preferred_element_type=f32)     # (tb, nl, nx)
        sim_l = jnp.einsum('bid,bjd->bij', q3, kl3,
                           preferred_element_type=f32)     # (tb, nl, nl)

        # Softmax over the (virtually) concatenated kv axis: shared max + shared denom.
        m = jnp.maximum(sim_x.max(axis=-1, keepdims=True),
                        sim_l.max(axis=-1, keepdims=True))
        p_med = jnp.exp(sim_x - m)
        p_lat = jnp.exp(sim_l - m)
        denom = p_med.sum(axis=-1, keepdims=True) + p_lat.sum(axis=-1, keepdims=True)
        if exact_recip:
            inv = 1.0 / denom                              # exact for f32 validation
        else:
            inv = pl.reciprocal(denom, approx=True)        # EUP slot, off the VALU

        p_med = (p_med * inv).astype(mxu_dtype)
        p_lat = (p_lat * inv).astype(mxu_dtype)

        o3 = (jnp.einsum('bij,bjd->bid', p_med, vx3, preferred_element_type=f32)
              + jnp.einsum('bij,bjd->bid', p_lat, vl3, preferred_element_type=f32))
        o_heads.append(o3.reshape(tb * nl, dim_head).astype(mxu_dtype))

    # 'b h t n d -> b t n (h d)' + to_out as ONE lane-dense (tb*nl, H*dh)@(H*dh, D) dot.
    o_cat = jnp.concatenate(o_heads, axis=-1)              # (tb*nl, H*dh)
    out = jnp.dot(o_cat, wo_ref[...], preferred_element_type=f32)
    o_ref[...] = out.astype(o_ref.dtype)


def _device_info():
    """(VMEM budget bytes for tiling, single_tensorcore?) for the local TPU generation."""
    try:
        kind = jax.devices()[0].device_kind.lower()
    except Exception:
        kind = ""
    if "v5e" in kind or "v5 lite" in kind or "v5lite" in kind:
        return 48 << 20, True       # v5e: 1 TC, 128 MiB VMEM, lowest HBM BW
    if "v6" in kind:
        return 80 << 20, True       # v6e: 1 TC, 128 MiB VMEM -> bigger blocks pay off
    if "v7" in kind:
        return 44 << 20, False      # v7x: 2 TCs, only 64 MiB VMEM/TC -> keep headroom
    return 40 << 20, False          # v4/v5p/unknown: conservative, assume multi-core


def _vmem_estimate(tb, nx, nl, d, heads, dim_head, io_bytes, out_bytes, mxu_bytes,
                   const_bufs=2):
    """Approximate per-grid-step VMEM footprint (pipeline buffers + in-kernel temps)."""
    inner = heads * dim_head
    rows_x, rows_l = tb * nx, tb * nl
    rows_kv = rows_x + rows_l
    # Streamed blocks (double-buffered by the pipeline): x, latents, out.
    stream = 2 * (rows_x * d * io_bytes + rows_l * d * io_bytes + rows_l * d * out_bytes)
    # Constant blocks: LN params (f32) + Wq/Wk/Wv/Wo.
    consts = const_bufs * (4 * d * 4 + 4 * d * inner * mxu_bytes)
    # In-kernel temporaries (generous; not all simultaneously live).
    tmp = rows_kv * d * 4                                    # f32 LayerNorm outputs
    tmp += rows_kv * d * mxu_bytes                           # stacked kv operand
    tmp += (rows_l + 2 * rows_kv) * inner * (4 + mxu_bytes)  # q/k/v f32 accs + mxu casts
    tmp += 3 * tb * nl * (nx + nl) * 4                       # sim + exp(p), one head live
    tmp += tb * nl * (nx + nl) * mxu_bytes                   # normalized probs
    tmp += rows_l * inner * (4 + 2 * mxu_bytes)              # head outputs + concat
    return int(1.25 * (stream + consts + tmp))


def _choose_tb(bt, nx, nl, d, heads, dim_head, io_bytes, out_bytes, mxu_bytes,
               budget, single_core):
    """Largest (b,t) batch per grid step that divides B*T, keeps row blocks sublane
    aligned, fits the generation's VMEM budget, and (multi-TC only) keeps an even,
    >=2-step grid so both TensorCores stay busy."""
    legal = []
    for c in range(1, bt + 1):
        if bt % c:
            continue
        aligned = (c * nx) % 8 == 0 and (c * nl) % 8 == 0
        if aligned or c == bt:       # full-array block is always a legal BlockSpec
            legal.append(c)
    if not legal:
        return bt
    fits = [c for c in legal
            if _vmem_estimate(c, nx, nl, d, heads, dim_head,
                              io_bytes, out_bytes, mxu_bytes) <= budget]
    if not single_core:
        both_cores = [c for c in fits if (bt // c) >= 2 and (bt // c) % 2 == 0]
        if both_cores:
            return max(both_cores)
    if fits:
        return max(fits)
    return min(legal)


def _prep_params(params, heads, dim_head, mxu_dtype):
    scale = dim_head ** (-0.5)
    # Pack the four LayerNorm vectors into one (4, D) array (single constant DMA).
    lnp = jnp.concatenate([params["gm"], params["bm"], params["gl"], params["bl"]],
                          axis=0).astype(jnp.float32)
    # Lane-dense weight layout: (D, H*dh) for q/k/v, (H*dh, D) for out; scale folded
    # into Wq before the (optional) bf16 cast.
    wq = (params["wq"] * scale).astype(mxu_dtype)
    wk = params["wk"].astype(mxu_dtype)
    wv = params["wv"].astype(mxu_dtype)
    wo = params["wo"].astype(mxu_dtype)
    return lnp, wq, wk, wv, wo


_BUFFERED_CONSTS_OK = [True]    # flips to False if this JAX build rejects pipeline_mode


def perceiver_attention(x, latents, params, *, heads, dim_head,
                        mxu_dtype=jnp.bfloat16, out_dtype=None, tb=None):
    B, T, Nx, D = x.shape
    Nl = latents.shape[2]
    inner = heads * dim_head
    bt = B * T
    if out_dtype is None:
        out_dtype = x.dtype
    # NOTE: for production shapes keep D a multiple of 128 so output stores are
    # lane-dense (unmasked vst); the small demo D only wastes lanes but still compiles.

    budget, single_core = _device_info()
    io_bytes = jnp.dtype(x.dtype).itemsize
    out_bytes = jnp.dtype(out_dtype).itemsize
    mxu_bytes = jnp.dtype(mxu_dtype).itemsize
    if tb is None:
        tb = _choose_tb(bt, Nx, Nl, D, heads, dim_head, io_bytes, out_bytes, mxu_bytes,
                        budget, single_core)
    assert bt % tb == 0

    # No boundary dtype cast (avoids an extra HBM rewrite); the kernel casts in VMEM.
    # Pass bf16 x/latents (and get a bf16 output) to halve HBM traffic if the rest of
    # the model runs in bf16.
    x2 = x.reshape(bt * Nx, D)
    l2 = latents.reshape(bt * Nl, D)
    lnp, wq, wk, wv, wo = _prep_params(params, heads, dim_head, mxu_dtype)
    assert wq.shape == (D, inner) and wo.shape == (inner, D)

    kernel = functools.partial(perceiver_attn_kernel, tb=tb, nx=Nx, nl=Nl,
                               heads=heads, dim_head=dim_head)

    def build(single_buffer_consts):
        def cspec(shape):
            idx = lambda i: (0,) * len(shape)        # noqa: E731
            if single_buffer_consts:
                # Constant block index -> single buffer; saves VMEM vs double-buffering.
                return pl.BlockSpec(shape, idx, pipeline_mode=pl.Buffered(1))
            return pl.BlockSpec(shape, idx)

        return pl.pallas_call(
            kernel,
            out_shape=jax.ShapeDtypeStruct((bt * Nl, D), out_dtype),
            grid_spec=pltpu.PrefetchScalarGridSpec(
                num_scalar_prefetch=0,
                grid=(bt // tb,),
                in_specs=[
                    pl.BlockSpec((tb * Nx, D), lambda i: (i, 0)),   # x (flattened)
                    pl.BlockSpec((tb * Nl, D), lambda i: (i, 0)),   # latents (flattened)
                    cspec((4, D)),                                   # packed LN params
                    cspec((D, inner)),                               # Wq (scale folded)
                    cspec((D, inner)),                               # Wk
                    cspec((D, inner)),                               # Wv
                    cspec((inner, D)),                               # Wout
                ],
                out_specs=pl.BlockSpec((tb * Nl, D), lambda i: (i, 0)),
            ),
            compiler_params=pltpu.CompilerParams(
                dimension_semantics=("parallel",),
                vmem_limit_bytes=int(budget),
            ),
        )

    args = (x2, l2, lnp, wq, wk, wv, wo)
    if _BUFFERED_CONSTS_OK[0]:
        try:
            out = build(True)(*args)
        except Exception:
            _BUFFERED_CONSTS_OK[0] = False
            out = build(False)(*args)
    else:
        out = build(False)(*args)

    return out.reshape(B, T, Nl, D)


def perceiver_attention_ref(x, latents, params, *, heads, dim_head):
    """Pure-JAX f32 reference mirroring the PyTorch forward."""
    scale = dim_head ** (-0.5)
    xn = _layernorm(x, params["gm"][0], params["bm"][0])
    ln = _layernorm(latents, params["gl"][0], params["bl"][0])
    q = ln @ params["wq"]
    kv_in = jnp.concatenate([xn, ln], axis=-2)
    k = kv_in @ params["wk"]
    v = kv_in @ params["wv"]

    def split_heads(t):  # b t n (h d) -> b h t n d
        b, m, n, _ = t.shape
        return t.reshape(b, m, n, heads, dim_head).transpose(0, 3, 1, 2, 4)

    q, k, v = map(split_heads, (q, k, v))
    q = q * scale
    sim = jnp.einsum('...id,...jd->...ij', q, k)
    sim = sim - jnp.max(sim, axis=-1, keepdims=True)
    attn = jax.nn.softmax(sim, axis=-1)
    out = jnp.einsum('...ij,...jd->...id', attn, v)
    b, h, m, n, d = out.shape
    out = out.transpose(0, 2, 3, 1, 4).reshape(b, m, n, h * d)
    return out @ params["wo"]


def make_params(key, dim, heads, dim_head):
    inner = heads * dim_head
    ks = jax.random.split(key, 8)
    return {
        # LayerNorm affine params as (1, D) rows.
        "gm": 1.0 + 0.1 * jax.random.normal(ks[0], (1, dim), jnp.float32),
        "bm": 0.1 * jax.random.normal(ks[1], (1, dim), jnp.float32),
        "gl": 1.0 + 0.1 * jax.random.normal(ks[2], (1, dim), jnp.float32),
        "bl": 0.1 * jax.random.normal(ks[3], (1, dim), jnp.float32),
        # Linear weights stored as (in_features, out_features) = W.T of nn.Linear.
        "wq": 0.05 * jax.random.normal(ks[4], (dim, inner), jnp.float32),
        "wk": 0.05 * jax.random.normal(ks[5], (dim, inner), jnp.float32),
        "wv": 0.05 * jax.random.normal(ks[6], (dim, inner), jnp.float32),
        "wo": 0.05 * jax.random.normal(ks[7], (inner, dim), jnp.float32),
    }


if __name__ == "__main__":
    dim, heads, dim_head = 32, 4, 8
    B, T, Nx, Nl = 2, 4, 16, 8

    key = jax.random.PRNGKey(0)
    kx, kl, kp = jax.random.split(key, 3)
    x = jax.random.normal(kx, (B, T, Nx, dim), jnp.float32)
    latents = jax.random.normal(kl, (B, T, Nl, dim), jnp.float32)
    params = make_params(kp, dim, heads, dim_head)

    ref = perceiver_attention_ref(x, latents, params, heads=heads, dim_head=dim_head)

    # f32-MXU config: tight check against the PyTorch-equivalent reference (exact recip).
    out_f32 = perceiver_attention(x, latents, params, heads=heads, dim_head=dim_head,
                                  mxu_dtype=jnp.float32)
    out_f32 = jax.block_until_ready(out_f32)
    assert out_f32.shape == (B, T, Nl, dim)
    assert jnp.allclose(out_f32, ref, atol=2e-3, rtol=2e-3), "f32 kernel mismatch vs reference"

    # bf16-MXU config with f32 boundary (perf config on v6e/v7x): looser tolerance.
    out_bf16 = perceiver_attention(x, latents, params, heads=heads, dim_head=dim_head,
                                   mxu_dtype=jnp.bfloat16)
    out_bf16 = jax.block_until_ready(out_bf16)
    assert out_bf16.shape == (B, T, Nl, dim)
    assert jnp.allclose(out_bf16, ref, atol=2e-2, rtol=2e-2), "bf16 kernel mismatch vs reference"

    # bf16 boundary config (halved activation DMA + writeback; best on v5e).
    out_bf16_io = perceiver_attention(x.astype(jnp.bfloat16), latents.astype(jnp.bfloat16),
                                      params, heads=heads, dim_head=dim_head,
                                      mxu_dtype=jnp.bfloat16)
    out_bf16_io = jax.block_until_ready(out_bf16_io)
    assert out_bf16_io.shape == (B, T, Nl, dim)
    assert jnp.allclose(out_bf16_io.astype(jnp.float32), ref, atol=4e-2, rtol=4e-2), \
        "bf16-I/O kernel mismatch vs reference"

    print("KERNEL_OK")
</pallas_src>

<mosaic_0001>
module attributes {stable_mosaic.version = 11 : i64} {
  func.func @perceiver_attn_kernel(%arg0: i32, %arg1: memref<64x32xf32, #tpu.memory_space<vmem>>, %arg2: memref<32x32xf32, #tpu.memory_space<vmem>>, %arg3: memref<4x32xf32, #tpu.memory_space<vmem>>, %arg4: memref<32x32xf32, #tpu.memory_space<vmem>>, %arg5: memref<32x32xf32, #tpu.memory_space<vmem>>, %arg6: memref<32x32xf32, #tpu.memory_space<vmem>>, %arg7: memref<32x32xf32, #tpu.memory_space<vmem>>, %arg8: memref<32x32xf32, #tpu.memory_space<vmem>>) attributes {dimension_semantics = [#tpu.dimension_semantics<parallel>], iteration_bounds = array<i64: 2>, scalar_prefetch = 0 : i64, scratch_operands = 0 : i64, tpu.core_type = #tpu.core_type<tc>, window_params = [{transform_indices = @transform_0, window_bounds = array<i64: 64, 32>}, {transform_indices = @transform_1, window_bounds = array<i64: 32, 32>}, {pipeline_mode = #tpu.pipeline_mode<synchronous>, transform_indices = @transform_2, window_bounds = array<i64: 4, 32>}, {pipeline_mode = #tpu.pipeline_mode<synchronous>, transform_indices = @transform_3, window_bounds = array<i64: 32, 32>}, {pipeline_mode = #tpu.pipeline_mode<synchronous>, transform_indices = @transform_4, window_bounds = array<i64: 32, 32>}, {pipeline_mode = #tpu.pipeline_mode<synchronous>, transform_indices = @transform_5, window_bounds = array<i64: 32, 32>}, {pipeline_mode = #tpu.pipeline_mode<synchronous>, transform_indices = @transform_6, window_bounds = array<i64: 32, 32>}, {transform_indices = @transform_7, window_bounds = array<i64: 32, 32>}]} {
    %c0 = arith.constant 0 : index
    %c0_0 = arith.constant 0 : index
    %0 = vector.load %arg1[%c0, %c0_0] : memref<64x32xf32, #tpu.memory_space<vmem>>, vector<64x32xf32>
    %c0_1 = arith.constant 0 : index
    %c0_2 = arith.constant 0 : index
    %1 = vector.load %arg2[%c0_1, %c0_2] : memref<32x32xf32, #tpu.memory_space<vmem>>, vector<32x32xf32>
    %c0_3 = arith.constant 0 : index
    %c0_4 = arith.constant 0 : index
    %2 = vector.load %arg3[%c0_3, %c0_4] : memref<4x32xf32, #tpu.memory_space<vmem>>, vector<4x32xf32>
    %3 = vector.extract_strided_slice %2 {offsets = [0, 0], sizes = [1, 32], strides = [1, 1]} : vector<4x32xf32> to vector<1x32xf32>
    %4 = vector.extract_strided_slice %2 {offsets = [1, 0], sizes = [1, 32], strides = [1, 1]} : vector<4x32xf32> to vector<1x32xf32>
    %5 = vector.extract_strided_slice %2 {offsets = [2, 0], sizes = [1, 32], strides = [1, 1]} : vector<4x32xf32> to vector<1x32xf32>
    %6 = vector.extract_strided_slice %2 {offsets = [3, 0], sizes = [1, 32], strides = [1, 1]} : vector<4x32xf32> to vector<1x32xf32>
    %cst = arith.constant dense<0.000000e+00> : vector<64xf32>
    %7 = vector.multi_reduction <add>, %0, %cst [1] : vector<64x32xf32> to vector<64xf32>
    %8 = vector.shape_cast %7 : vector<64xf32> to vector<64x1xf32>
    %cst_5 = arith.constant 3.200000e+01 : f32
    %9 = vector.broadcast %cst_5 : f32 to vector<64x1xf32>
    %10 = arith.divf %8, %9 : vector<64x1xf32>
    %11 = vector.broadcast %10 : vector<64x1xf32> to vector<64x32xf32>
    %12 = arith.subf %0, %11 : vector<64x32xf32>
    %13 = arith.mulf %12, %12 : vector<64x32xf32>
    %cst_6 = arith.constant dense<0.000000e+00> : vector<64xf32>
    %14 = vector.multi_reduction <add>, %13, %cst_6 [1] : vector<64x32xf32> to vector<64xf32>
    %15 = vector.shape_cast %14 : vector<64xf32> to vector<64x1xf32>
    %cst_7 = arith.constant 3.200000e+01 : f32
    %16 = vector.broadcast %cst_7 : f32 to vector<64x1xf32>
    %17 = arith.divf %15, %16 : vector<64x1xf32>
    %18 = vector.broadcast %10 : vector<64x1xf32> to vector<64x32xf32>
    %19 = arith.subf %0, %18 : vector<64x32xf32>
    %cst_8 = arith.constant 9.99999974E-6 : f32
    %20 = vector.broadcast %cst_8 : f32 to vector<64x1xf32>
    %21 = arith.addf %17, %20 : vector<64x1xf32>
    %22 = math.rsqrt %21 : vector<64x1xf32>
    %23 = vector.broadcast %22 : vector<64x1xf32> to vector<64x32xf32>
    %24 = arith.mulf %19, %23 : vector<64x32xf32>
    %25 = vector.broadcast %3 : vector<1x32xf32> to vector<64x32xf32>
    %26 = arith.mulf %24, %25 : vector<64x32xf32>
    %27 = vector.broadcast %4 : vector<1x32xf32> to vector<64x32xf32>
    %28 = arith.addf %26, %27 : vector<64x32xf32>
    %cst_9 = arith.constant dense<0.000000e+00> : vector<32xf32>
    %29 = vector.multi_reduction <add>, %1, %cst_9 [1] : vector<32x32xf32> to vector<32xf32>
    %30 = vector.shape_cast %29 : vector<32xf32> to vector<32x1xf32>
    %cst_10 = arith.constant 3.200000e+01 : f32
    %31 = vector.broadcast %cst_10 : f32 to vector<32x1xf32>
    %32 = arith.divf %30, %31 : vector<32x1xf32>
    %33 = vector.broadcast %32 : vector<32x1xf32> to vector<32x32xf32>
    %34 = arith.subf %1, %33 : vector<32x32xf32>
    %35 = arith.mulf %34, %34 : vector<32x32xf32>
    %cst_11 = arith.constant dense<0.000000e+00> : vector<32xf32>
    %36 = vector.multi_reduction <add>, %35, %cst_11 [1] : vector<32x32xf32> to vector<32xf32>
    %37 = vector.shape_cast %36 : vector<32xf32> to vector<32x1xf32>
    %cst_12 = arith.constant 3.200000e+01 : f32
    %38 = vector.broadcast %cst_12 : f32 to vector<32x1xf32>
    %39 = arith.divf %37, %38 : vector<32x1xf32>
    %40 = vector.broadcast %32 : vector<32x1xf32> to vector<32x32xf32>
    %41 = arith.subf %1, %40 : vector<32x32xf32>
    %cst_13 = arith.constant 9.99999974E-6 : f32
    %42 = vector.broadcast %cst_13 : f32 to vector<32x1xf32>
    %43 = arith.addf %39, %42 : vector<32x1xf32>
    %44 = math.rsqrt %43 : vector<32x1xf32>
    %45 = vector.broadcast %44 : vector<32x1xf32> to vector<32x32xf32>
    %46 = arith.mulf %41, %45 : vector<32x32xf32>
    %47 = vector.broadcast %5 : vector<1x32xf32> to vector<32x32xf32>
    %48 = arith.mulf %46, %47 : vector<32x32xf32>
    %49 = vector.broadcast %6 : vector<1x32xf32> to vector<32x32xf32>
    %50 = arith.addf %48, %49 : vector<32x32xf32>
    %51 = tpu.concatenate %28, %50 in 0 : vector<64x32xf32>, vector<32x32xf32> -> vector<96x32xf32>
    %c0_14 = arith.constant 0 : index
    %c0_15 = arith.constant 0 : index
    %52 = vector.load %arg4[%c0_14, %c0_15] : memref<32x32xf32, #tpu.memory_space<vmem>>, vector<32x32xf32>
    %cst_16 = arith.constant dense<0.000000e+00> : vector<32x32xf32>
    %53 = tpu.matmul %50, %52, %cst_16 {dimension_numbers = #tpu.dot_dimension_numbers<[1], [0], [0], [1], [0, 0, 1, 1], [], []>} : vector<32x32xf32>, vector<32x32xf32>, vector<32x32xf32> -> vector<32x32xf32>
    %c0_17 = arith.constant 0 : index
    %c0_18 = arith.constant 0 : index
    %54 = vector.load %arg5[%c0_17, %c0_18] : memref<32x32xf32, #tpu.memory_space<vmem>>, vector<32x32xf32>
    %cst_19 = arith.constant dense<0.000000e+00> : vector<96x32xf32>
    %55 = tpu.matmul %51, %54, %cst_19 {dimension_numbers = #tpu.dot_dimension_numbers<[1], [0], [0], [1], [0, 0, 1, 1], [], []>} : vector<96x32xf32>, vector<32x32xf32>, vector<96x32xf32> -> vector<96x32xf32>
    %c0_20 = arith.constant 0 : index
    %c0_21 = arith.constant 0 : index
    %56 = vector.load %arg6[%c0_20, %c0_21] : memref<32x32xf32, #tpu.memory_space<vmem>>, vector<32x32xf32>
    %cst_22 = arith.constant dense<0.000000e+00> : vector<96x32xf32>
    %57 = tpu.matmul %51, %56, %cst_22 {dimension_numbers = #tpu.dot_dimension_numbers<[1], [0], [0], [1], [0, 0, 1, 1], [], []>} : vector<96x32xf32>, vector<32x32xf32>, vector<96x32xf32> -> vector<96x32xf32>
    %58 = vector.extract_strided_slice %53 {offsets = [0, 0], sizes = [32, 8], strides = [1, 1]} : vector<32x32xf32> to vector<32x8xf32>
    %59 = vector.shape_cast %58 : vector<32x8xf32> to vector<4x8x8xf32>
    %60 = vector.extract_strided_slice %55 {offsets = [0, 0], sizes = [64, 8], strides = [1, 1]} : vector<96x32xf32> to vector<64x8xf32>
    %61 = vector.shape_cast %60 : vector<64x8xf32> to vector<4x16x8xf32>
    %62 = vector.extract_strided_slice %55 {offsets = [64, 0], sizes = [32, 8], strides = [1, 1]} : vector<96x32xf32> to vector<32x8xf32>
    %63 = vector.shape_cast %62 : vector<32x8xf32> to vector<4x8x8xf32>
    %64 = vector.extract_strided_slice %57 {offsets = [0, 0], sizes = [64, 8], strides = [1, 1]} : vector<96x32xf32> to vector<64x8xf32>
    %65 = vector.shape_cast %64 : vector<64x8xf32> to vector<4x16x8xf32>
    %66 = vector.extract_strided_slice %57 {offsets = [64, 0], sizes = [32, 8], strides = [1, 1]} : vector<96x32xf32> to vector<32x8xf32>
    %67 = vector.shape_cast %66 : vector<32x8xf32> to vector<4x8x8xf32>
    "tpu.trace_start"() <{level = 10 : i32, message = "bid,bjd->bij"}> : () -> ()
    %cst_23 = arith.constant dense<0.000000e+00> : vector<4x8x16xf32>
    %68 = tpu.matmul %59, %61, %cst_23 {dimension_numbers = #tpu.dot_dimension_numbers<[2], [2], [1], [1], [0, 0, 0, 1, 1, 1], [0], [0]>} : vector<4x8x8xf32>, vector<4x16x8xf32>, vector<4x8x16xf32> -> vector<4x8x16xf32>
    %cst_24 = arith.constant dense<0.000000e+00> : vector<4x8x8xf32>
    %69 = tpu.matmul %59, %63, %cst_24 {dimension_numbers = #tpu.dot_dimension_numbers<[2], [2], [1], [1], [0, 0, 0, 1, 1, 1], [0], [0]>} : vector<4x8x8xf32>, vector<4x8x8xf32>, vector<4x8x8xf32> -> vector<4x8x8xf32>
    "tpu.trace_stop"() : () -> ()
    %cst_25 = arith.constant dense<0xFF800000> : vector<4x8xf32>
    %70 = vector.multi_reduction <maximumf>, %68, %cst_25 [2] : vector<4x8x16xf32> to vector<4x8xf32>
    %71 = vector.shape_cast %70 : vector<4x8xf32> to vector<4x8x1xf32>
    %cst_26 = arith.constant dense<0xFF800000> : vector<4x8xf32>
    %72 = vector.multi_reduction <maximumf>, %69, %cst_26 [2] : vector<4x8x8xf32> to vector<4x8xf32>
    %73 = vector.shape_cast %72 : vector<4x8xf32> to vector<4x8x1xf32>
    %74 = arith.maximumf %71, %73 : vector<4x8x1xf32>
    %75 = vector.broadcast %74 : vector<4x8x1xf32> to vector<4x8x16xf32>
    %76 = arith.subf %68, %75 : vector<4x8x16xf32>
    %77 = math.exp %76 : vector<4x8x16xf32>
    %78 = vector.broadcast %74 : vector<4x8x1xf32> to vector<4x8x8xf32>
    %79 = arith.subf %69, %78 : vector<4x8x8xf32>
    %80 = math.exp %79 : vector<4x8x8xf32>
    %cst_27 = arith.constant dense<0.000000e+00> : vector<4x8xf32>
    %81 = vector.multi_reduction <add>, %77, %cst_27 [2] : vector<4x8x16xf32> to vector<4x8xf32>
    %82 = vector.shape_cast %81 : vector<4x8xf32> to vector<4x8x1xf32>
    %cst_28 = arith.constant dense<0.000000e+00> : vector<4x8xf32>
    %83 = vector.multi_reduction <add>, %80, %cst_28 [2] : vector<4x8x8xf32> to vector<4x8xf32>
    %84 = vector.shape_cast %83 : vector<4x8xf32> to vector<4x8x1xf32>
    %85 = arith.addf %82, %84 : vector<4x8x1xf32>
    %cst_29 = arith.constant 1.000000e+00 : f32
    %86 = vector.broadcast %cst_29 : f32 to vector<4x8x1xf32>
    %87 = arith.divf %86, %85 : vector<4x8x1xf32>
    %88 = vector.broadcast %87 : vector<4x8x1xf32> to vector<4x8x16xf32>
    %89 = arith.mulf %77, %88 : vector<4x8x16xf32>
    %90 = vector.broadcast %87 : vector<4x8x1xf32> to vector<4x8x8xf32>
    %91 = arith.mulf %80, %90 : vector<4x8x8xf32>
    "tpu.trace_start"() <{level = 10 : i32, message = "bij,bjd->bid"}> : () -> ()
    %cst_30 = arith.constant dense<0.000000e+00> : vector<4x8x8xf32>
    %92 = tpu.matmul %89, %65, %cst_30 {dimension_numbers = #tpu.dot_dimension_numbers<[2], [1], [1], [2], [0, 0, 0, 1, 1, 2], [0], [0]>} : vector<4x8x16xf32>, vector<4x16x8xf32>, vector<4x8x8xf32> -> vector<4x8x8xf32>
    %cst_31 = arith.constant dense<0.000000e+00> : vector<4x8x8xf32>
    %93 = tpu.matmul %91, %67, %cst_31 {dimension_numbers = #tpu.dot_dimension_numbers<[2], [1], [1], [2], [0, 0, 0, 1, 1, 2], [0], [0]>} : vector<4x8x8xf32>, vector<4x8x8xf32>, vector<4x8x8xf32> -> vector<4x8x8xf32>
    "tpu.trace_stop"() : () -> ()
    %94 = arith.addf %92, %93 : vector<4x8x8xf32>
    %95 = vector.shape_cast %94 : vector<4x8x8xf32> to vector<32x8xf32>
    %96 = vector.extract_strided_slice %53 {offsets = [0, 8], sizes = [32, 8], strides = [1, 1]} : vector<32x32xf32> to vector<32x8xf32>
    %97 = vector.shape_cast %96 : vector<32x8xf32> to vector<4x8x8xf32>
    %98 = vector.extract_strided_slice %55 {offsets = [0, 8], sizes = [64, 8], strides = [1, 1]} : vector<96x32xf32> to vector<64x8xf32>
    %99 = vector.shape_cast %98 : vector<64x8xf32> to vector<4x16x8xf32>
    %100 = vector.extract_strided_slice %55 {offsets = [64, 8], sizes = [32, 8], strides = [1, 1]} : vector<96x32xf32> to vector<32x8xf32>
    %101 = vector.shape_cast %100 : vector<32x8xf32> to vector<4x8x8xf32>
    %102 = vector.extract_strided_slice %57 {offsets = [0, 8], sizes = [64, 8], strides = [1, 1]} : vector<96x32xf32> to vector<64x8xf32>
    %103 = vector.shape_cast %102 : vector<64x8xf32> to vector<4x16x8xf32>
    %104 = vector.extract_strided_slice %57 {offsets = [64, 8], sizes = [32, 8], strides = [1, 1]} : vector<96x32xf32> to vector<32x8xf32>
    %105 = vector.shape_cast %104 : vector<32x8xf32> to vector<4x8x8xf32>
    "tpu.trace_start"() <{level = 10 : i32, message = "bid,bjd->bij"}> : () -> ()
    %cst_32 = arith.constant dense<0.000000e+00> : vector<4x8x16xf32>
    %106 = tpu.matmul %97, %99, %cst_32 {dimension_numbers = #tpu.dot_dimension_numbers<[2], [2], [1], [1], [0, 0, 0, 1, 1, 1], [0], [0]>} : vector<4x8x8xf32>, vector<4x16x8xf32>, vector<4x8x16xf32> -> vector<4x8x16xf32>
    %cst_33 = arith.constant dense<0.000000e+00> : vector<4x8x8xf32>
    %107 = tpu.matmul %97, %101, %cst_33 {dimension_numbers = #tpu.dot_dimension_numbers<[2], [2], [1], [1], [0, 0, 0, 1, 1, 1], [0], [0]>} : vector<4x8x8xf32>, vector<4x8x8xf32>, vector<4x8x8xf32> -> vector<4x8x8xf32>
    "tpu.trace_stop"() : () -> ()
    %cst_34 = arith.constant dense<0xFF800000> : vector<4x8xf32>
    %108 = vector.multi_reduction <maximumf>, %106, %cst_34 [2] : vector<4x8x16xf32> to vector<4x8xf32>
    %109 = vector.shape_cast %108 : vector<4x8xf32> to vector<4x8x1xf32>
    %cst_35 = arith.constant dense<0xFF800000> : vector<4x8xf32>
    %110 = vector.multi_reduction <maximumf>, %107, %cst_35 [2] : vector<4x8x8xf32> to vector<4x8xf32>
    %111 = vector.shape_cast %110 : vector<4x8xf32> to vector<4x8x1xf32>
    %112 = arith.maximumf %109, %111 : vector<4x8x1xf32>
    %113 = vector.broadcast %112 : vector<4x8x1xf32> to vector<4x8x16xf32>
    %114 = arith.subf %106, %113 : vector<4x8x16xf32>
    %115 = math.exp %114 : vector<4x8x16xf32>
    %116 = vector.broadcast %112 : vector<4x8x1xf32> to vector<4x8x8xf32>
    %117 = arith.subf %107, %116 : vector<4x8x8xf32>
    %118 = math.exp %117 : vector<4x8x8xf32>
    %cst_36 = arith.constant dense<0.000000e+00> : vector<4x8xf32>
    %119 = vector.multi_reduction <add>, %115, %cst_36 [2] : vector<4x8x16xf32> to vector<4x8xf32>
    %120 = vector.shape_cast %119 : vector<4x8xf32> to vector<4x8x1xf32>
    %cst_37 = arith.constant dense<0.000000e+00> : vector<4x8xf32>
    %121 = vector.multi_reduction <add>, %118, %cst_37 [2] : vector<4x8x8xf32> to vector<4x8xf32>
    %122 = vector.shape_cast %121 : vector<4x8xf32> to vector<4x8x1xf32>
    %123 = arith.addf %120, %122 : vector<4x8x1xf32>
    %cst_38 = arith.constant 1.000000e+00 : f32
    %124 = vector.broadcast %cst_38 : f32 to vector<4x8x1xf32>
    %125 = arith.divf %124, %123 : vector<4x8x1xf32>
    %126 = vector.broadcast %125 : vector<4x8x1xf32> to vector<4x8x16xf32>
    %127 = arith.mulf %115, %126 : vector<4x8x16xf32>
    %128 = vector.broadcast %125 : vector<4x8x1xf32> to vector<4x8x8xf32>
    %129 = arith.mulf %118, %128 : vector<4x8x8xf32>
    "tpu.trace_start"() <{level = 10 : i32, message = "bij,bjd->bid"}> : () -> ()
    %cst_39 = arith.constant dense<0.000000e+00> : vector<4x8x8xf32>
    %130 = tpu.matmul %127, %103, %cst_39 {dimension_numbers = #tpu.dot_dimension_numbers<[2], [1], [1], [2], [0, 0, 0, 1, 1, 2], [0], [0]>} : vector<4x8x16xf32>, vector<4x16x8xf32>, vector<4x8x8xf32> -> vector<4x8x8xf32>
    %cst_40 = arith.constant dense<0.000000e+00> : vector<4x8x8xf32>
    %131 = tpu.matmul %129, %105, %cst_40 {dimension_numbers = #tpu.dot_dimension_numbers<[2], [1], [1], [2], [0, 0, 0, 1, 1, 2], [0], [0]>} : vector<4x8x8xf32>, vector<4x8x8xf32>, vector<4x8x8xf32> -> vector<4x8x8xf32>
    "tpu.trace_stop"() : () -> ()
    %132 = arith.addf %130, %131 : vector<4x8x8xf32>
    %133 = vector.shape_cast %132 : vector<4x8x8xf32> to vector<32x8xf32>
    %134 = vector.extract_strided_slice %53 {offsets = [0, 16], sizes = [32, 8], strides = [1, 1]} : vector<32x32xf32> to vector<32x8xf32>
    %135 = vector.shape_cast %134 : vector<32x8xf32> to vector<4x8x8xf32>
    %136 = vector.extract_strided_slice %55 {offsets = [0, 16], sizes = [64, 8], strides = [1, 1]} : vector<96x32xf32> to vector<64x8xf32>
    %137 = vector.shape_cast %136 : vector<64x8xf32> to vector<4x16x8xf32>
    %138 = vector.extract_strided_slice %55 {offsets = [64, 16], sizes = [32, 8], strides = [1, 1]} : vector<96x32xf32> to vector<32x8xf32>
    %139 = vector.shape_cast %138 : vector<32x8xf32> to vector<4x8x8xf32>
    %140 = vector.extract_strided_slice %57 {offsets = [0, 16], sizes = [64, 8], strides = [1, 1]} : vector<96x32xf32> to vector<64x8xf32>
    %141 = vector.shape_cast %140 : vector<64x8xf32> to vector<4x16x8xf32>
    %142 = vector.extract_strided_slice %57 {offsets = [64, 16], sizes = [32, 8], strides = [1, 1]} : vector<96x32xf32> to vector<32x8xf32>
    %143 = vector.shape_cast %142 : vector<32x8xf32> to vector<4x8x8xf32>
    "tpu.trace_start"() <{level = 10 : i32, message = "bid,bjd->bij"}> : () -> ()
    %cst_41 = arith.constant dense<0.000000e+00> : vector<4x8x16xf32>
    %144 = tpu.matmul %135, %137, %cst_41 {dimension_numbers = #tpu.dot_dimension_numbers<[2], [2], [1], [1], [0, 0, 0, 1, 1, 1], [0], [0]>} : vector<4x8x8xf32>, vector<4x16x8xf32>, vector<4x8x16xf32> -> vector<4x8x16xf32>
    %cst_42 = arith.constant dense<0.000000e+00> : vector<4x8x8xf32>
    %145 = tpu.matmul %135, %139, %cst_42 {dimension_numbers = #tpu.dot_dimension_numbers<[2], [2], [1], [1], [0, 0, 0, 1, 1, 1], [0], [0]>} : vector<4x8x8xf32>, vector<4x8x8xf32>, vector<4x8x8xf32> -> vector<4x8x8xf32>
    "tpu.trace_stop"() : () -> ()
    %cst_43 = arith.constant dense<0xFF800000> : vector<4x8xf32>
    %146 = vector.multi_reduction <maximumf>, %144, %cst_43 [2] : vector<4x8x16xf32> to vector<4x8xf32>
    %147 = vector.shape_cast %146 : vector<4x8xf32> to vector<4x8x1xf32>
    %cst_44 = arith.constant dense<0xFF800000> : vector<4x8xf32>
    %148 = vector.multi_reduction <maximumf>, %145, %cst_44 [2] : vector<4x8x8xf32> to vector<4x8xf32>
    %149 = vector.shape_cast %148 : vector<4x8xf32> to vector<4x8x1xf32>
    %150 = arith.maximumf %147, %149 : vector<4x8x1xf32>
    %151 = vector.broadcast %150 : vector<4x8x1xf32> to vector<4x8x16xf32>
    %152 = arith.subf %144, %151 : vector<4x8x16xf32>
    %153 = math.exp %152 : vector<4x8x16xf32>
    %154 = vector.broadcast %150 : vector<4x8x1xf32> to vector<4x8x8xf32>
    %155 = arith.subf %145, %154 : vector<4x8x8xf32>
    %156 = math.exp %155 : vector<4x8x8xf32>
    %cst_45 = arith.constant dense<0.000000e+00> : vector<4x8xf32>
    %157 = vector.multi_reduction <add>, %153, %cst_45 [2] : vector<4x8x16xf32> to vector<4x8xf32>
    %158 = vector.shape_cast %157 : vector<4x8xf32> to vector<4x8x1xf32>
    %cst_46 = arith.constant dense<0.000000e+00> : vector<4x8xf32>
    %159 = vector.multi_reduction <add>, %156, %cst_46 [2] : vector<4x8x8xf32> to vector<4x8xf32>
    %160 = vector.shape_cast %159 : vector<4x8xf32> to vector<4x8x1xf32>
    %161 = arith.addf %158, %160 : vector<4x8x1xf32>
    %cst_47 = arith.constant 1.000000e+00 : f32
    %162 = vector.broadcast %cst_47 : f32 to vector<4x8x1xf32>
    %163 = arith.divf %162, %161 : vector<4x8x1xf32>
    %164 = vector.broadcast %163 : vector<4x8x1xf32> to vector<4x8x16xf32>
    %165 = arith.mulf %153, %164 : vector<4x8x16xf32>
    %166 = vector.broadcast %163 : vector<4x8x1xf32> to vector<4x8x8xf32>
    %167 = arith.mulf %156, %166 : vector<4x8x8xf32>
    "tpu.trace_start"() <{level = 10 : i32, message = "bij,bjd->bid"}> : () -> ()
    %cst_48 = arith.constant dense<0.000000e+00> : vector<4x8x8xf32>
    %168 = tpu.matmul %165, %141, %cst_48 {dimension_numbers = #tpu.dot_dimension_numbers<[2], [1], [1], [2], [0, 0, 0, 1, 1, 2], [0], [0]>} : vector<4x8x16xf32>, vector<4x16x8xf32>, vector<4x8x8xf32> -> vector<4x8x8xf32>
    %cst_49 = arith.constant dense<0.000000e+00> : vector<4x8x8xf32>
    %169 = tpu.matmul %167, %143, %cst_49 {dimension_numbers = #tpu.dot_dimension_numbers<[2], [1], [1], [2], [0, 0, 0, 1, 1, 2], [0], [0]>} : vector<4x8x8xf32>, vector<4x8x8xf32>, vector<4x8x8xf32> -> vector<4x8x8xf32>
    "tpu.trace_stop"() : () -> ()
    %170 = arith.addf %168, %169 : vector<4x8x8xf32>
    %171 = vector.shape_cast %170 : vector<4x8x8xf32> to vector<32x8xf32>
    %172 = vector.extract_strided_slice %53 {offsets = [0, 24], sizes = [32, 8], strides = [1, 1]} : vector<32x32xf32> to vector<32x8xf32>
    %173 = vector.shape_cast %172 : vector<32x8xf32> to vector<4x8x8xf32>
    %174 = vector.extract_strided_slice %55 {offsets = [0, 24], sizes = [64, 8], strides = [1, 1]} : vector<96x32xf32> to vector<64x8xf32>
    %175 = vector.shape_cast %174 : vector<64x8xf32> to vector<4x16x8xf32>
    %176 = vector.extract_strided_slice %55 {offsets = [64, 24], sizes = [32, 8], strides = [1, 1]} : vector<96x32xf32> to vector<32x8xf32>
    %177 = vector.shape_cast %176 : vector<32x8xf32> to vector<4x8x8xf32>
    %178 = vector.extract_strided_slice %57 {offsets = [0, 24], sizes = [64, 8], strides = [1, 1]} : vector<96x32xf32> to vector<64x8xf32>
    %179 = vector.shape_cast %178 : vector<64x8xf32> to vector<4x16x8xf32>
    %180 = vector.extract_strided_slice %57 {offsets = [64, 24], sizes = [32, 8], strides = [1, 1]} : vector<96x32xf32> to vector<32x8xf32>
    %181 = vector.shape_cast %180 : vector<32x8xf32> to vector<4x8x8xf32>
    "tpu.trace_start"() <{level = 10 : i32, message = "bid,bjd->bij"}> : () -> ()
    %cst_50 = arith.constant dense<0.000000e+00> : vector<4x8x16xf32>
    %182 = tpu.matmul %173, %175, %cst_50 {dimension_numbers = #tpu.dot_dimension_numbers<[2], [2], [1], [1], [0, 0, 0, 1, 1, 1], [0], [0]>} : vector<4x8x8xf32>, vector<4x16x8xf32>, vector<4x8x16xf32> -> vector<4x8x16xf32>
    %cst_51 = arith.constant dense<0.000000e+00> : vector<4x8x8xf32>
    %183 = tpu.matmul %173, %177, %cst_51 {dimension_numbers = #tpu.dot_dimension_numbers<[2], [2], [1], [1], [0, 0, 0, 1, 1, 1], [0], [0]>} : vector<4x8x8xf32>, vector<4x8x8xf32>, vector<4x8x8xf32> -> vector<4x8x8xf32>
    "tpu.trace_stop"() : () -> ()
    %cst_52 = arith.constant dense<0xFF800000> : vector<4x8xf32>
    %184 = vector.multi_reduction <maximumf>, %182, %cst_52 [2] : vector<4x8x16xf32> to vector<4x8xf32>
    %185 = vector.shape_cast %184 : vector<4x8xf32> to vector<4x8x1xf32>
    %cst_53 = arith.constant dense<0xFF800000> : vector<4x8xf32>
    %186 = vector.multi_reduction <maximumf>, %183, %cst_53 [2] : vector<4x8x8xf32> to vector<4x8xf32>
    %187 = vector.shape_cast %186 : vector<4x8xf32> to vector<4x8x1xf32>
    %188 = arith.maximumf %185, %187 : vector<4x8x1xf32>
    %189 = vector.broadcast %188 : vector<4x8x1xf32> to vector<4x8x16xf32>
    %190 = arith.subf %182, %189 : vector<4x8x16xf32>
    %191 = math.exp %190 : vector<4x8x16xf32>
    %192 = vector.broadcast %188 : vector<4x8x1xf32> to vector<4x8x8xf32>
    %193 = arith.subf %183, %192 : vector<4x8x8xf32>
    %194 = math.exp %193 : vector<4x8x8xf32>
    %cst_54 = arith.constant dense<0.000000e+00> : vector<4x8xf32>
    %195 = vector.multi_reduction <add>, %191, %cst_54 [2] : vector<4x8x16xf32> to vector<4x8xf32>
    %196 = vector.shape_cast %195 : vector<4x8xf32> to vector<4x8x1xf32>
    %cst_55 = arith.constant dense<0.000000e+00> : vector<4x8xf32>
    %197 = vector.multi_reduction <add>, %194, %cst_55 [2] : vector<4x8x8xf32> to vector<4x8xf32>
    %198 = vector.shape_cast %197 : vector<4x8xf32> to vector<4x8x1xf32>
    %199 = arith.addf %196, %198 : vector<4x8x1xf32>
    %cst_56 = arith.constant 1.000000e+00 : f32
    %200 = vector.broadcast %cst_56 : f32 to vector<4x8x1xf32>
    %201 = arith.divf %200, %199 : vector<4x8x1xf32>
    %202 = vector.broadcast %201 : vector<4x8x1xf32> to vector<4x8x16xf32>
    %203 = arith.mulf %191, %202 : vector<4x8x16xf32>
    %204 = vector.broadcast %201 : vector<4x8x1xf32> to vector<4x8x8xf32>
    %205 = arith.mulf %194, %204 : vector<4x8x8xf32>
    "tpu.trace_start"() <{level = 10 : i32, message = "bij,bjd->bid"}> : () -> ()
    %cst_57 = arith.constant dense<0.000000e+00> : vector<4x8x8xf32>
    %206 = tpu.matmul %203, %179, %cst_57 {dimension_numbers = #tpu.dot_dimension_numbers<[2], [1], [1], [2], [0, 0, 0, 1, 1, 2], [0], [0]>} : vector<4x8x16xf32>, vector<4x16x8xf32>, vector<4x8x8xf32> -> vector<4x8x8xf32>
    %cst_58 = arith.constant dense<0.000000e+00> : vector<4x8x8xf32>
    %207 = tpu.matmul %205, %181, %cst_58 {dimension_numbers = #tpu.dot_dimension_numbers<[2], [1], [1], [2], [0, 0, 0, 1, 1, 2], [0], [0]>} : vector<4x8x8xf32>, vector<4x8x8xf32>, vector<4x8x8xf32> -> vector<4x8x8xf32>
    "tpu.trace_stop"() : () -> ()
    %208 = arith.addf %206, %207 : vector<4x8x8xf32>
    %209 = vector.shape_cast %208 : vector<4x8x8xf32> to vector<32x8xf32>
    %210 = tpu.concatenate %95, %133, %171, %209 in 1 : vector<32x8xf32>, vector<32x8xf32>, vector<32x8xf32>, vector<32x8xf32> -> vector<32x32xf32>
    %c0_59 = arith.constant 0 : index
    %c0_60 = arith.constant 0 : index
    %211 = vector.load %arg7[%c0_59, %c0_60] : memref<32x32xf32, #tpu.memory_space<vmem>>, vector<32x32xf32>
    %cst_61 = arith.constant dense<0.000000e+00> : vector<32x32xf32>
    %212 = tpu.matmul %210, %211, %cst_61 {dimension_numbers = #tpu.dot_dimension_numbers<[1], [0], [0], [1], [0, 0, 1, 1], [], []>} : vector<32x32xf32>, vector<32x32xf32>, vector<32x32xf32> -> vector<32x32xf32>
    %c0_62 = arith.constant 0 : index
    %c0_63 = arith.constant 0 : index
    %213 = vector.load %arg8[%c0_62, %c0_63] : memref<32x32xf32, #tpu.memory_space<vmem>>, vector<32x32xf32>
    tpu.vector_store %arg8[%c0_62, %c0_63], %212 {strides = array<i32>} : memref<32x32xf32, #tpu.memory_space<vmem>>, vector<32x32xf32>,
    return
  }
  func.func @transform_0(%arg0: i32) -> (i32, i32) {
    %c0_i32 = arith.constant 0 : i32
    %c0_i32_0 = arith.constant 0 : i32
    return %arg0, %c0_i32 : i32, i32
  }
  func.func @transform_1(%arg0: i32) -> (i32, i32) {
    %c0_i32 = arith.constant 0 : i32
    %c0_i32_0 = arith.constant 0 : i32
    return %arg0, %c0_i32 : i32, i32
  }
  func.func @transform_2(%arg0: i32) -> (i32, i32) {
    %c0_i32 = arith.constant 0 : i32
    %c0_i32_0 = arith.constant 0 : i32
    %c0_i32_1 = arith.constant 0 : i32
    return %c0_i32, %c0_i32_0 : i32, i32
  }
  func.func @transform_3(%arg0: i32) -> (i32, i32) {
    %c0_i32 = arith.constant 0 : i32
    %c0_i32_0 = arith.constant 0 : i32
    %c0_i32_1 = arith.constant 0 : i32
    return %c0_i32, %c0_i32_0 : i32, i32
  }
  func.func @transform_4(%arg0: i32) -> (i32, i32) {
    %c0_i32 = arith.constant 0 : i32
    %c0_i32_0 = arith.constant 0 : i32
    %c0_i32_1 = arith.constant 0 : i32
    return %c0_i32, %c0_i32_0 : i32, i32
  }
  func.func @transform_5(%arg0: i32) -> (i32, i32) {
    %c0_i32 = arith.constant 0 : i32
    %c0_i32_0 = arith.constant 0 : i32
    %c0_i32_1 = arith.constant 0 : i32
    return %c0_i32, %c0_i32_0 : i32, i32
  }
  func.func @transform_6(%arg0: i32) -> (i32, i32) {
    %c0_i32 = arith.constant 0 : i32
    %c0_i32_0 = arith.constant 0 : i32
    %c0_i32_1 = arith.constant 0 : i32
    return %c0_i32, %c0_i32_0 : i32, i32
  }
  func.func @transform_7(%arg0: i32) -> (i32, i32) {
    %c0_i32 = arith.constant 0 : i32
    %c0_i32_0 = arith.constant 0 : i32
    return %arg0, %c0_i32 : i32, i32
  }
}

module attributes {stable_mosaic.version = 11 : i64} {
  func.func @perceiver_attn_kernel(%arg0: i32, %arg1: memref<64x32xf32, #tpu.memory_space<vmem>>, %arg2: memref<32x32xf32, #tpu.memory_space<vmem>>, %arg3: memref<4x32xf32, #tpu.memory_space<vmem>>, %arg4: memref<32x32xf32, #tpu.memory_space<vmem>>, %arg5: memref<32x32xf32, #tpu.memory_space<vmem>>, %arg6: memref<32x32xf32, #tpu.memory_space<vmem>>, %arg7: memref<32x32xf32, #tpu.memory_space<vmem>>, %arg8: memref<32x32xf32, #tpu.memory_space<vmem>>) attributes {dimension_semantics = [#tpu.dimension_semantics<parallel>], iteration_bounds = array<i64: 2>, scalar_prefetch = 0 : i64, scratch_operands = 0 : i64, tpu.core_type = #tpu.core_type<tc>, window_params = [{transform_indices = @transform_0, window_bounds = array<i64: 64, 32>}, {transform_indices = @transform_1, window_bounds = array<i64: 32, 32>}, {pipeline_mode = #tpu.pipeline_mode<synchronous>, transform_indices = @transform_2, window_bounds = array<i64: 4, 32>}, {pipeline_mode = #tpu.pipeline_mode<synchronous>, transform_indices = @transform_3, window_bounds = array<i64: 32, 32>}, {pipeline_mode = #tpu.pipeline_mode<synchronous>, transform_indices = @transform_4, window_bounds = array<i64: 32, 32>}, {pipeline_mode = #tpu.pipeline_mode<synchronous>, transform_indices = @transform_5, window_bounds = array<i64: 32, 32>}, {pipeline_mode = #tpu.pipeline_mode<synchronous>, transform_indices = @transform_6, window_bounds = array<i64: 32, 32>}, {transform_indices = @transform_7, window_bounds = array<i64: 32, 32>}]} {
    %c0 = arith.constant 0 : index
    %c0_0 = arith.constant 0 : index
    %0 = vector.load %arg1[%c0, %c0_0] : memref<64x32xf32, #tpu.memory_space<vmem>>, vector<64x32xf32>
    %c0_1 = arith.constant 0 : index
    %c0_2 = arith.constant 0 : index
    %1 = vector.load %arg2[%c0_1, %c0_2] : memref<32x32xf32, #tpu.memory_space<vmem>>, vector<32x32xf32>
    %c0_3 = arith.constant 0 : index
    %c0_4 = arith.constant 0 : index
    %2 = vector.load %arg3[%c0_3, %c0_4] : memref<4x32xf32, #tpu.memory_space<vmem>>, vector<4x32xf32>
    %3 = vector.extract_strided_slice %2 {offsets = [0, 0], sizes = [1, 32], strides = [1, 1]} : vector<4x32xf32> to vector<1x32xf32>
    %4 = vector.extract_strided_slice %2 {offsets = [1, 0], sizes = [1, 32], strides = [1, 1]} : vector<4x32xf32> to vector<1x32xf32>
    %5 = vector.extract_strided_slice %2 {offsets = [2, 0], sizes = [1, 32], strides = [1, 1]} : vector<4x32xf32> to vector<1x32xf32>
    %6 = vector.extract_strided_slice %2 {offsets = [3, 0], sizes = [1, 32], strides = [1, 1]} : vector<4x32xf32> to vector<1x32xf32>
    %cst = arith.constant dense<0.000000e+00> : vector<64xf32>
    %7 = vector.multi_reduction <add>, %0, %cst [1] : vector<64x32xf32> to vector<64xf32>
    %8 = vector.shape_cast %7 : vector<64xf32> to vector<64x1xf32>
    %cst_5 = arith.constant 3.200000e+01 : f32
    %9 = vector.broadcast %cst_5 : f32 to vector<64x1xf32>
    %10 = arith.divf %8, %9 : vector<64x1xf32>
    %11 = vector.broadcast %10 : vector<64x1xf32> to vector<64x32xf32>
    %12 = arith.subf %0, %11 : vector<64x32xf32>
    %13 = arith.mulf %12, %12 : vector<64x32xf32>
    %cst_6 = arith.constant dense<0.000000e+00> : vector<64xf32>
    %14 = vector.multi_reduction <add>, %13, %cst_6 [1] : vector<64x32xf32> to vector<64xf32>
    %15 = vector.shape_cast %14 : vector<64xf32> to vector<64x1xf32>
    %cst_7 = arith.constant 3.200000e+01 : f32
    %16 = vector.broadcast %cst_7 : f32 to vector<64x1xf32>
    %17 = arith.divf %15, %16 : vector<64x1xf32>
    %18 = vector.broadcast %10 : vector<64x1xf32> to vector<64x32xf32>
    %19 = arith.subf %0, %18 : vector<64x32xf32>
    %cst_8 = arith.constant 9.99999974E-6 : f32
    %20 = vector.broadcast %cst_8 : f32 to vector<64x1xf32>
    %21 = arith.addf %17, %20 : vector<64x1xf32>
    %22 = math.rsqrt %21 : vector<64x1xf32>
    %23 = vector.broadcast %22 : vector<64x1xf32> to vector<64x32xf32>
    %24 = arith.mulf %19, %23 : vector<64x32xf32>
    %25 = vector.broadcast %3 : vector<1x32xf32> to vector<64x32xf32>
    %26 = arith.mulf %24, %25 : vector<64x32xf32>
    %27 = vector.broadcast %4 : vector<1x32xf32> to vector<64x32xf32>
    %28 = arith.addf %26, %27 : vector<64x32xf32>
    %cst_9 = arith.constant dense<0.000000e+00> : vector<32xf32>
    %29 = vector.multi_reduction <add>, %1, %cst_9 [1] : vector<32x32xf32> to vector<32xf32>
    %30 = vector.shape_cast %29 : vector<32xf32> to vector<32x1xf32>
    %cst_10 = arith.constant 3.200000e+01 : f32
    %31 = vector.broadcast %cst_10 : f32 to vector<32x1xf32>
    %32 = arith.divf %30, %31 : vector<32x1xf32>
    %33 = vector.broadcast %32 : vector<32x1xf32> to vector<32x32xf32>
    %34 = arith.subf %1, %33 : vector<32x32xf32>
    %35 = arith.mulf %34, %34 : vector<32x32xf32>
    %cst_11 = arith.constant dense<0.000000e+00> : vector<32xf32>
    %36 = vector.multi_reduction <add>, %35, %cst_11 [1] : vector<32x32xf32> to vector<32xf32>
    %37 = vector.shape_cast %36 : vector<32xf32> to vector<32x1xf32>
    %cst_12 = arith.constant 3.200000e+01 : f32
    %38 = vector.broadcast %cst_12 : f32 to vector<32x1xf32>
    %39 = arith.divf %37, %38 : vector<32x1xf32>
    %40 = vector.broadcast %32 : vector<32x1xf32> to vector<32x32xf32>
    %41 = arith.subf %1, %40 : vector<32x32xf32>
    %cst_13 = arith.constant 9.99999974E-6 : f32
    %42 = vector.broadcast %cst_13 : f32 to vector<32x1xf32>
    %43 = arith.addf %39, %42 : vector<32x1xf32>
    %44 = math.rsqrt %43 : vector<32x1xf32>
    %45 = vector.broadcast %44 : vector<32x1xf32> to vector<32x32xf32>
    %46 = arith.mulf %41, %45 : vector<32x32xf32>
    %47 = vector.broadcast %5 : vector<1x32xf32> to vector<32x32xf32>
    %48 = arith.mulf %46, %47 : vector<32x32xf32>
    %49 = vector.broadcast %6 : vector<1x32xf32> to vector<32x32xf32>
    %50 = arith.addf %48, %49 : vector<32x32xf32>
    %51 = tpu.concatenate %28, %50 in 0 : vector<64x32xf32>, vector<32x32xf32> -> vector<96x32xf32>
    %c0_14 = arith.constant 0 : index
    %c0_15 = arith.constant 0 : index
    %52 = vector.load %arg4[%c0_14, %c0_15] : memref<32x32xf32, #tpu.memory_space<vmem>>, vector<32x32xf32>
    %cst_16 = arith.constant dense<0.000000e+00> : vector<32x32xf32>
    %53 = tpu.matmul %50, %52, %cst_16 {dimension_numbers = #tpu.dot_dimension_numbers<[1], [0], [0], [1], [0, 0, 1, 1], [], []>} : vector<32x32xf32>, vector<32x32xf32>, vector<32x32xf32> -> vector<32x32xf32>
    %c0_17 = arith.constant 0 : index
    %c0_18 = arith.constant 0 : index
    %54 = vector.load %arg5[%c0_17, %c0_18] : memref<32x32xf32, #tpu.memory_space<vmem>>, vector<32x32xf32>
    %cst_19 = arith.constant dense<0.000000e+00> : vector<96x32xf32>
    %55 = tpu.matmul %51, %54, %cst_19 {dimension_numbers = #tpu.dot_dimension_numbers<[1], [0], [0], [1], [0, 0, 1, 1], [], []>} : vector<96x32xf32>, vector<32x32xf32>, vector<96x32xf32> -> vector<96x32xf32>
    %c0_20 = arith.constant 0 : index
    %c0_21 = arith.constant 0 : index
    %56 = vector.load %arg6[%c0_20, %c0_21] : memref<32x32xf32, #tpu.memory_space<vmem>>, vector<32x32xf32>
    %cst_22 = arith.constant dense<0.000000e+00> : vector<96x32xf32>
    %57 = tpu.matmul %51, %56, %cst_22 {dimension_numbers = #tpu.dot_dimension_numbers<[1], [0], [0], [1], [0, 0, 1, 1], [], []>} : vector<96x32xf32>, vector<32x32xf32>, vector<96x32xf32> -> vector<96x32xf32>
    %58 = vector.extract_strided_slice %53 {offsets = [0, 0], sizes = [32, 8], strides = [1, 1]} : vector<32x32xf32> to vector<32x8xf32>
    %59 = vector.shape_cast %58 : vector<32x8xf32> to vector<4x8x8xf32>
    %60 = vector.extract_strided_slice %55 {offsets = [0, 0], sizes = [64, 8], strides = [1, 1]} : vector<96x32xf32> to vector<64x8xf32>
    %61 = vector.shape_cast %60 : vector<64x8xf32> to vector<4x16x8xf32>
    %62 = vector.extract_strided_slice %55 {offsets = [64, 0], sizes = [32, 8], strides = [1, 1]} : vector<96x32xf32> to vector<32x8xf32>
    %63 = vector.shape_cast %62 : vector<32x8xf32> to vector<4x8x8xf32>
    %64 = vector.extract_strided_slice %57 {offsets = [0, 0], sizes = [64, 8], strides = [1, 1]} : vector<96x32xf32> to vector<64x8xf32>
    %65 = vector.shape_cast %64 : vector<64x8xf32> to vector<4x16x8xf32>
    %66 = vector.extract_strided_slice %57 {offsets = [64, 0], sizes = [32, 8], strides = [1, 1]} : vector<96x32xf32> to vector<32x8xf32>
    %67 = vector.shape_cast %66 : vector<32x8xf32> to vector<4x8x8xf32>
    "tpu.trace_start"() <{level = 10 : i32, message = "bid,bjd->bij"}> : () -> ()
    %cst_23 = arith.constant dense<0.000000e+00> : vector<4x8x16xf32>
    %68 = tpu.matmul %59, %61, %cst_23 {dimension_numbers = #tpu.dot_dimension_numbers<[2], [2], [1], [1], [0, 0, 0, 1, 1, 1], [0], [0]>} : vector<4x8x8xf32>, vector<4x16x8xf32>, vector<4x8x16xf32> -> vector<4x8x16xf32>
    %cst_24 = arith.constant dense<0.000000e+00> : vector<4x8x8xf32>
    %69 = tpu.matmul %59, %63, %cst_24 {dimension_numbers = #tpu.dot_dimension_numbers<[2], [2], [1], [1], [0, 0, 0, 1, 1, 1], [0], [0]>} : vector<4x8x8xf32>, vector<4x8x8xf32>, vector<4x8x8xf32> -> vector<4x8x8xf32>
    "tpu.trace_stop"() : () -> ()
    %cst_25 = arith.constant dense<0xFF800000> : vector<4x8xf32>
    %70 = vector.multi_reduction <maximumf>, %68, %cst_25 [2] : vector<4x8x16xf32> to vector<4x8xf32>
    %71 = vector.shape_cast %70 : vector<4x8xf32> to vector<4x8x1xf32>
    %cst_26 = arith.constant dense<0xFF800000> : vector<4x8xf32>
    %72 = vector.multi_reduction <maximumf>, %69, %cst_26 [2] : vector<4x8x8xf32> to vector<4x8xf32>
    %73 = vector.shape_cast %72 : vector<4x8xf32> to vector<4x8x1xf32>
    %74 = arith.maximumf %71, %73 : vector<4x8x1xf32>
    %75 = vector.broadcast %74 : vector<4x8x1xf32> to vector<4x8x16xf32>
    %76 = arith.subf %68, %75 : vector<4x8x16xf32>
    %77 = math.exp %76 : vector<4x8x16xf32>
    %78 = vector.broadcast %74 : vector<4x8x1xf32> to vector<4x8x8xf32>
    %79 = arith.subf %69, %78 : vector<4x8x8xf32>
    %80 = math.exp %79 : vector<4x8x8xf32>
    %cst_27 = arith.constant dense<0.000000e+00> : vector<4x8xf32>
    %81 = vector.multi_reduction <add>, %77, %cst_27 [2] : vector<4x8x16xf32> to vector<4x8xf32>
    %82 = vector.shape_cast %81 : vector<4x8xf32> to vector<4x8x1xf32>
    %cst_28 = arith.constant dense<0.000000e+00> : vector<4x8xf32>
    %83 = vector.multi_reduction <add>, %80, %cst_28 [2] : vector<4x8x8xf32> to vector<4x8xf32>
    %84 = vector.shape_cast %83 : vector<4x8xf32> to vector<4x8x1xf32>
    %85 = arith.addf %82, %84 : vector<4x8x1xf32>
    %cst_29 = arith.constant 1.000000e+00 : f32
    %86 = vector.broadcast %cst_29 : f32 to vector<4x8x1xf32>
    %87 = arith.divf %86, %85 : vector<4x8x1xf32>
    %88 = vector.broadcast %87 : vector<4x8x1xf32> to vector<4x8x16xf32>
    %89 = arith.mulf %77, %88 : vector<4x8x16xf32>
    %90 = vector.broadcast %87 : vector<4x8x1xf32> to vector<4x8x8xf32>
    %91 = arith.mulf %80, %90 : vector<4x8x8xf32>
    "tpu.trace_start"() <{level = 10 : i32, message = "bij,bjd->bid"}> : () -> ()
    %cst_30 = arith.constant dense<0.000000e+00> : vector<4x8x8xf32>
    %92 = tpu.matmul %89, %65, %cst_30 {dimension_numbers = #tpu.dot_dimension_numbers<[2], [1], [1], [2], [0, 0, 0, 1, 1, 2], [0], [0]>} : vector<4x8x16xf32>, vector<4x16x8xf32>, vector<4x8x8xf32> -> vector<4x8x8xf32>
    %cst_31 = arith.constant dense<0.000000e+00> : vector<4x8x8xf32>
    %93 = tpu.matmul %91, %67, %cst_31 {dimension_numbers = #tpu.dot_dimension_numbers<[2], [1], [1], [2], [0, 0, 0, 1, 1, 2], [0], [0]>} : vector<4x8x8xf32>, vector<4x8x8xf32>, vector<4x8x8xf32> -> vector<4x8x8xf32>
    "tpu.trace_stop"() : () -> ()
    %94 = arith.addf %92, %93 : vector<4x8x8xf32>
    %95 = vector.shape_cast %94 : vector<4x8x8xf32> to vector<32x8xf32>
    %96 = vector.extract_strided_slice %53 {offsets = [0, 8], sizes = [32, 8], strides = [1, 1]} : vector<32x32xf32> to vector<32x8xf32>
    %97 = vector.shape_cast %96 : vector<32x8xf32> to vector<4x8x8xf32>
    %98 = vector.extract_strided_slice %55 {offsets = [0, 8], sizes = [64, 8], strides = [1, 1]} : vector<96x32xf32> to vector<64x8xf32>
    %99 = vector.shape_cast %98 : vector<64x8xf32> to vector<4x16x8xf32>
    %100 = vector.extract_strided_slice %55 {offsets = [64, 8], sizes = [32, 8], strides = [1, 1]} : vector<96x32xf32> to vector<32x8xf32>
    %101 = vector.shape_cast %100 : vector<32x8xf32> to vector<4x8x8xf32>
    %102 = vector.extract_strided_slice %57 {offsets = [0, 8], sizes = [64, 8], strides = [1, 1]} : vector<96x32xf32> to vector<64x8xf32>
    %103 = vector.shape_cast %102 : vector<64x8xf32> to vector<4x16x8xf32>
    %104 = vector.extract_strided_slice %57 {offsets = [64, 8], sizes = [32, 8], strides = [1, 1]} : vector<96x32xf32> to vector<32x8xf32>
    %105 = vector.shape_cast %104 : vector<32x8xf32> to vector<4x8x8xf32>
    "tpu.trace_start"() <{level = 10 : i32, message = "bid,bjd->bij"}> : () -> ()
    %cst_32 = arith.constant dense<0.000000e+00> : vector<4x8x16xf32>
    %106 = tpu.matmul %97, %99, %cst_32 {dimension_numbers = #tpu.dot_dimension_numbers<[2], [2], [1], [1], [0, 0, 0, 1, 1, 1], [0], [0]>} : vector<4x8x8xf32>, vector<4x16x8xf32>, vector<4x8x16xf32> -> vector<4x8x16xf32>
    %cst_33 = arith.constant dense<0.000000e+00> : vector<4x8x8xf32>
    %107 = tpu.matmul %97, %101, %cst_33 {dimension_numbers = #tpu.dot_dimension_numbers<[2], [2], [1], [1], [0, 0, 0, 1, 1, 1], [0], [0]>} : vector<4x8x8xf32>, vector<4x8x8xf32>, vector<4x8x8xf32> -> vector<4x8x8xf32>
    "tpu.trace_stop"() : () -> ()
    %cst_34 = arith.constant dense<0xFF800000> : vector<4x8xf32>
    %108 = vector.multi_reduction <maximumf>, %106, %cst_34 [2] : vector<4x8x16xf32> to vector<4x8xf32>
    %109 = vector.shape_cast %108 : vector<4x8xf32> to vector<4x8x1xf32>
    %cst_35 = arith.constant dense<0xFF800000> : vector<4x8xf32>
    %110 = vector.multi_reduction <maximumf>, %107, %cst_35 [2] : vector<4x8x8xf32> to vector<4x8xf32>
    %111 = vector.shape_cast %110 : vector<4x8xf32> to vector<4x8x1xf32>
    %112 = arith.maximumf %109, %111 : vector<4x8x1xf32>
    %113 = vector.broadcast %112 : vector<4x8x1xf32> to vector<4x8x16xf32>
    %114 = arith.subf %106, %113 : vector<4x8x16xf32>
    %115 = math.exp %114 : vector<4x8x16xf32>
    %116 = vector.broadcast %112 : vector<4x8x1xf32> to vector<4x8x8xf32>
    %117 = arith.subf %107, %116 : vector<4x8x8xf32>
    %118 = math.exp %117 : vector<4x8x8xf32>
    %cst_36 = arith.constant dense<0.000000e+00> : vector<4x8xf32>
    %119 = vector.multi_reduction <add>, %115, %cst_36 [2] : vector<4x8x16xf32> to vector<4x8xf32>
    %120 = vector.shape_cast %119 : vector<4x8xf32> to vector<4x8x1xf32>
    %cst_37 = arith.constant dense<0.000000e+00> : vector<4x8xf32>
    %121 = vector.multi_reduction <add>, %118, %cst_37 [2] : vector<4x8x8xf32> to vector<4x8xf32>
    %122 = vector.shape_cast %121 : vector<4x8xf32> to vector<4x8x1xf32>
    %123 = arith.addf %120, %122 : vector<4x8x1xf32>
    %cst_38 = arith.constant 1.000000e+00 : f32
    %124 = vector.broadcast %cst_38 : f32 to vector<4x8x1xf32>
    %125 = arith.divf %124, %123 : vector<4x8x1xf32>
    %126 = vector.broadcast %125 : vector<4x8x1xf32> to vector<4x8x16xf32>
    %127 = arith.mulf %115, %126 : vector<4x8x16xf32>
    %128 = vector.broadcast %125 : vector<4x8x1xf32> to vector<4x8x8xf32>
    %129 = arith.mulf %118, %128 : vector<4x8x8xf32>
    "tpu.trace_start"() <{level = 10 : i32, message = "bij,bjd->bid"}> : () -> ()
    %cst_39 = arith.constant dense<0.000000e+00> : vector<4x8x8xf32>
    %130 = tpu.matmul %127, %103, %cst_39 {dimension_numbers = #tpu.dot_dimension_numbers<[2], [1], [1], [2], [0, 0, 0, 1, 1, 2], [0], [0]>} : vector<4x8x16xf32>, vector<4x16x8xf32>, vector<4x8x8xf32> -> vector<4x8x8xf32>
    %cst_40 = arith.constant dense<0.000000e+00> : vector<4x8x8xf32>
    %131 = tpu.matmul %129, %105, %cst_40 {dimension_numbers = #tpu.dot_dimension_numbers<[2], [1], [1], [2], [0, 0, 0, 1, 1, 2], [0], [0]>} : vector<4x8x8xf32>, vector<4x8x8xf32>, vector<4x8x8xf32> -> vector<4x8x8xf32>
    "tpu.trace_stop"() : () -> ()
    %132 = arith.addf %130, %131 : vector<4x8x8xf32>
    %133 = vector.shape_cast %132 : vector<4x8x8xf32> to vector<32x8xf32>
    %134 = vector.extract_strided_slice %53 {offsets = [0, 16], sizes = [32, 8], strides = [1, 1]} : vector<32x32xf32> to vector<32x8xf32>
    %135 = vector.shape_cast %134 : vector<32x8xf32> to vector<4x8x8xf32>
    %136 = vector.extract_strided_slice %55 {offsets = [0, 16], sizes = [64, 8], strides = [1, 1]} : vector<96x32xf32> to vector<64x8xf32>
    %137 = vector.shape_cast %136 : vector<64x8xf32> to vector<4x16x8xf32>
    %138 = vector.extract_strided_slice %55 {offsets = [64, 16], sizes = [32, 8], strides = [1, 1]} : vector<96x32xf32> to vector<32x8xf32>
    %139 = vector.shape_cast %138 : vector<32x8xf32> to vector<4x8x8xf32>
    %140 = vector.extract_strided_slice %57 {offsets = [0, 16], sizes = [64, 8], strides = [1, 1]} : vector<96x32xf32> to vector<64x8xf32>
    %141 = vector.shape_cast %140 : vector<64x8xf32> to vector<4x16x8xf32>
    %142 = vector.extract_strided_slice %57 {offsets = [64, 16], sizes = [32, 8], strides = [1, 1]} : vector<96x32xf32> to vector<32x8xf32>
    %143 = vector.shape_cast %142 : vector<32x8xf32> to vector<4x8x8xf32>
    "tpu.trace_start"() <{level = 10 : i32, message = "bid,bjd->bij"}> : () -> ()
    %cst_41 = arith.constant dense<0.000000e+00> : vector<4x8x16xf32>
    %144 = tpu.matmul %135, %137, %cst_41 {dimension_numbers = #tpu.dot_dimension_numbers<[2], [2], [1], [1], [0, 0, 0, 1, 1, 1], [0], [0]>} : vector<4x8x8xf32>, vector<4x16x8xf32>, vector<4x8x16xf32> -> vector<4x8x16xf32>
    %cst_42 = arith.constant dense<0.000000e+00> : vector<4x8x8xf32>
    %145 = tpu.matmul %135, %139, %cst_42 {dimension_numbers = #tpu.dot_dimension_numbers<[2], [2], [1], [1], [0, 0, 0, 1, 1, 1], [0], [0]>} : vector<4x8x8xf32>, vector<4x8x8xf32>, vector<4x8x8xf32> -> vector<4x8x8xf32>
    "tpu.trace_stop"() : () -> ()
    %cst_43 = arith.constant dense<0xFF800000> : vector<4x8xf32>
    %146 = vector.multi_reduction <maximumf>, %144, %cst_43 [2] : vector<4x8x16xf32> to vector<4x8xf32>
    %147 = vector.shape_cast %146 : vector<4x8xf32> to vector<4x8x1xf32>
    %cst_44 = arith.constant dense<0xFF800000> : vector<4x8xf32>
    %148 = vector.multi_reduction <maximumf>, %145, %cst_44 [2] : vector<4x8x8xf32> to vector<4x8xf32>
    %149 = vector.shape_cast %148 : vector<4x8xf32> to vector<4x8x1xf32>
    %150 = arith.maximumf %147, %149 : vector<4x8x1xf32>
    %151 = vector.broadcast %150 : vector<4x8x1xf32> to vector<4x8x16xf32>
    %152 = arith.subf %144, %151 : vector<4x8x16xf32>
    %153 = math.exp %152 : vector<4x8x16xf32>
    %154 = vector.broadcast %150 : vector<4x8x1xf32> to vector<4x8x8xf32>
    %155 = arith.subf %145, %154 : vector<4x8x8xf32>
    %156 = math.exp %155 : vector<4x8x8xf32>
    %cst_45 = arith.constant dense<0.000000e+00> : vector<4x8xf32>
    %157 = vector.multi_reduction <add>, %153, %cst_45 [2] : vector<4x8x16xf32> to vector<4x8xf32>
    %158 = vector.shape_cast %157 : vector<4x8xf32> to vector<4x8x1xf32>
    %cst_46 = arith.constant dense<0.000000e+00> : vector<4x8xf32>
    %159 = vector.multi_reduction <add>, %156, %cst_46 [2] : vector<4x8x8xf32> to vector<4x8xf32>
    %160 = vector.shape_cast %159 : vector<4x8xf32> to vector<4x8x1xf32>
    %161 = arith.addf %158, %160 : vector<4x8x1xf32>
    %cst_47 = arith.constant 1.000000e+00 : f32
    %162 = vector.broadcast %cst_47 : f32 to vector<4x8x1xf32>
    %163 = arith.divf %162, %161 : vector<4x8x1xf32>
    %164 = vector.broadcast %163 : vector<4x8x1xf32> to vector<4x8x16xf32>
    %165 = arith.mulf %153, %164 : vector<4x8x16xf32>
    %166 = vector.broadcast %163 : vector<4x8x1xf32> to vector<4x8x8xf32>
    %167 = arith.mulf %156, %166 : vector<4x8x8xf32>
    "tpu.trace_start"() <{level = 10 : i32, message = "bij,bjd->bid"}> : () -> ()
    %cst_48 = arith.constant dense<0.000000e+00> : vector<4x8x8xf32>
    %168 = tpu.matmul %165, %141, %cst_48 {dimension_numbers = #tpu.dot_dimension_numbers<[2], [1], [1], [2], [0, 0, 0, 1, 1, 2], [0], [0]>} : vector<4x8x16xf32>, vector<4x16x8xf32>, vector<4x8x8xf32> -> vector<4x8x8xf32>
    %cst_49 = arith.constant dense<0.000000e+00> : vector<4x8x8xf32>
    %169 = tpu.matmul %167, %143, %cst_49 {dimension_numbers = #tpu.dot_dimension_numbers<[2], [1], [1], [2], [0, 0, 0, 1, 1, 2], [0], [0]>} : vector<4x8x8xf32>, vector<4x8x8xf32>, vector<4x8x8xf32> -> vector<4x8x8xf32>
    "tpu.trace_stop"() : () -> ()
    %170 = arith.addf %168, %169 : vector<4x8x8xf32>
    %171 = vector.shape_cast %170 : vector<4x8x8xf32> to vector<32x8xf32>
    %172 = vector.extract_strided_slice %53 {offsets = [0, 24], sizes = [32, 8], strides = [1, 1]} : vector<32x32xf32> to vector<32x8xf32>
    %173 = vector.shape_cast %172 : vector<32x8xf32> to vector<4x8x8xf32>
    %174 = vector.extract_strided_slice %55 {offsets = [0, 24], sizes = [64, 8], strides = [1, 1]} : vector<96x32xf32> to vector<64x8xf32>
    %175 = vector.shape_cast %174 : vector<64x8xf32> to vector<4x16x8xf32>
    %176 = vector.extract_strided_slice %55 {offsets = [64, 24], sizes = [32, 8], strides = [1, 1]} : vector<96x32xf32> to vector<32x8xf32>
    %177 = vector.shape_cast %176 : vector<32x8xf32> to vector<4x8x8xf32>
    %178 = vector.extract_strided_slice %57 {offsets = [0, 24], sizes = [64, 8], strides = [1, 1]} : vector<96x32xf32> to vector<64x8xf32>
    %179 = vector.shape_cast %178 : vector<64x8xf32> to vector<4x16x8xf32>
    %180 = vector.extract_strided_slice %57 {offsets = [64, 24], sizes = [32, 8], strides = [1, 1]} : vector<96x32xf32> to vector<32x8xf32>
    %181 = vector.shape_cast %180 : vector<32x8xf32> to vector<4x8x8xf32>
    "tpu.trace_start"() <{level = 10 : i32, message = "bid,bjd->bij"}> : () -> ()
    %cst_50 = arith.constant dense<0.000000e+00> : vector<4x8x16xf32>
    %182 = tpu.matmul %173, %175, %cst_50 {dimension_numbers = #tpu.dot_dimension_numbers<[2], [2], [1], [1], [0, 0, 0, 1, 1, 1], [0], [0]>} : vector<4x8x8xf32>, vector<4x16x8xf32>, vector<4x8x16xf32> -> vector<4x8x16xf32>
    %cst_51 = arith.constant dense<0.000000e+00> : vector<4x8x8xf32>
    %183 = tpu.matmul %173, %177, %cst_51 {dimension_numbers = #tpu.dot_dimension_numbers<[2], [2], [1], [1], [0, 0, 0, 1, 1, 1], [0], [0]>} : vector<4x8x8xf32>, vector<4x8x8xf32>, vector<4x8x8xf32> -> vector<4x8x8xf32>
    "tpu.trace_stop"() : () -> ()
    %cst_52 = arith.constant dense<0xFF800000> : vector<4x8xf32>
    %184 = vector.multi_reduction <maximumf>, %182, %cst_52 [2] : vector<4x8x16xf32> to vector<4x8xf32>
    %185 = vector.shape_cast %184 : vector<4x8xf32> to vector<4x8x1xf32>
    %cst_53 = arith.constant dense<0xFF800000> : vector<4x8xf32>
    %186 = vector.multi_reduction <maximumf>, %183, %cst_53 [2] : vector<4x8x8xf32> to vector<4x8xf32>
    %187 = vector.shape_cast %186 : vector<4x8xf32> to vector<4x8x1xf32>
    %188 = arith.maximumf %185, %187 : vector<4x8x1xf32>
    %189 = vector.broadcast %188 : vector<4x8x1xf32> to vector<4x8x16xf32>
    %190 = arith.subf %182, %189 : vector<4x8x16xf32>
    %191 = math.exp %190 : vector<4x8x16xf32>
    %192 = vector.broadcast %188 : vector<4x8x1xf32> to vector<4x8x8xf32>
    %193 = arith.subf %183, %192 : vector<4x8x8xf32>
    %194 = math.exp %193 : vector<4x8x8xf32>
    %cst_54 = arith.constant dense<0.000000e+00> : vector<4x8xf32>
    %195 = vector.multi_reduction <add>, %191, %cst_54 [2] : vector<4x8x16xf32> to vector<4x8xf32>
    %196 = vector.shape_cast %195 : vector<4x8xf32> to vector<4x8x1xf32>
    %cst_55 = arith.constant dense<0.000000e+00> : vector<4x8xf32>
    %197 = vector.multi_reduction <add>, %194, %cst_55 [2] : vector<4x8x8xf32> to vector<4x8xf32>
    %198 = vector.shape_cast %197 : vector<4x8xf32> to vector<4x8x1xf32>
    %199 = arith.addf %196, %198 : vector<4x8x1xf32>
    %cst_56 = arith.constant 1.000000e+00 : f32
    %200 = vector.broadcast %cst_56 : f32 to vector<4x8x1xf32>
    %201 = arith.divf %200, %199 : vector<4x8x1xf32>
    %202 = vector.broadcast %201 : vector<4x8x1xf32> to vector<4x8x16xf32>
    %203 = arith.mulf %191, %202 : vector<4x8x16xf32>
    %204 = vector.broadcast %201 : vector<4x8x1xf32> to vector<4x8x8xf32>
    %205 = arith.mulf %194, %204 : vector<4x8x8xf32>
    "tpu.trace_start"() <{level = 10 : i32, message = "bij,bjd->bid"}> : () -> ()
    %cst_57 = arith.constant dense<0.000000e+00> : vector<4x8x8xf32>
    %206 = tpu.matmul %203, %179, %cst_57 {dimension_numbers = #tpu.dot_dimension_numbers<[2], [1], [1], [2], [0, 0, 0, 1, 1, 2], [0], [0]>} : vector<4x8x16xf32>, vector<4x16x8xf32>, vector<4x8x8xf32> -> vector<4x8x8xf32>
    %cst_58 = arith.constant dense<0.000000e+00> : vector<4x8x8xf32>
    %207 = tpu.matmul %205, %181, %cst_58 {dimension_numbers = #tpu.dot_dimension_numbers<[2], [1], [1], [2], [0, 0, 0, 1, 1, 2], [0], [0]>} : vector<4x8x8xf32>, vector<4x8x8xf32>, vector<4x8x8xf32> -> vector<4x8x8xf32>
    "tpu.trace_stop"() : () -> ()
    %208 = arith.addf %206, %207 : vector<4x8x8xf32>
    %209 = vector.shape_cast %208 : vector<4x8x8xf32> to vector<32x8xf32>
    %210 = tpu.concatenate %95, %133, %171, %209 in 1 : vector<32x8xf32>, vector<32x8xf32>, vector<32x8xf32>, vector<32x8xf32> -> vector<32x32xf32>
    %c0_59 = arith.constant 0 : index
    %c0_60 = arith.constant 0 : index
    %211 = vector.load %arg7[%c0_59, %c0_60] : memref<32x32xf32, #tpu.memory_space<vmem>>, vector<32x32xf32>
    %cst_61 = arith.constant dense<0.000000e+00> : vector<32x32xf32>
    %212 = tpu.matmul %210, %211, %cst_61 {dimension_numbers = #tpu.dot_dimension_numbers<[1], [0], [0], [1], [0, 0, 1, 1], [], []>} : vector<32x32xf32>, vector<32x32xf32>, vector<32x32xf32> -> vector<32x32xf32>
    %c0_62 = arith.constant 0 : index
    %c0_63 = arith.constant 0 : index
    %213 = vector.load %arg8[%c0_62, %c0_63] : memref<32x32xf32, #tpu.memory_space<vmem>>, vector<32x32xf32>
    tpu.vector_store %arg8[%c0_62, %c0_63], %212 {strides = array<i32>} : memref<32x32xf32, #tpu.memory_space<vmem>>, vector<32x32xf32>,
    return
  }
  func.func @transform_0(%arg0: i32) -> (i32, i32) {
    %c0_i32 = arith.constant 0 : i32
    %c0_i32_0 = arith.constant 0 : i32
    return %arg0, %c0_i32 : i32, i32
  }
  func.func @transform_1(%arg0: i32) -> (i32, i32) {
    %c0_i32 = arith.constant 0 : i32
    %c0_i32_0 = arith.constant 0 : i32
    return %arg0, %c0_i32 : i32, i32
  }
  func.func @transform_2(%arg0: i32) -> (i32, i32) {
    %c0_i32 = arith.constant 0 : i32
    %c0_i32_0 = arith.constant 0 : i32
    %c0_i32_1 = arith.constant 0 : i32
    return %c0_i32, %c0_i32_0 : i32, i32
  }
  func.func @transform_3(%arg0: i32) -> (i32, i32) {
    %c0_i32 = arith.constant 0 : i32
    %c0_i32_0 = arith.constant 0 : i32
    %c0_i32_1 = arith.constant 0 : i32
    return %c0_i32, %c0_i32_0 : i32, i32
  }
  func.func @transform_4(%arg0: i32) -> (i32, i32) {
    %c0_i32 = arith.constant 0 : i32
    %c0_i32_0 = arith.constant 0 : i32
    %c0_i32_1 = arith.constant 0 : i32
    return %c0_i32, %c0_i32_0 : i32, i32
  }
  func.func @transform_5(%arg0: i32) -> (i32, i32) {
    %c0_i32 = arith.constant 0 : i32
    %c0_i32_0 = arith.constant 0 : i32
    %c0_i32_1 = arith.constant 0 : i32
    return %c0_i32, %c0_i32_0 : i32, i32
  }
  func.func @transform_6(%arg0: i32) -> (i32, i32) {
    %c0_i32 = arith.constant 0 : i32
    %c0_i32_0 = arith.constant 0 : i32
    %c0_i32_1 = arith.constant 0 : i32
    return %c0_i32, %c0_i32_0 : i32, i32
  }
  func.func @transform_7(%arg0: i32) -> (i32, i32) {
    %c0_i32 = arith.constant 0 : i32
    %c0_i32_0 = arith.constant 0 : i32
    return %arg0, %c0_i32 : i32, i32
  }
}

</mosaic_0001>

<bundles_post_ra>
// kernel: tpu_custom_call.1
= control target key start
LH: loop header
LB: loop body
LE: loop exit
PB: predicated region body
PF: predicated region fallthrough
CT: control target
= control target key end

     0   :  { %s7475_s24 = smov 0   ;;  %s8637_s0 = inlined_call_operand.vmem [shape: f32[128,32], index: 0, kind: input, shape index: {}]   ;;  %s8638_s1 = inlined_call_operand.vmem [shape: f32[64,32], index: 1, kind: input, shape index: {}]   ;;  %s8639_s2 = inlined_call_operand.vmem [shape: f32[4,32], index: 2, kind: input, shape index: {}]   ;;  %s8640_s3 = inlined_call_operand.vmem [shape: f32[32,32], index: 3, kind: input, shape index: {}]   ;;  %s8641_s4 = inlined_call_operand.vmem [shape: f32[32,32], index: 4, kind: input, shape index: {}]   ;;  %s8642_s5 = inlined_call_operand.vmem [shape: f32[32,32], index: 5, kind: input, shape index: {}]   ;;  %s8643_s6 = inlined_call_operand.vmem [shape: f32[32,32], index: 6, kind: input, shape index: {}]   ;;  %s8644_s7 = inlined_call_operand.vmem [shape: f32[64,32], index: 7, kind: output, shape index: {}]  }
   0x1 LB: > { %s6454_s25 = sadd.s32 4294967295, %s7425_s24   ;;  %p6458_p0 = scmp.ge.s32.totalorder %s7425_s24, 1  ;;  %s7425_s24 = sphi %s7475_s24, %s17_s24  }
   0x2   : > { %p249_p1 = scmp.lt.s32.totalorder %s7425_s24, 3 }
   0x4   : > { %p250_p2 = pnand %p6458_p0, %p249_p1 }
   0x6   : > { %253 = sbr.rel (%p250_p2) target bundleno = 3541 (0xdd5), region = 48 }
   0xb   : > { %s6461_s26 = sshll.u32 %s6454_s25, 2  ;;  %s6459_s27 = sshll.u32 %s6454_s25, 3  ;;  %vm317_vm0 = vcmask 261120   ;;  %vm7428_vm1 = vmmov 0   ;;  %vm898_vm2 = vcmask 64512   ;;  %vm1507_vm3 = vcmask 130048  }
   0xc   : > { %p293_p3 = scmp.lt.s32.totalorder %s6461_s26, 7  ;;  %p287_p4 = scmp.lt.s32.totalorder %s6459_s27, 15  ;;  %vm6276_vm4 = vcmask 195584  }
   0xd   : > { %s7429_s19 = smov 120   ;;  %s7430_s20 = smov 112  }
   0xe   : > { %s8651_s26 = smov (!%p293_p3, %s6461_s26), 7  ;;  %s8653_s27 = smov (!%p287_p4, %s6459_s27), 15 }
   0xf   : > { %s6462_s28 = sshll.u32 %s8651_s26, 3  ;;  %s6460_s9 = sshll.u32 %s8653_s27, 3 }
  0x10   : > { %s296_s8 = scalar_lea.vmem %s8638_s1, %s6462_s28  ;;  %s290_s12 = scalar_lea.vmem %s8637_s0, %s6460_s9 }
  0x11   : > { %v312_v0 = vld [vmem:[%s296_s8] sm:$0xff]  ;;  %v314_v1 = vld [vmem:[%s296_s8 + $0x10] sm:$0xff]  ;;  %v313_v2 = vld [vmem:[%s296_s8 + $0x8] sm:$0xff]  ;;  %s7431_s21 = smov 104   ;;  %s7432_s22 = smov 8  }
  0x12   : > { %v447_v3 = vsel %vm317_vm0, %v312_v0, 0.0  ;;  %v453_v4 = vsel %vm317_vm0, %v314_v1, 0.0  ;;  %v315_v5 = vld [vmem:[%s296_s8 + $0x18] sm:$0xff]  ;;  %v450_v6 = vsel %vm317_vm0, %v313_v2, 0.0  ;;  %v304_v8 = vld [vmem:[%s290_s12] sm:$0xff]  ;;  %v305_v9 = vld [vmem:[%s290_s12 + $0x8] sm:$0xff]  ;;  %s302_s15 = scalar_lea.vmem %s8644_s7, %s6462_s28 }
  0x13   : > { %448 = vadd.xlane.f32.xlu0 %v447_v3  ;;  %454 = vadd.xlane.f32.xlu1 %v453_v4  ;;  %v456_v7 = vsel %vm317_vm0, %v315_v5, 0.0  ;;  %v318_v10 = vsel %vm317_vm0, %v304_v8, 0.0  ;;  %v321_v11 = vsel %vm317_vm0, %v305_v9, 0.0  ;;  %v306_v12 = vld [vmem:[%s290_s12 + $0x10] sm:$0xff]  ;;  %v307_v13 = vld [vmem:[%s290_s12 + $0x18] sm:$0xff]  ;;  %v308_v16 = vld [vmem:[%s290_s12 + $0x20] sm:$0xff] }
  0x14   : > { %v324_v14 = vsel %vm317_vm0, %v306_v12, 0.0  ;;  %v327_v15 = vsel %vm317_vm0, %v307_v13, 0.0  ;;  %v309_v17 = vld [vmem:[%s290_s12 + $0x28] sm:$0xff]  ;;  %v330_v18 = vsel %vm317_vm0, %v308_v16, 0.0  ;;  %v7504_v20 = vld [vmem:[%s290_s12 + $0x30] sm:$0xff]  ;;  %v7506_v21 = vld [vmem:[%s290_s12 + $0x38] sm:$0xff] }
  0x15   : > { %v333_v19 = vsel %vm317_vm0, %v309_v17, 0.0  ;;  %v336_v22 = vsel %vm317_vm0, %v7504_v20, 0.0  ;;  %v339_v23 = vsel %vm317_vm0, %v7506_v21, 0.0  ;;  %s7433_s23 = smov 16   ;;  %s7434_s12 = smov 24  }
  0x17   : > { %451 = vadd.xlane.f32.xlu0 %v450_v6  ;;  %457 = vadd.xlane.f32.xlu1 %v456_v7 }
  0x1b   : > { %319 = vadd.xlane.f32.xlu0 %v318_v10  ;;  %322 = vadd.xlane.f32.xlu1 %v321_v11 }
  0x1f   : > { %325 = vadd.xlane.f32.xlu0 %v324_v14  ;;  %328 = vadd.xlane.f32.xlu1 %v327_v15 }
  0x23   : > { %331 = vadd.xlane.f32.xlu0 %v330_v18  ;;  %334 = vadd.xlane.f32.xlu1 %v333_v19 }
  0x27   : > { %337 = vadd.xlane.f32.xlu0 %v336_v22  ;;  %340 = vadd.xlane.f32.xlu1 %v339_v23  ;;  %v516_v22 = vld [vmem:[%s8640_s3 + $0x8] sm:$0xff]  ;;  %v515_v23 = vld [vmem:[%s8640_s3] sm:$0xff] }
  0x9c   : > { %v449_v24 = vpop.xlane.xlu0 %448  ;;  %v455_v25 = vpop.xlane.xlu1 %454 }
  0x9d   : > { %v459_v26 = vmul.f32 0.03125, %v449_v24  ;;  %v461_v27 = vmul.f32 0.03125, %v455_v25  ;;  %v7589_v24 = vld [vmem:[%s8641_s4 + $0x18] sm:$0xff] }
  0x9e   : > { %v772_v25 = vld [vmem:[%s8642_s5 + $0x18] sm:$0xff] }
  0x9f   : > { %v7512_v28 = vsub.f32 %v312_v0, %v459_v26  ;;  %v7514_v29 = vsub.f32 %v314_v1, %v461_v27  ;;  %6859 = vmatprep.subr.mxu0 %v772_v25  ;;  %v771_v26 = vld [vmem:[%s8642_s5 + $0x10] sm:$0xff]  ;;  %v770_v27 = vld [vmem:[%s8642_s5 + $0x8] sm:$0xff] }
  0xa0   : > { %v452_v30 = vpop.xlane.xlu0 %451  ;;  %v458_v31 = vpop.xlane.xlu1 %457  ;;  %6860 = vmatpush3.msra.mxu0 %v772_v25 }
  0xa1   : > { %v460_v32 = vmul.f32 0.03125, %v452_v30  ;;  %v462_v33 = vmul.f32 0.03125, %v458_v31  ;;  %v467_v34 = vmul.f32 %v7512_v28, %v7512_v28  ;;  %v469_v35 = vmul.f32 %v7514_v29, %v7514_v29  ;;  %6861 = vmatprep.subr.mxu0 %v771_v26  ;;  %v769_v30 = vld [vmem:[%s8642_s5] sm:$0xff] }
  0xa2   : > { %6862 = vmatpush3.msra.mxu0 %v771_v26 }
  0xa3   : > { %v7520_v36 = vsub.f32 %v313_v2, %v460_v32  ;;  %v7522_v37 = vsub.f32 %v315_v5, %v462_v33  ;;  %v471_v38 = vsel %vm317_vm0, %v467_v34, 0.0  ;;  %v477_v41 = vsel %vm317_vm0, %v469_v35, 0.0  ;;  %6863 = vmatprep.subr.mxu0 %v770_v27 }
  0xa4   : > { %472 = vadd.xlane.f32.xlu0 %v471_v38  ;;  %v320_v39 = vpop.xlane.xlu0 %319  ;;  %v323_v40 = vpop.xlane.xlu1 %322  ;;  %6864 = vmatpush3.msra.mxu0 %v770_v27 }
  0xa5   : > { %v343_v42 = vmul.f32 0.03125, %v320_v39  ;;  %v468_v43 = vmul.f32 %v7520_v36, %v7520_v36  ;;  %v344_v44 = vmul.f32 0.03125, %v323_v40  ;;  %v470_v45 = vmul.f32 %v7522_v37, %v7522_v37  ;;  %6865 = vmatprep.subr.mxu0 %v769_v30 }
  0xa6   : > { %6866 = vmatpush3.msra.mxu0 %v769_v30  ;;  %v423_v40 = vlaneseq }
  0xa7   : > { %v7530_v46 = vsub.f32 %v304_v8, %v343_v42  ;;  %v474_v47 = vsel %vm317_vm0, %v468_v43, 0.0  ;;  %v7533_v48 = vsub.f32 %v305_v9, %v344_v44  ;;  %v480_v50 = vsel %vm317_vm0, %v470_v45, 0.0 }
  0xa8   : > { %475 = vadd.xlane.f32.xlu1 %v474_v47  ;;  %478 = vadd.xlane.f32.xlu0 %v477_v41  ;;  %v326_v49 = vpop.xlane.xlu0 %325  ;;  %v329_v51 = vpop.xlane.xlu1 %328 }
  0xa9   : > { %v345_v52 = vmul.f32 0.03125, %v326_v49  ;;  %v346_v53 = vmul.f32 0.03125, %v329_v51  ;;  %v359_v54 = vmul.f32 %v7530_v46, %v7530_v46  ;;  %v360_v55 = vmul.f32 %v7533_v48, %v7533_v48 }
  0xaa   : > { %v424_v49 = vshrl.u32 %v423_v40, 7 }
  0xab   : > { %v7540_v56 = vsub.f32 %v306_v12, %v345_v52  ;;  %v7542_v57 = vsub.f32 %v307_v13, %v346_v53  ;;  %v367_v58 = vsel %vm317_vm0, %v359_v54, 0.0  ;;  %v370_v60 = vsel %vm317_vm0, %v360_v55, 0.0 }
  0xac   : > { %481 = vadd.xlane.f32.xlu1 %v480_v50  ;;  %368 = vadd.xlane.f32.xlu0 %v367_v58  ;;  %v332_v59 = vpop.xlane.xlu0 %331  ;;  %v335_v61 = vpop.xlane.xlu1 %334  ;;  %v501_v58 = vsub.s32 2, %v424_v49  ;;  %v437_v27 = vsub.s32 1, %v424_v49 }
  0xad   : > { %v347_v62 = vmul.f32 0.03125, %v332_v59  ;;  %v348_v63 = vmul.f32 0.03125, %v335_v61  ;;  %v361_v0 = vmul.f32 %v7540_v56, %v7540_v56  ;;  %v362_v1 = vmul.f32 %v7542_v57, %v7542_v57  ;;  %v316_v59 = vld [vmem:[%s8639_s2] sm:$0xf] }
  0xae   : > { %v438_v40 = vrot.slane %v316_v59, %v437_v27 }
  0xaf   : > { %v7550_v2 = vsub.f32 %v308_v16, %v347_v62  ;;  %v7552_v3 = vsub.f32 %v309_v17, %v348_v63  ;;  %v373_v4 = vsel %vm317_vm0, %v361_v0, 0.0  ;;  %v376_v6 = vsel %vm317_vm0, %v362_v1, 0.0 }
  0xb0   : > { %371 = vadd.xlane.f32.xlu1 %v370_v60  ;;  %374 = vadd.xlane.f32.xlu0 %v373_v4  ;;  %v338_v5 = vpop.xlane.xlu0 %337  ;;  %v341_v7 = vpop.xlane.xlu1 %340  ;;  %v509_v62 = vsub.s32 3, %v424_v49 }
  0xb1   : > { %v349_v8 = vmul.f32 0.03125, %v338_v5  ;;  %v350_v9 = vmul.f32 0.03125, %v341_v7  ;;  %v363_v10 = vmul.f32 %v7550_v2, %v7550_v2  ;;  %v364_v11 = vmul.f32 %v7552_v3, %v7552_v3 }
  0xb2   : > { %v502_v5 = vrot.slane %v316_v59, %v501_v58 }
  0xb3   : > { %v7561_v12 = vsub.f32 %v7504_v20, %v349_v8  ;;  %v7564_v13 = vsub.f32 %v7506_v21, %v350_v9  ;;  %v379_v14 = vsel %vm317_vm0, %v363_v10, 0.0  ;;  %v382_v15 = vsel %vm317_vm0, %v364_v11, 0.0  ;;  %v518_v20 = vld [vmem:[%s8640_s3 + $0x18] sm:$0xff]  ;;  %v517_v21 = vld [vmem:[%s8640_s3 + $0x10] sm:$0xff] }
  0xb4   : > { %377 = vadd.xlane.f32.xlu1 %v376_v6  ;;  %380 = vadd.xlane.f32.xlu0 %v379_v14  ;;  %v510_v10 = vrot.slane %v316_v59, %v509_v62 }
  0xb5   : > { %v365_v16 = vmul.f32 %v7561_v12, %v7561_v12  ;;  %v366_v17 = vmul.f32 %v7564_v13, %v7564_v13  ;;  %6819 = vmatprep.subr.mxu1 %v518_v20 }
  0xb6   : > { %6820 = vmatpush3.msra.mxu1 %v518_v20 }
  0xb7   : > { %v385_v18 = vsel %vm317_vm0, %v365_v16, 0.0  ;;  %v388_v19 = vsel %vm317_vm0, %v366_v17, 0.0  ;;  %6821 = vmatprep.subr.mxu1 %v517_v21 }
  0xb8   : > { %383 = vadd.xlane.f32.xlu1 %v382_v15  ;;  %386 = vadd.xlane.f32.xlu0 %v385_v18 }
  0xb9   : > { %6822 = vmatpush3.msra.mxu1 %v517_v21 }
  0xba   : > { %6823 = vmatprep.subr.mxu1 %v516_v22 }
  0xbb   : > { %6824 = vmatpush3.msra.mxu1 %v516_v22 }
  0xbc   : > { %389 = vadd.xlane.f32.xlu1 %v388_v19  ;;  %6825 = vmatprep.subr.mxu1 %v515_v23  ;;  %v425_v19 = vsub.s32 0, %v424_v49 }
  0xbd   : > { %6826 = vmatpush3.msra.mxu1 %v515_v23 }
  0xbe   : > { %6833 = vmatprep.subr.mxu1 %v7589_v24 }
 0x12d   : > { %v473_v31 = vpop.xlane.xlu0 %472 }
 0x12e   : > { %v483_v32 = vmul.f32 0.03125, %v473_v31 }
 0x130   : > { %v487_v33 = vadd.f32 1e-05, %v483_v32 }
 0x131   : > { %v476_v34 = vpop.xlane.xlu1 %475  ;;  %v479_v35 = vpop.xlane.xlu0 %478 }
 0x132   : > { %7299 = vrsqrt.f32 %v487_v33  ;;  %v484_v38 = vmul.f32 0.03125, %v476_v34  ;;  %v485_v39 = vmul.f32 0.03125, %v479_v35  ;;  %v7614_v33 = vrot.slane %v316_v59, %v425_v19 }
 0x134   : > { %v488_v41 = vadd.f32 1e-05, %v484_v38  ;;  %v489_v42 = vadd.f32 1e-05, %v485_v39 }
 0x135   : > { %v482_v43 = vpop.xlane.xlu1 %481  ;;  %v369_v44 = vpop.xlane.xlu0 %368 }
 0x136   : > { %7301 = vrsqrt.f32 %v488_v41  ;;  %v486_v45 = vmul.f32 0.03125, %v482_v43  ;;  %v391_v47 = vmul.f32 0.03125, %v369_v44 }
 0x137   : > { %7303 = vrsqrt.f32 %v489_v42 }
 0x138   : > { %v490_v50 = vadd.f32 1e-05, %v486_v45  ;;  %v399_v51 = vadd.f32 1e-05, %v391_v47 }
 0x139   : > { %v372_v52 = vpop.xlane.xlu1 %371  ;;  %v375_v53 = vpop.xlane.xlu0 %374 }
 0x13a   : > { %7305 = vrsqrt.f32 %v490_v50  ;;  %v392_v54 = vmul.f32 0.03125, %v372_v52  ;;  %v393_v55 = vmul.f32 0.03125, %v375_v53 }
 0x13b   : > { %7307 = vrsqrt.f32 %v399_v51  ;;  %v616_v51 = vld [vmem:[%s8641_s4] sm:$0xff] }
 0x13c   : > { %v400_v60 = vadd.f32 1e-05, %v392_v54  ;;  %v401_v61 = vadd.f32 1e-05, %v393_v55 }
 0x13d   : > { %v378_v63 = vpop.xlane.xlu1 %377  ;;  %v381_v0 = vpop.xlane.xlu0 %380 }
 0x13e   : > { %7309 = vrsqrt.f32 %v400_v60  ;;  %v394_v1 = vmul.f32 0.03125, %v378_v63  ;;  %v395_v4 = vmul.f32 0.03125, %v381_v0 }
 0x13f   : > { %v7300_v6 = vpop.eup %7299  ;;  %7311 = vrsqrt.f32 %v401_v61 }
 0x140   : > { %v402_v7 = vadd.f32 1e-05, %v394_v1  ;;  %v403_v8 = vadd.f32 1e-05, %v395_v4  ;;  %v495_v9 = vmul.f32 %v7300_v6, %v7512_v28 }
 0x141   : > { %v384_v11 = vpop.xlane.xlu1 %383  ;;  %v387_v14 = vpop.xlane.xlu0 %386 }
 0x142   : > { %7313 = vrsqrt.f32 %v402_v7  ;;  %v396_v15 = vmul.f32 0.03125, %v384_v11  ;;  %v397_v16 = vmul.f32 0.03125, %v387_v14  ;;  %v503_v17 = vmul.f32 %v502_v5, %v495_v9 }
 0x143   : > { %v7302_v18 = vpop.eup %7301  ;;  %7315 = vrsqrt.f32 %v403_v8 }
 0x144   : > { %v7304_v20 = vpop.eup %7303  ;;  %v404_v21 = vadd.f32 1e-05, %v396_v15  ;;  %v405_v22 = vadd.f32 1e-05, %v397_v16  ;;  %v7608_v23 = vadd.f32 %v510_v10, %v503_v17  ;;  %v496_v25 = vmul.f32 %v7302_v18, %v7520_v36 }
 0x145   : > { %v390_v26 = vpop.xlane.xlu1 %389  ;;  %v497_v28 = vmul.f32 %v7304_v20, %v7514_v29  ;;  %v618_v29 = vld [vmem:[%s8641_s4 + $0x10] sm:$0xff] }
 0x146   : > { %7317 = vrsqrt.f32 %v404_v21  ;;  %v398_v30 = vmul.f32 0.03125, %v390_v26  ;;  %6827 = vmatprep.mubr.msk.f32.mxu1 %vm317_vm0, %v7608_v23  ;;  %v504_v31 = vmul.f32 %v502_v5, %v496_v25 }
 0x147   : > { %v7306_v32 = vpop.eup %7305  ;;  %7319 = vrsqrt.f32 %v405_v22  ;;  %v505_v34 = vmul.f32 %v502_v5, %v497_v28 }
 0x148   : > { %v7308_v35 = vpop.eup %7307  ;;  %v406_v38 = vadd.f32 1e-05, %v398_v30  ;;  %v7616_v39 = vadd.f32 %v510_v10, %v504_v31  ;;  %v498_v36 = vmul.f32 %v7306_v32, %v7522_v37  ;;  %v617_v37 = vld [vmem:[%s8641_s4 + $0x8] sm:$0xff] }
 0x149   : > { %v7619_v41 = vadd.f32 %v510_v10, %v505_v34  ;;  %v415_v42 = vmul.f32 %v7308_v35, %v7530_v46 }
 0x14a   : > { %7321 = vrsqrt.f32 %v406_v38  ;;  %6828 = vmatmul.mubr.msk.f32.vlgmr.msra.gmra.mxu1 %vm317_vm0, %v7616_v39  ;;  %v506_v43 = vmul.f32 %v502_v5, %v498_v36 }
 0x14b   : > { %v7310_v44 = vpop.eup %7309  ;;  %6830 = vmatprep.mubr.msk.f32.mxu1 %vm317_vm0, %v7619_v41  ;;  %6834 = vmatpush3.msra.mxu1 %v7589_v24  ;;  %v427_v45 = vmul.f32 %v7614_v33, %v415_v42 }
 0x14c   : > { %v7312_v47 = vpop.eup %7311  ;;  %v416_v46 = vmul.f32 %v7310_v44, %v7533_v48  ;;  %6835 = vmatprep.subr.mxu1 %v618_v29  ;;  %v514_v49 = vadd.f32 %v510_v10, %v506_v43 }
 0x14d   : > { %6836 = vmatpush3.msra.mxu1 %v618_v29  ;;  %v439_v50 = vadd.f32 %v438_v40, %v427_v45  ;;  %v417_v52 = vmul.f32 %v7312_v47, %v7540_v56 }
 0x14e   : > { %6831 = vmatmul.mubr.msk.f32.gmra.mxu1 %vm317_vm0, %v514_v49  ;;  %6837 = vmatprep.subr.mxu1 %v617_v37  ;;  %v428_v24 = vmul.f32 %v7614_v33, %v416_v46 }
 0x14f   : > { %v7314_v53 = vpop.eup %7313  ;;  %6867 = vmatprep.mubr.msk.f32.mxu0 %vm317_vm0, %v439_v50  ;;  %6838 = vmatpush3.msra.mxu1 %v617_v37  ;;  %v429_v48 = vmul.f32 %v7614_v33, %v417_v52 }
 0x150   : > { %v7316_v54 = vpop.eup %7315  ;;  %6841 = vmatprep.mubr.msk.f32.mxu1 %vm317_vm0, %v439_v50  ;;  %6839 = vmatprep.subr.mxu1 %v616_v51  ;;  %v440_v55 = vadd.f32 %v438_v40, %v428_v24  ;;  %v418_v58 = vmul.f32 %v7314_v53, %v7542_v57 }
 0x151   : > { %6840 = vmatpush3.msra.mxu1 %v616_v51  ;;  %v441_v56 = vadd.f32 %v438_v40, %v429_v48  ;;  %v419_v59 = vmul.f32 %v7316_v54, %v7550_v2 }
 0x152   : > { %6842 = vmatmul.mubr.msk.f32.vlgmr.msra.gmra.mxu1 %vm317_vm0, %v440_v55  ;;  %6868 = vmatmul.mubr.msk.f32.vlgmr.msra.gmra.mxu0 %vm317_vm0, %v440_v55  ;;  %v430_v60 = vmul.f32 %v7614_v33, %v418_v58 }
 0x153   : > { %v7318_v61 = vpop.eup %7317  ;;  %6844 = vmatprep.mubr.msk.f32.mxu1 %vm317_vm0, %v441_v56  ;;  %6870 = vmatprep.mubr.msk.f32.mxu0 %vm317_vm0, %v441_v56  ;;  %v431_v62 = vmul.f32 %v7614_v33, %v419_v59 }
 0x154   : > { %v7320_v63 = vpop.eup %7319  ;;  %v442_v0 = vadd.f32 %v438_v40, %v430_v60  ;;  %v420_v57 = vmul.f32 %v7318_v61, %v7552_v3 }
 0x155   : > { %v443_v1 = vadd.f32 %v438_v40, %v431_v62  ;;  %v421_v2 = vmul.f32 %v7320_v63, %v7561_v12 }
 0x156   : > { %6845 = vmatmul.mubr.msk.f32.gmra.mxu1 %vm317_vm0, %v442_v0  ;;  %6871 = vmatmul.mubr.msk.f32.gmra.mxu0 %vm317_vm0, %v442_v0  ;;  %v432_v4 = vmul.f32 %v7614_v33, %v420_v57 }
 0x157   : > { %v7322_v5 = vpop.eup %7321  ;;  %6847 = vmatprep.mubr.msk.f32.mxu1 %vm317_vm0, %v443_v1  ;;  %6873 = vmatprep.mubr.msk.f32.mxu0 %vm317_vm0, %v443_v1  ;;  %v433_v6 = vmul.f32 %v7614_v33, %v421_v2 }
 0x158   : > { %v444_v7 = vadd.f32 %v438_v40, %v432_v4  ;;  %v422_v8 = vmul.f32 %v7322_v5, %v7564_v13  ;;  %v8645_v13 = vmov 0.0  }
 0x159   : > { %v445_v3 = vadd.f32 %v438_v40, %v433_v6  ;;  %6885 = vmatprep.subr.mxu1 %v8645_v13  ;;  %6892 = vmatprep.subr.mxu0 %v8645_v13 }
 0x15a   : > { %6848 = vmatmul.mubr.msk.f32.gmra.mxu1 %vm317_vm0, %v444_v7  ;;  %6874 = vmatmul.mubr.msk.f32.gmra.mxu0 %vm317_vm0, %v444_v7  ;;  %v434_v12 = vmul.f32 %v7614_v33, %v422_v8 }
 0x15b   : > { %6850 = vmatprep.mubr.msk.f32.mxu1 %vm317_vm0, %v445_v3  ;;  %6876 = vmatprep.mubr.msk.f32.mxu0 %vm317_vm0, %v445_v3 }
 0x15c   : > { %v446_v9 = vadd.f32 %v438_v40, %v434_v12 }
 0x15e   : > { %6851 = vmatmul.mubr.msk.f32.gmra.mxu1 %vm317_vm0, %v446_v9  ;;  %6877 = vmatmul.mubr.msk.f32.gmra.mxu0 %vm317_vm0, %v446_v9 }
 0x15f   : > { %6853 = vmatprep.mubr.msk.f32.mxu1 %vm317_vm0, %v7608_v23  ;;  %6879 = vmatprep.mubr.msk.f32.mxu0 %vm317_vm0, %v7608_v23 }
 0x162   : > { %6854 = vmatmul.mubr.msk.f32.gmra.mxu1 %vm317_vm0, %v7616_v39  ;;  %6880 = vmatmul.mubr.msk.f32.gmra.mxu0 %vm317_vm0, %v7616_v39 }
 0x163   : > { %6856 = vmatprep.mubr.msk.f32.mxu1 %vm317_vm0, %v7619_v41  ;;  %6882 = vmatprep.mubr.msk.f32.mxu0 %vm317_vm0, %v7619_v41 }
 0x166   : > { %6857 = vmatmul.mubr.msk.f32.gmra.mxu1 %vm317_vm0, %v514_v49  ;;  %6883 = vmatmul.mubr.msk.f32.gmra.mxu0 %vm317_vm0, %v514_v49 }
 0x167   : > { %6889 = vmatprep.mubr.msk.f32.mxu1 %vm7428_vm1, %v8645_v13  ;;  %6896 = vmatprep.mubr.msk.f32.mxu0 %vm7428_vm1, %v8645_v13 }
 0x20a   : > { %v7688_v10 = vpop.f32.mrf.mxu1 }
 0x20c   : > { %v7690_v11 = vpop.f32.mrf.mxu1 }
 0x20e   : > { %v7692_v14 = vpop.f32.mrf.mxu1 }
 0x210   : > { %v7694_v15 = vpop.f32.mrf.mxu1 }
 0x212   : > { %v7696_v16 = vpop.f32.mrf.mxu1  ;;  %v7698_v17 = vpop.f32.mrf.mxu0 }
 0x213   : > { %6886 = vmatpush3.xpose.msk.msra.mxu1 %vm898_vm2, %v7696_v16 }
 0x214   : > { %v7702_v18 = vpop.f32.mrf.mxu1  ;;  %v7704_v19 = vpop.f32.mrf.mxu0  ;;  %6887 = vmatprep.subr.mxu1 %v8645_v13 }
 0x216   : > { %v7707_v20 = vpop.f32.mrf.mxu1  ;;  %v7709_v21 = vpop.f32.mrf.mxu0 }
 0x217   : > { %6888 = vmatpush3.xpose.msk.msra.mxu1 %vm898_vm2, %v7702_v18  ;;  %6893 = vmatpush3.xpose.msk.msra.mxu0 %vm898_vm2, %v7707_v20 }
 0x218   : > { %v7715_v22 = vpop.f32.mrf.mxu1  ;;  %v7717_v23 = vpop.f32.mrf.mxu0  ;;  %6894 = vmatprep.subr.mxu0 %v8645_v13  ;;  %6899 = vmatprep.subr.mxu1 %v8645_v13 }
 0x21a   : > { %v7721_v25 = vpop.f32.mrf.mxu1  ;;  %v7723_v26 = vpop.f32.mrf.mxu0  ;;  %6890 = vmatmul.mubr.msk.f32.vlgmr.msra.gmra.mxu1 %vm898_vm2, %v7690_v11 }
 0x21b   : > { %6895 = vmatpush3.xpose.msk.msra.mxu0 %vm898_vm2, %v7715_v22  ;;  %6900 = vmatpush3.xpose.msk.msra.mxu1 %vm898_vm2, %v7721_v25 }
 0x21c   : > { %v7731_v27 = vpop.f32.mrf.mxu1  ;;  %v7733_v28 = vpop.f32.mrf.mxu0  ;;  %6901 = vmatprep.subr.mxu1 %v8645_v13  ;;  %6906 = vmatprep.subr.mxu0 %v8645_v13 }
 0x21d   : > { %6903 = vmatprep.mubr.msk.f32.mxu1 %vm7428_vm1, %v8645_v13 }
 0x21e   : > { %v7739_v30 = vpop.f32.mrf.mxu1  ;;  %6897 = vmatmul.mubr.msk.f32.vlgmr.msra.gmra.mxu0 %vm898_vm2, %v7688_v10  ;;  %v7747_v31 = vpop.f32.mrf.mxu0 }
 0x21f   : > { %6902 = vmatpush3.xpose.msk.msra.mxu1 %vm898_vm2, %v7731_v27  ;;  %6907 = vmatpush3.xpose.msk.msra.mxu0 %vm898_vm2, %v7739_v30 }
 0x220   : > { %v7749_v32 = vpop.f32.mrf.mxu1  ;;  %6908 = vmatprep.subr.mxu0 %v8645_v13  ;;  %6913 = vmatprep.subr.mxu1 %v8645_v13  ;;  %v7763_v34 = vpop.f32.mrf.mxu0 }
 0x221   : > { %6910 = vmatprep.mubr.msk.f32.mxu0 %vm7428_vm1, %v8645_v13 }
 0x222   : > { %v7755_v33 = vpop.f32.mrf.mxu1  ;;  %6904 = vmatmul.mubr.msk.f32.vlgmr.msra.gmra.mxu1 %vm898_vm2, %v7694_v15  ;;  %v7777_v39 = vpop.f32.mrf.mxu0 }
 0x223   : > { %6909 = vmatpush3.xpose.msk.msra.mxu0 %vm898_vm2, %v7749_v32  ;;  %6915 = vmatprep.mubr.msk.f32.mxu1 %vm7428_vm1, %v8645_v13 }
 0x224   : > { %v7765_v35 = vpop.f32.mrf.mxu1  ;;  %6923 = vmatprep.subr.mxu0 %v8645_v13  ;;  %v7791_v40 = vpop.f32.mrf.mxu0 }
 0x225   : > { %6914 = vmatpush3.xpose.msk.msra.mxu1 %vm898_vm2, %v7765_v35 }
 0x226   : > { %v7770_v38 = vpop.f32.mrf.mxu1  ;;  %6911 = vmatmul.mubr.msk.f32.vlgmr.msra.gmra.mxu0 %vm898_vm2, %v7692_v14  ;;  %6918 = vmatprep.subr.mxu1 %v8645_v13  ;;  %v7812_v41 = vpop.f32.mrf.mxu0 }
 0x227   : > { %6925 = vmatprep.mubr.msk.f32.mxu0 %vm7428_vm1, %v8645_v13 }
 0x228   : > { %v7779_v36 = vpop.f32.mrf.mxu1  ;;  %6916 = vmatmul.mubr.msk.f32.vlgmr.msra.gmra.mxu1 %vm898_vm2, %v7690_v11  ;;  %v7815_v43 = vpop.f32.mrf.mxu0 }
 0x229   : > { %6919 = vmatpush3.xpose.msk.msra.mxu1 %vm898_vm2, %v7755_v33  ;;  %6924 = vmatpush3.xpose.msk.msra.mxu0 %vm898_vm2, %v7779_v36 }
 0x22a   : > { %6920 = vmatprep.mubr.msk.f32.mxu1 %vm7428_vm1, %v8645_v13  ;;  %6928 = vmatprep.subr.mxu1 %v8645_v13 }
 0x22b   : > { %6933 = vmatprep.subr.mxu0 %v8645_v13 }
 0x22c   : > { %6921 = vmatmul.mubr.msk.f32.vlgmr.msra.gmra.mxu1 %vm898_vm2, %v7688_v10  ;;  %6926 = vmatmul.mubr.msk.f32.vlgmr.msra.gmra.mxu0 %vm898_vm2, %v7694_v15 }
 0x22d   : > { %6929 = vmatpush3.xpose.msk.msra.mxu1 %vm898_vm2, %v7770_v38  ;;  %6934 = vmatpush3.msra.mxu0 %v7791_v40 }
 0x22e   : > { %6930 = vmatprep.mubr.msk.f32.mxu1 %vm7428_vm1, %v8645_v13  ;;  %6938 = vmatprep.subr.mxu1 %v8645_v13 }
 0x22f   : > { %6935 = vmatprep.mubr.msk.f32.mxu0 %vm7428_vm1, %v8645_v13  ;;  %6943 = vmatprep.subr.mxu0 %v8645_v13 }
 0x230   : > { %6931 = vmatmul.mubr.msk.f32.vlgmr.msra.gmra.mxu1 %vm898_vm2, %v7692_v14 }
 0x231   : > { %6939 = vmatpush3.msra.mxu1 %v7777_v39  ;;  %6940 = vmatprep.mubr.msk.f32.mxu1 %vm7428_vm1, %v8645_v13 }
 0x232   : > { %6948 = vmatprep.subr.mxu1 %v8645_v13 }
 0x2da   : > { %v974_v29 = vpop.f32.mrf.mxu1 }
 0x2db   : > { %v1508_v42 = vsel %vm1507_vm3, %v974_v29, -inf }
 0x2dc   : > { %1509 = vmax.xlane.f32.xlu0 %v1508_v42  ;;  %v6891_v44 = vpop.f32.mrf.mxu1 }
 0x2de   : > { %v1053_v37 = vpop.f32.mrf.mxu0 }
 0x2df   : > { %v1511_v45 = vsel %vm1507_vm3, %v1053_v37, -inf }
 0x2e0   : > { %v6898_v47 = vpop.f32.mrf.mxu0  ;;  %1512 = vmax.xlane.f32.xlu0 %v1511_v45 }
 0x2e2   : > { %v1132_v46 = vpop.f32.mrf.mxu1 }
 0x2e3   : > { %v1514_v49 = vsel %vm1507_vm3, %v1132_v46, -inf }
 0x2e4   : > { %1515 = vmax.xlane.f32.xlu0 %v1514_v49  ;;  %v6905_v50 = vpop.f32.mrf.mxu1 }
 0x2e6   : > { %v1211_v51 = vpop.f32.mrf.mxu0 }
 0x2e7   : > { %v1517_v52 = vsel %vm1507_vm3, %v1211_v51, -inf }
 0x2e8   : > { %v6912_v24 = vpop.f32.mrf.mxu0  ;;  %1518 = vmax.xlane.f32.xlu0 %v1517_v52  ;;  %v1284_v53 = vpop.f32.mrf.mxu1 }
 0x2e9   : > { %v1520_v48 = vsel %vm898_vm2, %v1284_v53, -inf }
 0x2ea   : > { %1521 = vmax.xlane.f32.xlu1 %v1520_v48  ;;  %v6917_v54 = vpop.f32.mrf.mxu1 }
 0x2ec   : > { %v1357_v55 = vpop.f32.mrf.mxu1  ;;  %v1430_v58 = vpop.f32.mrf.mxu0 }
 0x2ed   : > { %v1523_v56 = vsel %vm898_vm2, %v1357_v55, -inf  ;;  %v1526_v62 = vsel %vm898_vm2, %v1430_v58, -inf }
 0x2ee   : > { %v6927_v59 = vpop.f32.mrf.mxu0  ;;  %1524 = vmax.xlane.f32.xlu1 %v1523_v56  ;;  %v6922_v60 = vpop.f32.mrf.mxu1 }
 0x2f0   : > { %v7822_v61 = vpop.f32.mrf.mxu1 }
 0x2f1   : > { %v1529_v0 = vsel %vm898_vm2, %v7822_v61, -inf }
 0x2f2   : > { %1527 = vmax.xlane.f32.xlu1 %v1526_v62  ;;  %v6932_v63 = vpop.f32.mrf.mxu1 }
 0x2f6   : > { %1530 = vmax.xlane.f32.xlu1 %v1529_v0 }
 0x365   : > { %v1510_v57 = vpop.xlane.xlu0 %1509 }
 0x369   : > { %v1513_v1 = vpop.xlane.xlu0 %1512 }
 0x36d   : > { %v1516_v9 = vpop.xlane.xlu0 %1515 }
 0x371   : > { %v1519_v48 = vpop.xlane.xlu0 %1518 }
 0x373   : > { %v1522_v2 = vpop.xlane.xlu1 %1521 }
 0x374   : > { %v1532_v4 = vmax.f32 %v1510_v57, %v1522_v2 }
 0x376   : > { %v1536_v5 = vsub.f32 %v974_v29, %v1532_v4  ;;  %v1548_v6 = vsub.f32 %v1284_v53, %v1532_v4 }
 0x377   : > { %v1525_v7 = vpop.xlane.xlu1 %1524 }
 0x378   : > { %v1540_v8 = vmul.f32 1.442695, %v1536_v5  ;;  %v1552_v3 = vmul.f32 1.442695, %v1548_v6  ;;  %v1533_v12 = vmax.f32 %v1513_v1, %v1525_v7 }
 0x37a   : > { %7323 = vpow2.f32 %v1540_v8  ;;  %v1537_v42 = vsub.f32 %v1053_v37, %v1533_v12  ;;  %v1549_v44 = vsub.f32 %v1357_v55, %v1533_v12 }
 0x37b   : > { %7325 = vpow2.f32 %v1552_v3  ;;  %v1528_v45 = vpop.xlane.xlu1 %1527 }
 0x37c   : > { %v1542_v47 = vmul.f32 1.442695, %v1537_v42  ;;  %v1554_v49 = vmul.f32 1.442695, %v1549_v44  ;;  %v1534_v50 = vmax.f32 %v1516_v9, %v1528_v45 }
 0x37e   : > { %7327 = vpow2.f32 %v1542_v47  ;;  %v1538_v52 = vsub.f32 %v1132_v46, %v1534_v50  ;;  %v1550_v24 = vsub.f32 %v1430_v58, %v1534_v50 }
 0x37f   : > { %7329 = vpow2.f32 %v1554_v49  ;;  %v1531_v29 = vpop.xlane.xlu1 %1530 }
 0x380   : > { %v1544_v53 = vmul.f32 1.442695, %v1538_v52  ;;  %v1556_v54 = vmul.f32 1.442695, %v1550_v24  ;;  %v1535_v56 = vmax.f32 %v1519_v48, %v1531_v29 }
 0x382   : > { %7331 = vpow2.f32 %v1544_v53  ;;  %v1539_v59 = vsub.f32 %v1211_v51, %v1535_v56  ;;  %v1551_v7 = vsub.f32 %v7822_v61, %v1535_v56 }
 0x383   : > { %7333 = vpow2.f32 %v1556_v54 }
 0x384   : > { %v1546_v60 = vmul.f32 1.442695, %v1539_v59  ;;  %v1558_v8 = vmul.f32 1.442695, %v1551_v7 }
 0x386   : > { %7335 = vpow2.f32 %v1546_v60 }
 0x387   : > { %v7827_v37 = vpop.eup %7323  ;;  %7337 = vpow2.f32 %v1558_v8 }
 0x388   : > { %v7326_v55 = vpop.eup %7325  ;;  %v1560_v62 = vsel %vm1507_vm3, %v7827_v37, 0.0 }
 0x389   : > { %1561 = vadd.xlane.f32.xlu0 %v1560_v62  ;;  %v1572_v46 = vsel %vm898_vm2, %v7326_v55, 0.0 }
 0x38a   : > { %1573 = vadd.xlane.f32.xlu1 %v1572_v46 }
 0x38b   : > { %v7832_v58 = vpop.eup %7327 }
 0x38c   : > { %v7330_v63 = vpop.eup %7329  ;;  %v1563_v0 = vsel %vm1507_vm3, %v7832_v58, 0.0 }
 0x38d   : > { %1564 = vadd.xlane.f32.xlu0 %v1563_v0  ;;  %v1575_v51 = vsel %vm898_vm2, %v7330_v63, 0.0 }
 0x38e   : > { %1576 = vadd.xlane.f32.xlu1 %v1575_v51 }
 0x38f   : > { %v7837_v57 = vpop.eup %7331 }
 0x390   : > { %v7334_v1 = vpop.eup %7333  ;;  %v1566_v2 = vsel %vm1507_vm3, %v7837_v57, 0.0 }
 0x391   : > { %1567 = vadd.xlane.f32.xlu0 %v1566_v2  ;;  %v1578_v4 = vsel %vm898_vm2, %v7334_v1, 0.0 }
 0x392   : > { %1579 = vadd.xlane.f32.xlu1 %v1578_v4 }
 0x393   : > { %v7842_v5 = vpop.eup %7335 }
 0x394   : > { %v1569_v6 = vsel %vm1507_vm3, %v7842_v5, 0.0  ;;  %v7865_v3 = vpop.eup %7337 }
 0x395   : > { %1570 = vadd.xlane.f32.xlu0 %v1569_v6  ;;  %v1581_v61 = vsel %vm898_vm2, %v7865_v3, 0.0 }
 0x3a3   : > { %2274 = vrot.lane.b32.xlu1 %v7707_v20, %s7429_s19 }
 0x3a7   : > { %2190 = vrot.lane.b32.xlu1 %v7702_v18, %s7429_s19 }
 0x3ab   : > { %2192 = vrot.lane.b32.xlu0 %v7696_v16, %s7429_s19 }
 0x3af   : > { %2188 = vrot.lane.b32.xlu0 %v7690_v11, %s7429_s19 }
 0x3b3   : > { %2270 = vrot.lane.b32.xlu0 %v7688_v10, %s7429_s19 }
 0x3b7   : > { %2354 = vrot.lane.b32.xlu0 %v7731_v27, %s7429_s19 }
 0x3bb   : > { %2352 = vrot.lane.b32.xlu0 %v7694_v15, %s7429_s19 }
 0x3bf   : > { %2516 = vrot.lane.b32.xlu0 %v7765_v35, %s7429_s19 }
 0x3c3   : > { %2664 = vrot.lane.b32.xlu0 %v7779_v36, %s7429_s19 }
 0x3cb   : > { %1582 = vadd.xlane.f32.xlu1 %v1581_v61 }
 0x3dc   : > { %2272 = vrot.lane.b32.xlu1 %v7715_v22, %s7429_s19 }
 0x3e0   : > { %2356 = vrot.lane.b32.xlu1 %v7721_v25, %s7429_s19 }
 0x3e4   : > { %2438 = vrot.lane.b32.xlu1 %v7739_v30, %s7429_s19 }
 0x3e8   : > { %2436 = vrot.lane.b32.xlu1 %v7749_v32, %s7429_s19 }
 0x3ec   : > { %2434 = vrot.lane.b32.xlu1 %v7692_v14, %s7429_s19 }
 0x3f0   : > { %2590 = vrot.lane.b32.xlu1 %v7755_v33, %s7429_s19 }
 0x3f4   : > { %2738 = vrot.lane.b32.xlu1 %v7770_v38, %s7429_s19 }
 0x412   : > { %v1562_v12 = vpop.xlane.xlu0 %1561 }
 0x413   : > { %v1574_v9 = vpop.xlane.xlu1 %1573 }
 0x414   : > { %v1584_v42 = vadd.f32 %v1574_v9, %v1562_v12 }
 0x416   : > { %7339 = vrcp.f32 %v1584_v42  ;;  %v1565_v44 = vpop.xlane.xlu0 %1564 }
 0x417   : > { %v1577_v45 = vpop.xlane.xlu1 %1576 }
 0x418   : > { %v1585_v47 = vadd.f32 %v1577_v45, %v1565_v44 }
 0x41a   : > { %7341 = vrcp.f32 %v1585_v47  ;;  %v1568_v49 = vpop.xlane.xlu0 %1567 }
 0x41b   : > { %v1580_v50 = vpop.xlane.xlu1 %1579 }
 0x41c   : > { %v1586_v52 = vadd.f32 %v1580_v50, %v1568_v49 }
 0x41e   : > { %7343 = vrcp.f32 %v1586_v52  ;;  %v1571_v59 = vpop.xlane.xlu0 %1570 }
 0x422   : > { %v2193_v46 = vpop.permute.xlu0 %2192 }
 0x423   : > { %v7340_v24 = vpop.eup %7339 }
 0x424   : > { %v1600_v48 = vmul.f32 %v7340_v24, %v7326_v55  ;;  %v1596_v60 = vmul.f32 %v7340_v24, %v7827_v37  ;;  %v2275_v55 = vpop.permute.xlu1 %2274 }
 0x426   : > { %6936 = vmatmul.mubr.msk.f32.vlgmr.msra.gmra.mxu0 %vm898_vm2, %v1600_v48 }
 0x427   : > { %v7884_v29 = vpop.eup %7341  ;;  %6944 = vmatpush3.msra.mxu0 %v7815_v43  ;;  %6945 = vmatprep.mubr.msk.f32.mxu0 %vm7428_vm1, %v8645_v13 }
 0x428   : > { %v1601_v53 = vmul.f32 %v7884_v29, %v7330_v63  ;;  %6953 = vmatprep.subr.mxu0 %v8645_v13  ;;  %v2191_v37 = vpop.permute.xlu1 %2190  ;;  %v2189_v63 = vpop.permute.xlu0 %2188  ;;  %v1597_v9 = vmul.f32 %v7884_v29, %v7832_v58 }
 0x42a   : > { %6941 = vmatmul.mubr.msk.f32.vlgmr.msra.gmra.mxu1 %vm898_vm2, %v1601_v53 }
 0x42b   : > { %v7344_v54 = vpop.eup %7343  ;;  %6949 = vmatpush3.msra.mxu1 %v7812_v41  ;;  %6950 = vmatprep.mubr.msk.f32.mxu1 %vm7428_vm1, %v8645_v13 }
 0x42c   : > { %v1602_v56 = vmul.f32 %v7344_v54, %v7334_v1  ;;  %6960 = vmatprep.subr.mxu1 %v8645_v13  ;;  %v1598_v62 = vmul.f32 %v7344_v54, %v7837_v57  ;;  %v2271_v0 = vpop.permute.xlu0 %2270 }
 0x42e   : > { %6946 = vmatmul.mubr.msk.f32.vlgmr.msra.gmra.mxu0 %vm898_vm2, %v1602_v56 }
 0x42f   : > { %6954 = vmatpush3.msra.mxu0 %v7698_v17  ;;  %6957 = vmatprep.mubr.msk.f32.mxu0 %vm7428_vm1, %v8645_v13 }
 0x430   : > { %6955 = vmatprep.subr.mxu0 %v8645_v13  ;;  %v2355_v1 = vpop.permute.xlu0 %2354 }
 0x431   : > { %6956 = vmatpush3.msra.mxu0 %v7704_v19 }
 0x432   : > { %6967 = vmatprep.subr.mxu0 %v8645_v13  ;;  %6958 = vmatmul.mubr.msk.f32.vlgmr.msra.gmra.mxu0 %vm1507_vm3, %v1596_v60 }
 0x433   : > { %6968 = vmatpush3.msra.mxu0 %v7723_v26  ;;  %6971 = vmatprep.mubr.msk.f32.mxu0 %vm7428_vm1, %v8645_v13 }
 0x434   : > { %6969 = vmatprep.subr.mxu0 %v8645_v13  ;;  %v2353_v4 = vpop.permute.xlu0 %2352 }
 0x435   : > { %6970 = vmatpush3.msra.mxu0 %v7733_v28 }
 0x436   : > { %6981 = vmatprep.subr.mxu0 %v8645_v13  ;;  %6972 = vmatmul.mubr.msk.f32.vlgmr.msra.gmra.mxu0 %vm1507_vm3, %v1598_v62 }
 0x437   : > { %6982 = vmatpush3.xpose.msk.msra.mxu0 %vm898_vm2, %v2193_v46  ;;  %6985 = vmatprep.mubr.msk.f32.mxu0 %vm7428_vm1, %v8645_v13 }
 0x438   : > { %6983 = vmatprep.subr.mxu0 %v8645_v13  ;;  %v2517_v7 = vpop.permute.xlu0 %2516 }
 0x43b   : > { %6984 = vmatpush3.xpose.msk.msra.mxu0 %vm898_vm2, %v2191_v37 }
 0x43c   : > { %6995 = vmatprep.subr.mxu0 %v8645_v13  ;;  %v2665_v12 = vpop.permute.xlu0 %2664 }
 0x43e   : > { %6986 = vmatmul.mubr.msk.f32.vlgmr.msra.gmra.mxu0 %vm898_vm2, %v2189_v63 }
 0x43f   : > { %6999 = vmatprep.mubr.msk.f32.mxu0 %vm7428_vm1, %v8645_v13 }
 0x454   : > { %v1583_v51 = vpop.xlane.xlu1 %1582 }
 0x455   : > { %v1587_v57 = vadd.f32 %v1583_v51, %v1571_v59 }
 0x457   : > { %7345 = vrcp.f32 %v1587_v57 }
 0x458   : > { %v2273_v2 = vpop.permute.xlu1 %2272 }
 0x45c   : > { %v2357_v6 = vpop.permute.xlu1 %2356 }
 0x45d   : > { %6996 = vmatpush3.xpose.msk.msra.mxu0 %vm898_vm2, %v2357_v6 }
 0x45e   : > { %6997 = vmatprep.subr.mxu0 %v8645_v13 }
 0x461   : > { %6998 = vmatpush3.xpose.msk.msra.mxu0 %vm898_vm2, %v2355_v1 }
 0x462   : > { %7009 = vmatprep.subr.mxu0 %v8645_v13 }
 0x464   : > { %v7346_v8 = vpop.eup %7345  ;;  %7000 = vmatmul.mubr.msk.f32.vlgmr.msra.gmra.mxu0 %vm898_vm2, %v2353_v4 }
 0x465   : > { %7010 = vmatpush3.xpose.msk.msra.mxu0 %vm898_vm2, %v2517_v7  ;;  %v1603_v61 = vmul.f32 %v7346_v8, %v7865_v3  ;;  %7011 = vmatprep.mubr.msk.f32.mxu0 %vm7428_vm1, %v8645_v13  ;;  %v2439_v3 = vpop.permute.xlu1 %2438  ;;  %v1599_v58 = vmul.f32 %v7346_v8, %v7842_v5 }
 0x466   : > { %7019 = vmatprep.subr.mxu0 %v8645_v13 }
 0x467   : > { %6951 = vmatmul.mubr.msk.f32.vlgmr.msra.gmra.mxu1 %vm898_vm2, %v1603_v61 }
 0x468   : > { %6961 = vmatpush3.msra.mxu1 %v7709_v21  ;;  %7012 = vmatmul.mubr.msk.f32.vlgmr.msra.gmra.mxu0 %vm898_vm2, %v2189_v63 }
 0x469   : > { %6962 = vmatprep.subr.mxu1 %v8645_v13  ;;  %7020 = vmatpush3.xpose.msk.msra.mxu0 %vm898_vm2, %v2665_v12  ;;  %v2437_v42 = vpop.permute.xlu1 %2436 }
 0x46a   : > { %6963 = vmatpush3.msra.mxu1 %v7717_v23  ;;  %6964 = vmatprep.mubr.msk.f32.mxu1 %vm7428_vm1, %v8645_v13 }
 0x46b   : > { %6974 = vmatprep.subr.mxu1 %v8645_v13  ;;  %6965 = vmatmul.mubr.msk.f32.vlgmr.msra.gmra.mxu1 %vm1507_vm3, %v1597_v9 }
 0x46c   : > { %6975 = vmatpush3.msra.mxu1 %v7747_v31  ;;  %7021 = vmatprep.mubr.msk.f32.mxu0 %vm7428_vm1, %v8645_v13 }
 0x46d   : > { %6976 = vmatprep.subr.mxu1 %v8645_v13  ;;  %7022 = vmatmul.mubr.msk.f32.vlgmr.msra.gmra.mxu0 %vm898_vm2, %v2353_v4  ;;  %v2435_v5 = vpop.permute.xlu1 %2434 }
 0x46e   : > { %6977 = vmatpush3.msra.mxu1 %v7763_v34  ;;  %6978 = vmatprep.mubr.msk.f32.mxu1 %vm7428_vm1, %v8645_v13 }
 0x46f   : > { %6988 = vmatprep.subr.mxu1 %v8645_v13  ;;  %6979 = vmatmul.mubr.msk.f32.vlgmr.msra.gmra.mxu1 %vm1507_vm3, %v1599_v58 }
 0x470   : > { %6989 = vmatpush3.xpose.msk.msra.mxu1 %vm898_vm2, %v2275_v55  ;;  %6992 = vmatprep.mubr.msk.f32.mxu1 %vm7428_vm1, %v8645_v13 }
 0x471   : > { %6990 = vmatprep.subr.mxu1 %v8645_v13  ;;  %7029 = vmatprep.subr.mxu0 %v8645_v13  ;;  %v2591_v44 = vpop.permute.xlu1 %2590 }
 0x472   : > { %7031 = vmatprep.mubr.msk.f32.mxu0 %vm7428_vm1, %v8645_v13 }
 0x474   : > { %6991 = vmatpush3.xpose.msk.msra.mxu1 %vm898_vm2, %v2273_v2 }
 0x475   : > { %7002 = vmatprep.subr.mxu1 %v8645_v13  ;;  %v2739_v45 = vpop.permute.xlu1 %2738 }
 0x477   : > { %6993 = vmatmul.mubr.msk.f32.vlgmr.msra.gmra.mxu1 %vm898_vm2, %v2271_v0 }
 0x478   : > { %7003 = vmatpush3.xpose.msk.msra.mxu1 %vm898_vm2, %v2439_v3  ;;  %7006 = vmatprep.mubr.msk.f32.mxu1 %vm7428_vm1, %v8645_v13 }
 0x479   : > { %7004 = vmatprep.subr.mxu1 %v8645_v13 }
 0x47c   : > { %7005 = vmatpush3.xpose.msk.msra.mxu1 %vm898_vm2, %v2437_v42 }
 0x47d   : > { %7014 = vmatprep.subr.mxu1 %v8645_v13 }
 0x47f   : > { %7007 = vmatmul.mubr.msk.f32.vlgmr.msra.gmra.mxu1 %vm898_vm2, %v2435_v5 }
 0x480   : > { %7015 = vmatpush3.xpose.msk.msra.mxu1 %vm898_vm2, %v2591_v44  ;;  %7016 = vmatprep.mubr.msk.f32.mxu1 %vm7428_vm1, %v8645_v13 }
 0x481   : > { %7024 = vmatprep.subr.mxu1 %v8645_v13 }
 0x483   : > { %7017 = vmatmul.mubr.msk.f32.vlgmr.msra.gmra.mxu1 %vm898_vm2, %v2271_v0 }
 0x484   : > { %7025 = vmatpush3.xpose.msk.msra.mxu1 %vm898_vm2, %v2739_v45  ;;  %7026 = vmatprep.mubr.msk.f32.mxu1 %vm7428_vm1, %v8645_v13 }
 0x485   : > { %7034 = vmatprep.subr.mxu1 %v8645_v13 }
 0x487   : > { %7027 = vmatmul.mubr.msk.f32.vlgmr.msra.gmra.mxu1 %vm898_vm2, %v2435_v5 }
 0x488   : > { %7036 = vmatprep.mubr.msk.f32.mxu1 %vm7428_vm1, %v8645_v13 }
 0x4e6   : > { %v1673_v47 = vpop.f32.mrf.mxu0 }
 0x4e8   : > { %v6937_v49 = vpop.f32.mrf.mxu0 }
 0x4ea   : > { %v1746_v50 = vpop.f32.mrf.mxu1 }
 0x4ec   : > { %v6942_v52 = vpop.f32.mrf.mxu1 }
 0x4ee   : > { %v1819_v24 = vpop.f32.mrf.mxu0 }
 0x4f0   : > { %v6947_v48 = vpop.f32.mrf.mxu0 }
 0x4f2   : > { %v1965_v29 = vpop.f32.mrf.mxu0 }
 0x4f3   : > { %v7984_v53 = vadd.f32 %v1965_v29, %v1673_v47 }
 0x4f4   : > { %v6959_v54 = vpop.f32.mrf.mxu0 }
 0x4f6   : > { %v2111_v56 = vpop.f32.mrf.mxu0 }
 0x4f7   : > { %v7986_v59 = vadd.f32 %v2111_v56, %v1819_v24 }
 0x4f8   : > { %v6973_v60 = vpop.f32.mrf.mxu0 }
 0x4fe   : > { %v2266_v55 = vpop.f32.mrf.mxu0 }
 0x4ff   : > { %v2812_v62 = vsel %vm1507_vm3, %v2266_v55, -inf }
 0x500   : > { %2813 = vmax.xlane.f32.xlu0 %v2812_v62  ;;  %v6987_v46 = vpop.f32.mrf.mxu0 }
 0x524   : > { %v7989_v37 = vpop.f32.mrf.mxu0 }
 0x525   : > { %v2818_v44 = vsel %vm1507_vm3, %v7989_v37, -inf }
 0x526   : > { %v7001_v63 = vpop.f32.mrf.mxu0 }
 0x527   : > { %v1892_v0 = vpop.f32.mrf.mxu1 }
 0x528   : > { %v2586_v51 = vpop.f32.mrf.mxu0 }
 0x529   : > { %v6952_v57 = vpop.f32.mrf.mxu1  ;;  %v2824_v1 = vsel %vm898_vm2, %v2586_v51, -inf }
 0x52a   : > { %2825 = vmax.xlane.f32.xlu1 %v2824_v1  ;;  %v7013_v2 = vpop.f32.mrf.mxu0 }
 0x52b   : > { %v2038_v4 = vpop.f32.mrf.mxu1 }
 0x52c   : > { %v7992_v6 = vadd.f32 %v2038_v4, %v1746_v50 }
 0x52d   : > { %v7994_v7 = vpop.f32.mrf.mxu0  ;;  %v6966_v8 = vpop.f32.mrf.mxu1 }
 0x52e   : > { %v2830_v54 = vsel %vm898_vm2, %v7994_v7, -inf }
 0x52f   : > { %v7023_v61 = vpop.f32.mrf.mxu0  ;;  %v2184_v12 = vpop.f32.mrf.mxu1 }
 0x530   : > { %v7996_v9 = vadd.f32 %v2184_v12, %v1892_v0 }
 0x531   : > { %v6980_v3 = vpop.f32.mrf.mxu1 }
 0x532   : > { %8647 = vst [vmem:[#allocation2_spill] sm:$0xff] %v7996_v9 }
 0x537   : > { %v2348_v58 = vpop.f32.mrf.mxu1 }
 0x538   : > { %v2815_v42 = vsel %vm1507_vm3, %v2348_v58, -inf }
 0x539   : > { %2816 = vmax.xlane.f32.xlu0 %v2815_v42  ;;  %v6994_v5 = vpop.f32.mrf.mxu1 }
 0x53b   : > { %2986 = vrot.lane.b32.xlu1 %v7777_v39, %s7429_s19 }
 0x53d   : > { %2819 = vmax.xlane.f32.xlu0 %v2818_v44 }
 0x53f   : > { %v8003_v45 = vpop.f32.mrf.mxu1  ;;  %3063 = vrot.lane.b32.xlu1 %v7815_v43, %s7429_s19 }
 0x540   : > { %v2821_v48 = vsel %vm1507_vm3, %v8003_v45, -inf }
 0x541   : > { %v7008_v47 = vpop.f32.mrf.mxu1 }
 0x543   : > { %v2660_v49 = vpop.f32.mrf.mxu1  ;;  %3140 = vrot.lane.b32.xlu1 %v7812_v41, %s7429_s19 }
 0x544   : > { %v2827_v50 = vsel %vm898_vm2, %v2660_v49, -inf }
 0x545   : > { %2828 = vmax.xlane.f32.xlu0 %v2827_v50  ;;  %v7018_v52 = vpop.f32.mrf.mxu1 }
 0x547   : > { %v8010_v24 = vpop.f32.mrf.mxu1  ;;  %3301 = vrot.lane.b32.xlu1 %v7709_v21, %s7429_s19 }
 0x548   : > { %v2833_v56 = vsel %vm898_vm2, %v8010_v24, -inf }
 0x549   : > { %2822 = vmax.xlane.f32.xlu0 %v2821_v48  ;;  %v7028_v29 = vpop.f32.mrf.mxu1 }
 0x54b   : > { %3299 = vrot.lane.b32.xlu1 %v7717_v23, %s7429_s19 }
 0x54f   : > { %3463 = vrot.lane.b32.xlu1 %v7747_v31, %s7429_s19 }
 0x55f   : > { %2909 = vrot.lane.b32.xlu0 %v7791_v40, %s7429_s19 }
 0x563   : > { %3220 = vrot.lane.b32.xlu0 %v7698_v17, %s7429_s19 }
 0x567   : > { %3218 = vrot.lane.b32.xlu0 %v7704_v19, %s7429_s19 }
 0x56b   : > { %3382 = vrot.lane.b32.xlu0 %v7723_v26, %s7429_s19 }
 0x56f   : > { %3380 = vrot.lane.b32.xlu0 %v7733_v28, %s7429_s19 }
 0x573   : > { %2831 = vmax.xlane.f32.xlu1 %v2830_v54 }
 0x577   : > { %2834 = vmax.xlane.f32.xlu1 %v2833_v56 }
 0x588   : > { %3461 = vrot.lane.b32.xlu1 %v7763_v34, %s7429_s19 }
 0x589   : > { %v2814_v60 = vpop.xlane.xlu0 %2813 }
 0x5b3   : > { %v2826_v62 = vpop.xlane.xlu1 %2825 }
 0x5b4   : > { %v2836_v46 = vmax.f32 %v2814_v60, %v2826_v62 }
 0x5b6   : > { %v2840_v63 = vsub.f32 %v2266_v55, %v2836_v46  ;;  %v2852_v0 = vsub.f32 %v2586_v51, %v2836_v46 }
 0x5b7   : > { %v2987_v57 = vpop.permute.xlu1 %2986 }
 0x5b8   : > { %v2844_v1 = vmul.f32 1.442695, %v2840_v63  ;;  %v2856_v2 = vmul.f32 1.442695, %v2852_v0  ;;  %7035 = vmatpush3.msra.mxu1 %v2987_v57 }
 0x5b9   : > { %7044 = vmatprep.subr.mxu1 %v8645_v13 }
 0x5ba   : > { %7347 = vpow2.f32 %v2844_v1 }
 0x5bb   : > { %7349 = vpow2.f32 %v2856_v2  ;;  %v8046_v29 = vpop.permute.xlu1 %3063 }
 0x5c2   : > { %v2817_v4 = vpop.xlane.xlu0 %2816 }
 0x5c6   : > { %v2820_v51 = vpop.xlane.xlu0 %2819 }
 0x5c7   : > { %v8037_v8 = vpop.eup %7347 }
 0x5c8   : > { %v8039_v61 = vpop.eup %7349  ;;  %v2864_v12 = vsel %vm1507_vm3, %v8037_v8, 0.0 }
 0x5c9   : > { %2865 = vadd.xlane.f32.xlu0 %v2864_v12  ;;  %v2876_v55 = vsel %vm898_vm2, %v8039_v61, 0.0 }
 0x5ca   : > { %2877 = vadd.xlane.f32.xlu1 %v2876_v55 }
 0x5ce   : > { %v2829_v3 = vpop.xlane.xlu0 %2828 }
 0x5cf   : > { %v2837_v42 = vmax.f32 %v2817_v4, %v2829_v3 }
 0x5d1   : > { %v2841_v5 = vsub.f32 %v2348_v58, %v2837_v42  ;;  %v2853_v44 = vsub.f32 %v2660_v49, %v2837_v42  ;;  %v8056_v49 = vpop.permute.xlu1 %3140 }
 0x5d2   : > { %v2823_v47 = vpop.xlane.xlu0 %2822 }
 0x5d3   : > { %v2846_v50 = vmul.f32 1.442695, %v2841_v5  ;;  %v2858_v52 = vmul.f32 1.442695, %v2853_v44 }
 0x5d5   : > { %7351 = vpow2.f32 %v2846_v50  ;;  %v8058_v62 = vpop.permute.xlu1 %3301 }
 0x5d6   : > { %7353 = vpow2.f32 %v2858_v52  ;;  %v2910_v48 = vpop.permute.xlu0 %2909 }
 0x5d7   : > { %7030 = vmatpush3.msra.mxu0 %v2910_v48 }
 0x5d8   : > { %7039 = vmatprep.subr.mxu0 %v8645_v13 }
 0x5d9   : > { %v8060_v46 = vpop.permute.xlu1 %3299 }
 0x5da   : > { %v3221_v48 = vpop.permute.xlu0 %3220 }
 0x5dd   : > { %v8062_v63 = vpop.permute.xlu1 %3463 }
 0x5e2   : > { %v8048_v54 = vpop.eup %7351 }
 0x5e3   : > { %v8050_v56 = vpop.eup %7353  ;;  %v2867_v60 = vsel %vm1507_vm3, %v8048_v54, 0.0 }
 0x5e4   : > { %2868 = vadd.xlane.f32.xlu0 %v2867_v60  ;;  %v2879_v58 = vsel %vm898_vm2, %v8050_v56, 0.0  ;;  %v3219_v60 = vpop.permute.xlu0 %3218 }
 0x5e5   : > { %2880 = vadd.xlane.f32.xlu1 %v2879_v58 }
 0x5fc   : > { %v2832_v0 = vpop.xlane.xlu1 %2831 }
 0x5fd   : > { %v2838_v57 = vmax.f32 %v2820_v51, %v2832_v0  ;;  %v3383_v0 = vpop.permute.xlu0 %3382 }
 0x5ff   : > { %v2842_v1 = vsub.f32 %v7989_v37, %v2838_v57  ;;  %v2854_v2 = vsub.f32 %v7994_v7, %v2838_v57 }
 0x600   : > { %v2835_v4 = vpop.xlane.xlu1 %2834 }
 0x601   : > { %v2848_v12 = vmul.f32 1.442695, %v2842_v1  ;;  %v2860_v55 = vmul.f32 1.442695, %v2854_v2  ;;  %v2839_v3 = vmax.f32 %v2823_v47, %v2835_v4  ;;  %v3381_v57 = vpop.permute.xlu0 %3380 }
 0x603   : > { %7355 = vpow2.f32 %v2848_v12  ;;  %v2843_v42 = vsub.f32 %v8003_v45, %v2839_v3  ;;  %v2855_v45 = vsub.f32 %v8010_v24, %v2839_v3 }
 0x604   : > { %7357 = vpow2.f32 %v2860_v55  ;;  %v8099_v1 = vpop.permute.xlu1 %3461 }
 0x605   : > { %v2850_v5 = vmul.f32 1.442695, %v2843_v42  ;;  %v2862_v52 = vmul.f32 1.442695, %v2855_v45 }
 0x607   : > { %7359 = vpow2.f32 %v2850_v5 }
 0x608   : > { %7361 = vpow2.f32 %v2862_v52 }
 0x610   : > { %v8067_v44 = vpop.eup %7355 }
 0x611   : > { %v7358_v50 = vpop.eup %7357  ;;  %v2870_v51 = vsel %vm1507_vm3, %v8067_v44, 0.0 }
 0x612   : > { %2871 = vadd.xlane.f32.xlu0 %v2870_v51  ;;  %v2882_v37 = vsel %vm898_vm2, %v7358_v50, 0.0 }
 0x613   : > { %2883 = vadd.xlane.f32.xlu1 %v2882_v37 }
 0x614   : > { %v8072_v7 = vpop.eup %7359 }
 0x615   : > { %v2873_v47 = vsel %vm1507_vm3, %v8072_v7, 0.0  ;;  %v8091_v24 = vpop.eup %7361 }
 0x616   : > { %2874 = vadd.xlane.f32.xlu0 %v2873_v47  ;;  %v2885_v58 = vsel %vm898_vm2, %v8091_v24, 0.0 }
 0x624   : > { %3626 = vrot.lane.b32.xlu1 %v7707_v20, %s7430_s20 }
 0x62c   : > { %3544 = vrot.lane.b32.xlu0 %v7696_v16, %s7430_s20 }
 0x630   : > { %3542 = vrot.lane.b32.xlu0 %v7702_v18, %s7430_s20 }
 0x634   : > { %3540 = vrot.lane.b32.xlu0 %v7690_v11, %s7430_s20 }
 0x638   : > { %3622 = vrot.lane.b32.xlu0 %v7688_v10, %s7430_s20 }
 0x63c   : > { %3706 = vrot.lane.b32.xlu0 %v7731_v27, %s7430_s20 }
 0x640   : > { %3704 = vrot.lane.b32.xlu0 %v7694_v15, %s7430_s20 }
 0x644   : > { %3868 = vrot.lane.b32.xlu0 %v7765_v35, %s7430_s20 }
 0x648   : > { %2886 = vadd.xlane.f32.xlu1 %v2885_v58  ;;  %4016 = vrot.lane.b32.xlu0 %v7779_v36, %s7430_s20 }
 0x652   : > { %v2866_v2 = vpop.xlane.xlu0 %2865 }
 0x653   : > { %v2878_v4 = vpop.xlane.xlu1 %2877 }
 0x654   : > { %v2888_v12 = vadd.f32 %v2878_v4, %v2866_v2 }
 0x656   : > { %7363 = vrcp.f32 %v2888_v12 }
 0x659   : > { %3624 = vrot.lane.b32.xlu1 %v7715_v22, %s7430_s20 }
 0x65d   : > { %3708 = vrot.lane.b32.xlu1 %v7721_v25, %s7430_s20 }
 0x661   : > { %3790 = vrot.lane.b32.xlu1 %v7739_v30, %s7430_s20 }
 0x663   : > { %v7364_v55 = vpop.eup %7363 }
 0x664   : > { %v2904_v3 = vmul.f32 %v7364_v55, %v8039_v61 }
 0x665   : > { %3788 = vrot.lane.b32.xlu1 %v7749_v32, %s7430_s20 }
 0x666   : > { %7032 = vmatmul.mubr.msk.f32.vlgmr.msra.gmra.mxu0 %vm898_vm2, %v2904_v3 }
 0x667   : > { %7040 = vmatpush3.msra.mxu0 %v8046_v29  ;;  %7041 = vmatprep.mubr.msk.f32.mxu0 %vm7428_vm1, %v8645_v13 }
 0x668   : > { %7049 = vmatprep.subr.mxu0 %v8645_v13 }
 0x669   : > { %3786 = vrot.lane.b32.xlu1 %v7692_v14, %s7430_s20 }
 0x66d   : > { %v2869_v42 = vpop.xlane.xlu0 %2868  ;;  %3942 = vrot.lane.b32.xlu1 %v7755_v33, %s7430_s20 }
 0x66e   : > { %v2881_v61 = vpop.xlane.xlu1 %2880 }
 0x66f   : > { %v2889_v5 = vadd.f32 %v2881_v61, %v2869_v42 }
 0x671   : > { %7365 = vrcp.f32 %v2889_v5  ;;  %4090 = vrot.lane.b32.xlu1 %v7770_v38, %s7430_s20 }
 0x67e   : > { %v8121_v51 = vpop.eup %7365 }
 0x67f   : > { %v2905_v29 = vmul.f32 %v8121_v51, %v8050_v56  ;;  %v2900_v56 = vmul.f32 %v7364_v55, %v8037_v8 }
 0x681   : > { %7037 = vmatmul.mubr.msk.f32.vlgmr.msra.gmra.mxu1 %vm898_vm2, %v2905_v29 }
 0x682   : > { %7045 = vmatpush3.msra.mxu1 %v8056_v49  ;;  %7046 = vmatprep.mubr.msk.f32.mxu1 %vm7428_vm1, %v8645_v13 }
 0x683   : > { %7056 = vmatprep.subr.mxu1 %v8645_v13 }
 0x69b   : > { %v2872_v37 = vpop.xlane.xlu0 %2871 }
 0x69c   : > { %v2884_v47 = vpop.xlane.xlu1 %2883 }
 0x69d   : > { %v2890_v45 = vadd.f32 %v2884_v47, %v2872_v37  ;;  %v2901_v37 = vmul.f32 %v8121_v51, %v8048_v54 }
 0x69f   : > { %7367 = vrcp.f32 %v2890_v45  ;;  %v2875_v58 = vpop.xlane.xlu0 %2874 }
 0x6a3   : > { %v3545_v49 = vpop.permute.xlu0 %3544 }
 0x6a7   : > { %v3543_v8 = vpop.permute.xlu0 %3542 }
 0x6ac   : > { %v7368_v52 = vpop.eup %7367 }
 0x6ad   : > { %v2906_v2 = vmul.f32 %v7368_v52, %v7358_v50  ;;  %v2902_v50 = vmul.f32 %v7368_v52, %v8067_v44  ;;  %v3627_v44 = vpop.permute.xlu1 %3626 }
 0x6af   : > { %7042 = vmatmul.mubr.msk.f32.vlgmr.msra.gmra.mxu0 %vm898_vm2, %v2906_v2 }
 0x6b0   : > { %7050 = vmatpush3.msra.mxu0 %v3221_v48  ;;  %7053 = vmatprep.mubr.msk.f32.mxu0 %vm7428_vm1, %v8645_v13  ;;  %v3541_v48 = vpop.permute.xlu0 %3540 }
 0x6b1   : > { %7051 = vmatprep.subr.mxu0 %v8645_v13 }
 0x6b2   : > { %7052 = vmatpush3.msra.mxu0 %v3219_v60 }
 0x6b3   : > { %7063 = vmatprep.subr.mxu0 %v8645_v13  ;;  %7054 = vmatmul.mubr.msk.f32.vlgmr.msra.gmra.mxu0 %vm1507_vm3, %v2900_v56 }
 0x6b4   : > { %7064 = vmatpush3.msra.mxu0 %v3383_v0  ;;  %7067 = vmatprep.mubr.msk.f32.mxu0 %vm7428_vm1, %v8645_v13  ;;  %v3623_v60 = vpop.permute.xlu0 %3622 }
 0x6b5   : > { %7065 = vmatprep.subr.mxu0 %v8645_v13 }
 0x6b6   : > { %7066 = vmatpush3.msra.mxu0 %v3381_v57 }
 0x6b7   : > { %7077 = vmatprep.subr.mxu0 %v8645_v13  ;;  %7068 = vmatmul.mubr.msk.f32.vlgmr.msra.gmra.mxu0 %vm1507_vm3, %v2902_v50 }
 0x6b8   : > { %7078 = vmatpush3.xpose.msk.msra.mxu0 %vm898_vm2, %v3545_v49  ;;  %7081 = vmatprep.mubr.msk.f32.mxu0 %vm7428_vm1, %v8645_v13  ;;  %v3707_v4 = vpop.permute.xlu0 %3706 }
 0x6b9   : > { %7079 = vmatprep.subr.mxu0 %v8645_v13 }
 0x6bc   : > { %7080 = vmatpush3.xpose.msk.msra.mxu0 %vm898_vm2, %v3543_v8  ;;  %v3705_v55 = vpop.permute.xlu0 %3704 }
 0x6bd   : > { %7091 = vmatprep.subr.mxu0 %v8645_v13 }
 0x6bf   : > { %7082 = vmatmul.mubr.msk.f32.vlgmr.msra.gmra.mxu0 %vm898_vm2, %v3541_v48 }
 0x6c0   : > { %7095 = vmatprep.mubr.msk.f32.mxu0 %vm7428_vm1, %v8645_v13  ;;  %v3869_v42 = vpop.permute.xlu0 %3868 }
 0x6c4   : > { %v4017_v29 = vpop.permute.xlu0 %4016 }
 0x6d1   : > { %v2887_v0 = vpop.xlane.xlu1 %2886 }
 0x6d2   : > { %v2891_v57 = vadd.f32 %v2887_v0, %v2875_v58 }
 0x6d4   : > { %7369 = vrcp.f32 %v2891_v57 }
 0x6d5   : > { %v3625_v12 = vpop.permute.xlu1 %3624 }
 0x6d9   : > { %v3709_v3 = vpop.permute.xlu1 %3708 }
 0x6da   : > { %7092 = vmatpush3.xpose.msk.msra.mxu0 %vm898_vm2, %v3709_v3 }
 0x6db   : > { %7093 = vmatprep.subr.mxu0 %v8645_v13 }
 0x6de   : > { %7094 = vmatpush3.xpose.msk.msra.mxu0 %vm898_vm2, %v3707_v4 }
 0x6df   : > { %7105 = vmatprep.subr.mxu0 %v8645_v13 }
 0x6e1   : > { %v7370_v61 = vpop.eup %7369  ;;  %7096 = vmatmul.mubr.msk.f32.vlgmr.msra.gmra.mxu0 %vm898_vm2, %v3705_v55 }
 0x6e2   : > { %7106 = vmatpush3.xpose.msk.msra.mxu0 %vm898_vm2, %v3869_v42  ;;  %v2907_v5 = vmul.f32 %v7370_v61, %v8091_v24  ;;  %7107 = vmatprep.mubr.msk.f32.mxu0 %vm7428_vm1, %v8645_v13  ;;  %v3791_v24 = vpop.permute.xlu1 %3790  ;;  %v2903_v54 = vmul.f32 %v7370_v61, %v8072_v7 }
 0x6e3   : > { %7115 = vmatprep.subr.mxu0 %v8645_v13 }
 0x6e4   : > { %7047 = vmatmul.mubr.msk.f32.vlgmr.msra.gmra.mxu1 %vm898_vm2, %v2907_v5 }
 0x6e5   : > { %7057 = vmatpush3.msra.mxu1 %v8058_v62  ;;  %7108 = vmatmul.mubr.msk.f32.vlgmr.msra.gmra.mxu0 %vm898_vm2, %v3541_v48 }
 0x6e6   : > { %7058 = vmatprep.subr.mxu1 %v8645_v13  ;;  %7116 = vmatpush3.xpose.msk.msra.mxu0 %vm898_vm2, %v4017_v29  ;;  %v3789_v62 = vpop.permute.xlu1 %3788 }
 0x6e7   : > { %7059 = vmatpush3.msra.mxu1 %v8060_v46  ;;  %7060 = vmatprep.mubr.msk.f32.mxu1 %vm7428_vm1, %v8645_v13 }
 0x6e8   : > { %7070 = vmatprep.subr.mxu1 %v8645_v13  ;;  %7061 = vmatmul.mubr.msk.f32.vlgmr.msra.gmra.mxu1 %vm1507_vm3, %v2901_v37 }
 0x6e9   : > { %7071 = vmatpush3.msra.mxu1 %v8062_v63  ;;  %7117 = vmatprep.mubr.msk.f32.mxu0 %vm7428_vm1, %v8645_v13 }
 0x6ea   : > { %7072 = vmatprep.subr.mxu1 %v8645_v13  ;;  %7118 = vmatmul.mubr.msk.f32.vlgmr.msra.gmra.mxu0 %vm898_vm2, %v3705_v55  ;;  %v3787_v46 = vpop.permute.xlu1 %3786 }
 0x6eb   : > { %7073 = vmatpush3.msra.mxu1 %v8099_v1  ;;  %7074 = vmatprep.mubr.msk.f32.mxu1 %vm7428_vm1, %v8645_v13 }
 0x6ec   : > { %7084 = vmatprep.subr.mxu1 %v8645_v13  ;;  %7075 = vmatmul.mubr.msk.f32.vlgmr.msra.gmra.mxu1 %vm1507_vm3, %v2903_v54 }
 0x6ed   : > { %7085 = vmatpush3.xpose.msk.msra.mxu1 %vm898_vm2, %v3627_v44  ;;  %7088 = vmatprep.mubr.msk.f32.mxu1 %vm7428_vm1, %v8645_v13 }
 0x6ee   : > { %7086 = vmatprep.subr.mxu1 %v8645_v13  ;;  %7125 = vmatprep.subr.mxu0 %v8645_v13  ;;  %v3943_v63 = vpop.permute.xlu1 %3942 }
 0x6ef   : > { %7127 = vmatprep.mubr.msk.f32.mxu0 %vm7428_vm1, %v8645_v13 }
 0x6f1   : > { %7087 = vmatpush3.xpose.msk.msra.mxu1 %vm898_vm2, %v3625_v12 }
 0x6f2   : > { %7098 = vmatprep.subr.mxu1 %v8645_v13  ;;  %v4091_v7 = vpop.permute.xlu1 %4090 }
 0x6f4   : > { %7089 = vmatmul.mubr.msk.f32.vlgmr.msra.gmra.mxu1 %vm898_vm2, %v3623_v60 }
 0x6f5   : > { %7099 = vmatpush3.xpose.msk.msra.mxu1 %vm898_vm2, %v3791_v24  ;;  %7102 = vmatprep.mubr.msk.f32.mxu1 %vm7428_vm1, %v8645_v13 }
 0x6f6   : > { %7100 = vmatprep.subr.mxu1 %v8645_v13 }
 0x6f9   : > { %7101 = vmatpush3.xpose.msk.msra.mxu1 %vm898_vm2, %v3789_v62 }
 0x6fa   : > { %7110 = vmatprep.subr.mxu1 %v8645_v13 }
 0x6fc   : > { %7103 = vmatmul.mubr.msk.f32.vlgmr.msra.gmra.mxu1 %vm898_vm2, %v3787_v46 }
 0x6fd   : > { %7111 = vmatpush3.xpose.msk.msra.mxu1 %vm898_vm2, %v3943_v63  ;;  %7112 = vmatprep.mubr.msk.f32.mxu1 %vm7428_vm1, %v8645_v13 }
 0x6fe   : > { %7120 = vmatprep.subr.mxu1 %v8645_v13 }
 0x700   : > { %7113 = vmatmul.mubr.msk.f32.vlgmr.msra.gmra.mxu1 %vm898_vm2, %v3623_v60 }
 0x701   : > { %7121 = vmatpush3.xpose.msk.msra.mxu1 %vm898_vm2, %v4091_v7  ;;  %7122 = vmatprep.mubr.msk.f32.mxu1 %vm7428_vm1, %v8645_v13 }
 0x702   : > { %7130 = vmatprep.subr.mxu1 %v8645_v13 }
 0x704   : > { %7123 = vmatmul.mubr.msk.f32.vlgmr.msra.gmra.mxu1 %vm898_vm2, %v3787_v46 }
 0x705   : > { %7132 = vmatprep.mubr.msk.f32.mxu1 %vm7428_vm1, %v8645_v13 }
 0x726   : > { %v8214_v1 = vpop.f32.mrf.mxu0 }
 0x728   : > { %v7033_v51 = vpop.f32.mrf.mxu0 }
 0x741   : > { %v8216_v47 = vpop.f32.mrf.mxu1 }
 0x743   : > { %v7038_v45 = vpop.f32.mrf.mxu1 }
 0x76f   : > { %v3135_v52 = vpop.f32.mrf.mxu0 }
 0x771   : > { %v7043_v58 = vpop.f32.mrf.mxu0 }
 0x773   : > { %v8218_v2 = vpop.f32.mrf.mxu0 }
 0x775   : > { %v7055_v56 = vpop.f32.mrf.mxu0 }
 0x777   : > { %v3455_v49 = vpop.f32.mrf.mxu0 }
 0x778   : > { %v8220_v50 = vadd.f32 %v3455_v49, %v3135_v52 }
 0x779   : > { %v7069_v8 = vpop.f32.mrf.mxu0 }
 0x77f   : > { %v3618_v48 = vpop.f32.mrf.mxu0 }
 0x780   : > { %v4164_v44 = vsel %vm1507_vm3, %v3618_v48, -inf }
 0x781   : > { %4165 = vmax.xlane.f32.xlu0 %v4164_v44  ;;  %v7083_v60 = vpop.f32.mrf.mxu0 }
 0x7a1   : > { %v8223_v0 = vpop.f32.mrf.mxu0 }
 0x7a2   : > { %v4170_v51 = vsel %vm1507_vm3, %v8223_v0, -inf }
 0x7a3   : > { %v7097_v57 = vpop.f32.mrf.mxu0 }
 0x7a4   : > { %v3212_v4 = vpop.f32.mrf.mxu1 }
 0x7a5   : > { %v3938_v12 = vpop.f32.mrf.mxu0 }
 0x7a6   : > { %v7048_v55 = vpop.f32.mrf.mxu1  ;;  %v4176_v3 = vsel %vm898_vm2, %v3938_v12, -inf }
 0x7a7   : > { %4177 = vmax.xlane.f32.xlu1 %v4176_v3  ;;  %v7109_v42 = vpop.f32.mrf.mxu0 }
 0x7a8   : > { %v8226_v61 = vpop.f32.mrf.mxu1 }
 0x7aa   : > { %v8228_v5 = vpop.f32.mrf.mxu0  ;;  %v7062_v29 = vpop.f32.mrf.mxu1 }
 0x7ab   : > { %v4182_v57 = vsel %vm898_vm2, %v8228_v5, -inf }
 0x7ac   : > { %v7119_v37 = vpop.f32.mrf.mxu0  ;;  %v3536_v24 = vpop.f32.mrf.mxu1 }
 0x7ad   : > { %v8230_v54 = vadd.f32 %v3536_v24, %v3212_v4 }
 0x7ae   : > { %v7076_v62 = vpop.f32.mrf.mxu1 }
 0x7b4   : > { %v3700_v46 = vpop.f32.mrf.mxu1 }
 0x7b5   : > { %v4167_v63 = vsel %vm1507_vm3, %v3700_v46, -inf }
 0x7b6   : > { %4168 = vmax.xlane.f32.xlu0 %v4167_v63  ;;  %v7090_v7 = vpop.f32.mrf.mxu1 }
 0x7b8   : > { %4336 = vrot.lane.b32.xlu1 %v7777_v39, %s7430_s20 }
 0x7ba   : > { %4171 = vmax.xlane.f32.xlu0 %v4170_v51 }
 0x7bc   : > { %v8237_v45 = vpop.f32.mrf.mxu1  ;;  %4412 = vrot.lane.b32.xlu1 %v7815_v43, %s7430_s20 }
 0x7bd   : > { %v4173_v44 = vsel %vm1507_vm3, %v8237_v45, -inf }
 0x7be   : > { %v7104_v52 = vpop.f32.mrf.mxu1 }
 0x7c0   : > { %v4012_v58 = vpop.f32.mrf.mxu1  ;;  %4488 = vrot.lane.b32.xlu1 %v7812_v41, %s7430_s20 }
 0x7c1   : > { %v4179_v56 = vsel %vm898_vm2, %v4012_v58, -inf }
 0x7c2   : > { %4180 = vmax.xlane.f32.xlu0 %v4179_v56  ;;  %v7114_v49 = vpop.f32.mrf.mxu1 }
 0x7c4   : > { %v8244_v8 = vpop.f32.mrf.mxu1  ;;  %4645 = vrot.lane.b32.xlu1 %v7709_v21, %s7430_s20 }
 0x7c5   : > { %v4185_v4 = vsel %vm898_vm2, %v8244_v8, -inf }
 0x7c6   : > { %4174 = vmax.xlane.f32.xlu0 %v4173_v44  ;;  %v7124_v60 = vpop.f32.mrf.mxu1 }
 0x7c8   : > { %4643 = vrot.lane.b32.xlu1 %v7717_v23, %s7430_s20 }
 0x7cc   : > { %4803 = vrot.lane.b32.xlu1 %v7747_v31, %s7430_s20 }
 0x7dc   : > { %4260 = vrot.lane.b32.xlu0 %v7791_v40, %s7430_s20 }
 0x7e0   : > { %4566 = vrot.lane.b32.xlu0 %v7698_v17, %s7430_s20 }
 0x7e4   : > { %4564 = vrot.lane.b32.xlu0 %v7704_v19, %s7430_s20 }
 0x7e8   : > { %4724 = vrot.lane.b32.xlu0 %v7723_v26, %s7430_s20 }
 0x7ec   : > { %4722 = vrot.lane.b32.xlu0 %v7733_v28, %s7430_s20 }
 0x7f0   : > { %4183 = vmax.xlane.f32.xlu1 %v4182_v57 }
 0x7f4   : > { %4186 = vmax.xlane.f32.xlu1 %v4185_v4 }
 0x805   : > { %4801 = vrot.lane.b32.xlu1 %v7763_v34, %s7430_s20 }
 0x80a   : > { %v4166_v55 = vpop.xlane.xlu0 %4165 }
 0x830   : > { %v4178_v3 = vpop.xlane.xlu1 %4177 }
 0x831   : > { %v4188_v42 = vmax.f32 %v4166_v55, %v4178_v3 }
 0x833   : > { %v4192_v29 = vsub.f32 %v3618_v48, %v4188_v42  ;;  %v4204_v37 = vsub.f32 %v3938_v12, %v4188_v42 }
 0x834   : > { %v4337_v24 = vpop.permute.xlu1 %4336 }
 0x835   : > { %v4196_v62 = vmul.f32 1.442695, %v4192_v29  ;;  %v4208_v63 = vmul.f32 1.442695, %v4204_v37  ;;  %7131 = vmatpush3.msra.mxu1 %v4337_v24 }
 0x836   : > { %7140 = vmatprep.subr.mxu1 %v8645_v13 }
 0x837   : > { %7371 = vpow2.f32 %v4196_v62 }
 0x838   : > { %7373 = vpow2.f32 %v4208_v63  ;;  %v8280_v29 = vpop.permute.xlu1 %4412 }
 0x83f   : > { %v4169_v7 = vpop.xlane.xlu0 %4168 }
 0x843   : > { %v4172_v12 = vpop.xlane.xlu0 %4171 }
 0x844   : > { %v8271_v51 = vpop.eup %7371 }
 0x845   : > { %v8273_v52 = vpop.eup %7373  ;;  %v4216_v56 = vsel %vm1507_vm3, %v8271_v51, 0.0 }
 0x846   : > { %4217 = vadd.xlane.f32.xlu0 %v4216_v56  ;;  %v4228_v48 = vsel %vm898_vm2, %v8273_v52, 0.0 }
 0x847   : > { %4229 = vadd.xlane.f32.xlu1 %v4228_v48 }
 0x84b   : > { %v4181_v49 = vpop.xlane.xlu0 %4180 }
 0x84c   : > { %v4189_v44 = vmax.f32 %v4169_v7, %v4181_v49 }
 0x84e   : > { %v4193_v60 = vsub.f32 %v3700_v46, %v4189_v44  ;;  %v4205_v57 = vsub.f32 %v4012_v58, %v4189_v44  ;;  %v8290_v58 = vpop.permute.xlu1 %4488 }
 0x84f   : > { %v4175_v4 = vpop.xlane.xlu0 %4174 }
 0x850   : > { %v4198_v55 = vmul.f32 1.442695, %v4193_v60  ;;  %v4210_v3 = vmul.f32 1.442695, %v4205_v57 }
 0x852   : > { %7375 = vpow2.f32 %v4198_v55  ;;  %v8292_v63 = vpop.permute.xlu1 %4645 }
 0x853   : > { %7377 = vpow2.f32 %v4210_v3  ;;  %v4261_v42 = vpop.permute.xlu0 %4260 }
 0x854   : > { %7126 = vmatpush3.msra.mxu0 %v4261_v42 }
 0x855   : > { %7135 = vmatprep.subr.mxu0 %v8645_v13 }
 0x856   : > { %v8294_v7 = vpop.permute.xlu1 %4643 }
 0x85a   : > { %v8296_v56 = vpop.permute.xlu1 %4803 }
 0x85f   : > { %v8282_v37 = vpop.eup %7375 }
 0x860   : > { %v8284_v24 = vpop.eup %7377  ;;  %v4219_v62 = vsel %vm1507_vm3, %v8282_v37, 0.0 }
 0x861   : > { %4220 = vadd.xlane.f32.xlu0 %v4219_v62  ;;  %v4231_v46 = vsel %vm898_vm2, %v8284_v24, 0.0 }
 0x862   : > { %4232 = vadd.xlane.f32.xlu1 %v4231_v46 }
 0x879   : > { %v4184_v48 = vpop.xlane.xlu1 %4183 }
 0x87a   : > { %v4190_v49 = vmax.f32 %v4172_v12, %v4184_v48 }
 0x87c   : > { %v4194_v44 = vsub.f32 %v8223_v0, %v4190_v49  ;;  %v4206_v60 = vsub.f32 %v8228_v5, %v4190_v49  ;;  %v4567_v49 = vpop.permute.xlu0 %4566 }
 0x87d   : > { %v4187_v57 = vpop.xlane.xlu1 %4186 }
 0x87e   : > { %v4200_v55 = vmul.f32 1.442695, %v4194_v44  ;;  %v4212_v3 = vmul.f32 1.442695, %v4206_v60  ;;  %v4191_v42 = vmax.f32 %v4175_v4, %v4187_v57 }
 0x880   : > { %7379 = vpow2.f32 %v4200_v55  ;;  %v4195_v62 = vsub.f32 %v8237_v45, %v4191_v42  ;;  %v4207_v45 = vsub.f32 %v8244_v8, %v4191_v42 }
 0x881   : > { %7381 = vpow2.f32 %v4212_v3  ;;  %v8333_v8 = vpop.permute.xlu1 %4801 }
 0x882   : > { %v4202_v46 = vmul.f32 1.442695, %v4195_v62  ;;  %v4214_v48 = vmul.f32 1.442695, %v4207_v45 }
 0x884   : > { %7383 = vpow2.f32 %v4202_v46 }
 0x885   : > { %7385 = vpow2.f32 %v4214_v48 }
 0x88d   : > { %v8301_v13 = vpop.eup %7379 }
 0x88e   : > { %v7382_v9 = vpop.eup %7381  ;;  %v4222_v12 = vsel %vm1507_vm3, %v8301_v13, 0.0 }
 0x88f   : > { %4223 = vadd.xlane.f32.xlu0 %v4222_v12  ;;  %v4234_v0 = vsel %vm898_vm2, %v7382_v9, 0.0 }
 0x890   : > { %4235 = vadd.xlane.f32.xlu1 %v4234_v0 }
 0x891   : > { %v8306_v5 = vpop.eup %7383 }
 0x892   : > { %v4225_v4 = vsel %vm1507_vm3, %v8306_v5, 0.0 }
 0x893   : > { %4226 = vadd.xlane.f32.xlu0 %v4225_v4 }
 0x8a1   : > { %4966 = vrot.lane.b32.xlu1 %v7707_v20, %s7431_s21  ;;  %v8325_v20 = vpop.eup %7385 }
 0x8a9   : > { %4884 = vrot.lane.b32.xlu0 %v7696_v16, %s7431_s21  ;;  %v4565_v16 = vpop.permute.xlu0 %4564 }
 0x8ad   : > { %4882 = vrot.lane.b32.xlu0 %v7702_v18, %s7431_s21  ;;  %v4725_v18 = vpop.permute.xlu0 %4724 }
 0x8b1   : > { %4880 = vrot.lane.b32.xlu0 %v7690_v11, %s7431_s21  ;;  %v4237_v11 = vsel %vm898_vm2, %v8325_v20, 0.0 }
 0x8b5   : > { %4962 = vrot.lane.b32.xlu0 %v7688_v10, %s7431_s21  ;;  %v4723_v10 = vpop.permute.xlu0 %4722 }
 0x8b9   : > { %5046 = vrot.lane.b32.xlu0 %v7731_v27, %s7431_s21 }
 0x8bd   : > { %5044 = vrot.lane.b32.xlu0 %v7694_v15, %s7431_s21 }
 0x8c1   : > { %5208 = vrot.lane.b32.xlu0 %v7765_v35, %s7431_s21 }
 0x8c5   : > { %4238 = vadd.xlane.f32.xlu1 %v4237_v11  ;;  %5356 = vrot.lane.b32.xlu0 %v7779_v36, %s7431_s21  ;;  %v8648_v36 = vmov 0.0  }
 0x8cf   : > { %v4218_v27 = vpop.xlane.xlu0 %4217 }
 0x8d0   : > { %v4230_v44 = vpop.xlane.xlu1 %4229 }
 0x8d1   : > { %v4240_v15 = vadd.f32 %v4230_v44, %v4218_v27 }
 0x8d3   : > { %7387 = vrcp.f32 %v4240_v15 }
 0x8d6   : > { %4964 = vrot.lane.b32.xlu1 %v7715_v22, %s7431_s21 }
 0x8da   : > { %5048 = vrot.lane.b32.xlu1 %v7721_v25, %s7431_s21 }
 0x8de   : > { %5130 = vrot.lane.b32.xlu1 %v7739_v30, %s7431_s21 }
 0x8e0   : > { %v7388_v35 = vpop.eup %7387 }
 0x8e1   : > { %v4256_v60 = vmul.f32 %v7388_v35, %v8273_v52 }
 0x8e2   : > { %5128 = vrot.lane.b32.xlu1 %v7749_v32, %s7431_s21 }
 0x8e3   : > { %7128 = vmatmul.mubr.msk.f32.vlgmr.msra.gmra.mxu0 %vm898_vm2, %v4256_v60 }
 0x8e4   : > { %7136 = vmatpush3.msra.mxu0 %v8280_v29  ;;  %7137 = vmatprep.mubr.msk.f32.mxu0 %vm7428_vm1, %v8648_v36 }
 0x8e5   : > { %7145 = vmatprep.subr.mxu0 %v8648_v36 }
 0x8e6   : > { %5126 = vrot.lane.b32.xlu1 %v7692_v14, %s7431_s21 }
 0x8ea   : > { %v4221_v22 = vpop.xlane.xlu0 %4220  ;;  %5282 = vrot.lane.b32.xlu1 %v7755_v33, %s7431_s21 }
 0x8eb   : > { %v4233_v25 = vpop.xlane.xlu1 %4232 }
 0x8ec   : > { %v4241_v30 = vadd.f32 %v4233_v25, %v4221_v22 }
 0x8ee   : > { %7389 = vrcp.f32 %v4241_v30  ;;  %5430 = vrot.lane.b32.xlu1 %v7770_v38, %s7431_s21 }
 0x8fb   : > { %v8355_v32 = vpop.eup %7389 }
 0x8fc   : > { %v4257_v52 = vmul.f32 %v8355_v32, %v8284_v24  ;;  %v4252_v24 = vmul.f32 %v7388_v35, %v8271_v51 }
 0x8fe   : > { %7133 = vmatmul.mubr.msk.f32.vlgmr.msra.gmra.mxu1 %vm898_vm2, %v4257_v52 }
 0x8ff   : > { %7141 = vmatpush3.msra.mxu1 %v8290_v58  ;;  %7142 = vmatprep.mubr.msk.f32.mxu1 %vm7428_vm1, %v8648_v36 }
 0x900   : > { %7152 = vmatprep.subr.mxu1 %v8648_v36 }
 0x918   : > { %v4224_v14 = vpop.xlane.xlu0 %4223 }
 0x919   : > { %v4236_v33 = vpop.xlane.xlu1 %4235 }
 0x91a   : > { %v4242_v29 = vadd.f32 %v4236_v33, %v4224_v14 }
 0x91c   : > { %7391 = vrcp.f32 %v4242_v29  ;;  %v4227_v38 = vpop.xlane.xlu0 %4226 }
 0x920   : > { %v4885_v58 = vpop.permute.xlu0 %4884 }
 0x924   : > { %v4883_v51 = vpop.permute.xlu0 %4882 }
 0x928   : > { %v4881_v3 = vpop.permute.xlu0 %4880 }
 0x929   : > { %v7392_v57 = vpop.eup %7391 }
 0x92a   : > { %v4258_v55 = vmul.f32 %v7392_v57, %v7382_v9  ;;  %v4254_v9 = vmul.f32 %v7392_v57, %v8301_v13  ;;  %v4967_v13 = vpop.permute.xlu1 %4966 }
 0x92c   : > { %7138 = vmatmul.mubr.msk.f32.vlgmr.msra.gmra.mxu0 %vm898_vm2, %v4258_v55  ;;  %v4963_v42 = vpop.permute.xlu0 %4962 }
 0x92d   : > { %7146 = vmatpush3.msra.mxu0 %v4567_v49  ;;  %7149 = vmatprep.mubr.msk.f32.mxu0 %vm7428_vm1, %v8648_v36 }
 0x92e   : > { %7147 = vmatprep.subr.mxu0 %v8648_v36 }
 0x92f   : > { %7148 = vmatpush3.msra.mxu0 %v4565_v16 }
 0x930   : > { %7159 = vmatprep.subr.mxu0 %v8648_v36  ;;  %7150 = vmatmul.mubr.msk.f32.vlgmr.msra.gmra.mxu0 %vm1507_vm3, %v4252_v24  ;;  %v5047_v12 = vpop.permute.xlu0 %5046 }
 0x931   : > { %7160 = vmatpush3.msra.mxu0 %v4725_v18  ;;  %7163 = vmatprep.mubr.msk.f32.mxu0 %vm7428_vm1, %v8648_v36  ;;  %v4253_v18 = vmul.f32 %v8355_v32, %v8282_v37 }
 0x932   : > { %7161 = vmatprep.subr.mxu0 %v8648_v36 }
 0x933   : > { %7162 = vmatpush3.msra.mxu0 %v4723_v10 }
 0x934   : > { %7173 = vmatprep.subr.mxu0 %v8648_v36  ;;  %7164 = vmatmul.mubr.msk.f32.vlgmr.msra.gmra.mxu0 %vm1507_vm3, %v4254_v9  ;;  %v5045_v4 = vpop.permute.xlu0 %5044 }
 0x935   : > { %7174 = vmatpush3.xpose.msk.msra.mxu0 %vm898_vm2, %v4885_v58  ;;  %7177 = vmatprep.mubr.msk.f32.mxu0 %vm7428_vm1, %v8648_v36 }
 0x936   : > { %7175 = vmatprep.subr.mxu0 %v8648_v36 }
 0x938   : > { %v5209_v48 = vpop.permute.xlu0 %5208 }
 0x939   : > { %7176 = vmatpush3.xpose.msk.msra.mxu0 %vm898_vm2, %v4883_v51 }
 0x93a   : > { %7187 = vmatprep.subr.mxu0 %v8648_v36 }
 0x93c   : > { %7178 = vmatmul.mubr.msk.f32.vlgmr.msra.gmra.mxu0 %vm898_vm2, %v4881_v3  ;;  %v5357_v11 = vpop.permute.xlu0 %5356 }
 0x93d   : > { %7191 = vmatprep.mubr.msk.f32.mxu0 %vm7428_vm1, %v8648_v36 }
 0x94e   : > { %v4239_v62 = vpop.xlane.xlu1 %4238 }
 0x94f   : > { %v4243_v46 = vadd.f32 %v4239_v62, %v4227_v38 }
 0x951   : > { %7393 = vrcp.f32 %v4243_v46 }
 0x952   : > { %v4965_v0 = vpop.permute.xlu1 %4964 }
 0x956   : > { %v5049_v45 = vpop.permute.xlu1 %5048 }
 0x957   : > { %7188 = vmatpush3.xpose.msk.msra.mxu0 %vm898_vm2, %v5049_v45 }
 0x958   : > { %7189 = vmatprep.subr.mxu0 %v8648_v36 }
 0x95b   : > { %7190 = vmatpush3.xpose.msk.msra.mxu0 %vm898_vm2, %v5047_v12 }
 0x95c   : > { %7201 = vmatprep.subr.mxu0 %v8648_v36 }
 0x95e   : > { %v7394_v49 = vpop.eup %7393  ;;  %7192 = vmatmul.mubr.msk.f32.vlgmr.msra.gmra.mxu0 %vm898_vm2, %v5045_v4 }
 0x95f   : > { %7202 = vmatpush3.xpose.msk.msra.mxu0 %vm898_vm2, %v5209_v48  ;;  %v4259_v16 = vmul.f32 %v7394_v49, %v8325_v20  ;;  %7203 = vmatprep.mubr.msk.f32.mxu0 %vm7428_vm1, %v8648_v36  ;;  %v5131_v20 = vpop.permute.xlu1 %5130  ;;  %v4255_v37 = vmul.f32 %v7394_v49, %v8306_v5 }
 0x960   : > { %7211 = vmatprep.subr.mxu0 %v8648_v36 }
 0x961   : > { %7143 = vmatmul.mubr.msk.f32.vlgmr.msra.gmra.mxu1 %vm898_vm2, %v4259_v16 }
 0x962   : > { %7153 = vmatpush3.msra.mxu1 %v8292_v63  ;;  %7204 = vmatmul.mubr.msk.f32.vlgmr.msra.gmra.mxu0 %vm898_vm2, %v4881_v3 }
 0x963   : > { %7154 = vmatprep.subr.mxu1 %v8648_v36  ;;  %7212 = vmatpush3.xpose.msk.msra.mxu0 %vm898_vm2, %v5357_v11  ;;  %v5129_v63 = vpop.permute.xlu1 %5128 }
 0x964   : > { %7155 = vmatpush3.msra.mxu1 %v8294_v7  ;;  %7156 = vmatprep.mubr.msk.f32.mxu1 %vm7428_vm1, %v8648_v36 }
 0x965   : > { %7166 = vmatprep.subr.mxu1 %v8648_v36  ;;  %7157 = vmatmul.mubr.msk.f32.vlgmr.msra.gmra.mxu1 %vm1507_vm3, %v4253_v18 }
 0x966   : > { %7167 = vmatpush3.msra.mxu1 %v8296_v56  ;;  %7213 = vmatprep.mubr.msk.f32.mxu0 %vm7428_vm1, %v8648_v36 }
 0x967   : > { %7168 = vmatprep.subr.mxu1 %v8648_v36  ;;  %7214 = vmatmul.mubr.msk.f32.vlgmr.msra.gmra.mxu0 %vm898_vm2, %v5045_v4  ;;  %v5127_v7 = vpop.permute.xlu1 %5126 }
 0x968   : > { %7169 = vmatpush3.msra.mxu1 %v8333_v8  ;;  %7170 = vmatprep.mubr.msk.f32.mxu1 %vm7428_vm1, %v8648_v36 }
 0x969   : > { %7180 = vmatprep.subr.mxu1 %v8648_v36  ;;  %7171 = vmatmul.mubr.msk.f32.vlgmr.msra.gmra.mxu1 %vm1507_vm3, %v4255_v37 }
 0x96a   : > { %7181 = vmatpush3.xpose.msk.msra.mxu1 %vm898_vm2, %v4967_v13  ;;  %7184 = vmatprep.mubr.msk.f32.mxu1 %vm7428_vm1, %v8648_v36 }
 0x96b   : > { %7182 = vmatprep.subr.mxu1 %v8648_v36  ;;  %7221 = vmatprep.subr.mxu0 %v8648_v36  ;;  %v5283_v56 = vpop.permute.xlu1 %5282 }
 0x96c   : > { %7223 = vmatprep.mubr.msk.f32.mxu0 %vm7428_vm1, %v8648_v36 }
 0x96e   : > { %7183 = vmatpush3.xpose.msk.msra.mxu1 %vm898_vm2, %v4965_v0 }
 0x96f   : > { %7194 = vmatprep.subr.mxu1 %v8648_v36  ;;  %v5431_v5 = vpop.permute.xlu1 %5430 }
 0x971   : > { %7185 = vmatmul.mubr.msk.f32.vlgmr.msra.gmra.mxu1 %vm898_vm2, %v4963_v42 }
 0x972   : > { %7195 = vmatpush3.xpose.msk.msra.mxu1 %vm898_vm2, %v5131_v20  ;;  %7198 = vmatprep.mubr.msk.f32.mxu1 %vm7428_vm1, %v8648_v36 }
 0x973   : > { %7196 = vmatprep.subr.mxu1 %v8648_v36 }
 0x976   : > { %7197 = vmatpush3.xpose.msk.msra.mxu1 %vm898_vm2, %v5129_v63 }
 0x977   : > { %7206 = vmatprep.subr.mxu1 %v8648_v36 }
 0x979   : > { %7199 = vmatmul.mubr.msk.f32.vlgmr.msra.gmra.mxu1 %vm898_vm2, %v5127_v7 }
 0x97a   : > { %7207 = vmatpush3.xpose.msk.msra.mxu1 %vm898_vm2, %v5283_v56  ;;  %7208 = vmatprep.mubr.msk.f32.mxu1 %vm7428_vm1, %v8648_v36 }
 0x97b   : > { %7216 = vmatprep.subr.mxu1 %v8648_v36 }
 0x97d   : > { %7209 = vmatmul.mubr.msk.f32.vlgmr.msra.gmra.mxu1 %vm898_vm2, %v4963_v42 }
 0x97e   : > { %7217 = vmatpush3.xpose.msk.msra.mxu1 %vm898_vm2, %v5431_v5  ;;  %7218 = vmatprep.mubr.msk.f32.mxu1 %vm7428_vm1, %v8648_v36 }
 0x97f   : > { %7226 = vmatprep.subr.mxu1 %v8648_v36 }
 0x981   : > { %7219 = vmatmul.mubr.msk.f32.vlgmr.msra.gmra.mxu1 %vm898_vm2, %v5127_v7 }
 0x982   : > { %7228 = vmatprep.mubr.msk.f32.mxu1 %vm7428_vm1, %v8648_v36 }
 0x9a3   : > { %v8448_v10 = vpop.f32.mrf.mxu0 }
 0x9a5   : > { %v7129_v8 = vpop.f32.mrf.mxu0 }
 0x9be   : > { %v8450_v27 = vpop.f32.mrf.mxu1 }
 0x9c0   : > { %v7134_v44 = vpop.f32.mrf.mxu1 }
 0x9ec   : > { %v4484_v15 = vpop.f32.mrf.mxu0 }
 0x9ee   : > { %v7139_v35 = vpop.f32.mrf.mxu0 }
 0x9f0   : > { %v8452_v60 = vpop.f32.mrf.mxu0 }
 0x9f2   : > { %v7151_v22 = vpop.f32.mrf.mxu0 }
 0x9f4   : > { %v4797_v25 = vpop.f32.mrf.mxu0 }
 0x9f5   : > { %v8454_v30 = vadd.f32 %v4797_v25, %v4484_v15 }
 0x9f6   : > { %v7165_v32 = vpop.f32.mrf.mxu0 }
 0x9fc   : > { %v4958_v52 = vpop.f32.mrf.mxu0 }
 0x9fd   : > { %v5504_v14 = vsel %vm1507_vm3, %v4958_v52, -inf }
 0x9fe   : > { %5505 = vmax.xlane.f32.xlu0 %v5504_v14  ;;  %v7179_v33 = vpop.f32.mrf.mxu0 }
 0xa1e   : > { %v8457_v29 = vpop.f32.mrf.mxu0 }
 0xa1f   : > { %v5510_v48 = vsel %vm1507_vm3, %v8457_v29, -inf }
 0xa20   : > { %v7193_v57 = vpop.f32.mrf.mxu0 }
 0xa21   : > { %v4560_v38 = vpop.f32.mrf.mxu1 }
 0xa22   : > { %v5278_v55 = vpop.f32.mrf.mxu0 }
 0xa23   : > { %v7144_v24 = vpop.f32.mrf.mxu1  ;;  %v5516_v58 = vsel %vm898_vm2, %v5278_v55, -inf }
 0xa24   : > { %5517 = vmax.xlane.f32.xlu1 %v5516_v58  ;;  %v7205_v9 = vpop.f32.mrf.mxu0 }
 0xa25   : > { %v8460_v51 = vpop.f32.mrf.mxu1 }
 0xa27   : > { %v8462_v3 = vpop.f32.mrf.mxu0  ;;  %v7158_v13 = vpop.f32.mrf.mxu1 }
 0xa29   : > { %v7215_v42 = vpop.f32.mrf.mxu0  ;;  %v4876_v62 = vpop.f32.mrf.mxu1 }
 0xa2a   : > { %v8464_v46 = vadd.f32 %v4876_v62, %v4560_v38 }
 0xa2b   : > { %v7172_v12 = vpop.f32.mrf.mxu1 }
 0xa31   : > { %v5040_v0 = vpop.f32.mrf.mxu1 }
 0xa32   : > { %v5507_v4 = vsel %vm1507_vm3, %v5040_v0, -inf }
 0xa33   : > { %5508 = vmax.xlane.f32.xlu0 %v5507_v4  ;;  %v7186_v45 = vpop.f32.mrf.mxu1 }
 0xa35   : > { %5676 = vrot.lane.b32.xlu1 %v7777_v39, %s7431_s21 }
 0xa37   : > { %5511 = vmax.xlane.f32.xlu0 %v5510_v48 }
 0xa39   : > { %v8471_v49 = vpop.f32.mrf.mxu1  ;;  %5752 = vrot.lane.b32.xlu1 %v7815_v43, %s7431_s21 }
 0xa3a   : > { %v5513_v39 = vsel %vm1507_vm3, %v8471_v49, -inf }
 0xa3b   : > { %v7200_v16 = vpop.f32.mrf.mxu1 }
 0xa3d   : > { %v5352_v11 = vpop.f32.mrf.mxu1  ;;  %5828 = vrot.lane.b32.xlu1 %v7812_v41, %s7431_s21  ;;  %v5522_v41 = vsel %vm898_vm2, %v8462_v3, -inf }
 0xa3e   : > { %v5519_v18 = vsel %vm898_vm2, %v5352_v11, -inf }
 0xa3f   : > { %5520 = vmax.xlane.f32.xlu0 %v5519_v18  ;;  %v7210_v20 = vpop.f32.mrf.mxu1 }
 0xa41   : > { %v8478_v37 = vpop.f32.mrf.mxu1 }
 0xa42   : > { %v5525_v43 = vsel %vm898_vm2, %v8478_v37, -inf }
 0xa43   : > { %5514 = vmax.xlane.f32.xlu0 %v5513_v39  ;;  %v7220_v63 = vpop.f32.mrf.mxu1 }
 0xa59   : > { %5600 = vrot.lane.b32.xlu0 %v7791_v40, %s7431_s21 }
 0xa5d   : > { %5906 = vrot.lane.b32.xlu0 %v7698_v17, %s7431_s21 }
 0xa61   : > { %5523 = vmax.xlane.f32.xlu1 %v5522_v41 }
 0xa65   : > { %5526 = vmax.xlane.f32.xlu1 %v5525_v43 }
 0xa76   : > { %5985 = vrot.lane.b32.xlu1 %v7709_v21, %s7431_s21 }
 0xa87   : > { %v5506_v7 = vpop.xlane.xlu0 %5505 }
 0xaad   : > { %v5518_v56 = vpop.xlane.xlu1 %5517 }
 0xaae   : > { %v5528_v5 = vmax.f32 %v5506_v7, %v5518_v56 }
 0xab0   : > { %v5532_v8 = vsub.f32 %v4958_v52, %v5528_v5  ;;  %v5544_v44 = vsub.f32 %v5278_v55, %v5528_v5 }
 0xab1   : > { %v5677_v40 = vpop.permute.xlu1 %5676 }
 0xab2   : > { %v5536_v15 = vmul.f32 1.442695, %v5532_v8  ;;  %v5548_v35 = vmul.f32 1.442695, %v5544_v44  ;;  %7227 = vmatpush3.msra.mxu1 %v5677_v40  ;;  %v3294_v40 = vadd.f32 %v8218_v2, %v8214_v1 }
 0xab3   : > { %7236 = vmatprep.subr.mxu1 %v8648_v36 }
 0xab4   : > { %7395 = vpow2.f32 %v5536_v15 }
 0xab5   : > { %7397 = vpow2.f32 %v5548_v35 }
 0xabc   : > { %v5509_v17 = vpop.xlane.xlu0 %5508 }
 0xac0   : > { %v5512_v52 = vpop.xlane.xlu0 %5511 }
 0xac1   : > { %v8493_v22 = vpop.eup %7395 }
 0xac2   : > { %v8495_v25 = vpop.eup %7397  ;;  %v5556_v21 = vsel %vm1507_vm3, %v8493_v22, 0.0 }
 0xac3   : > { %5557 = vadd.xlane.f32.xlu0 %v5556_v21  ;;  %v5568_v32 = vsel %vm898_vm2, %v8495_v25, 0.0 }
 0xac4   : > { %5569 = vadd.xlane.f32.xlu1 %v5568_v32 }
 0xac8   : > { %v5521_v14 = vpop.xlane.xlu0 %5520 }
 0xac9   : > { %v5529_v33 = vmax.f32 %v5509_v17, %v5521_v14 }
 0xacb   : > { %v5533_v57 = vsub.f32 %v5040_v0, %v5529_v33  ;;  %v5545_v38 = vsub.f32 %v5352_v11, %v5529_v33  ;;  %v5753_v0 = vpop.permute.xlu1 %5752 }
 0xacc   : > { %v5515_v55 = vpop.xlane.xlu0 %5514 }
 0xacd   : > { %v5538_v24 = vmul.f32 1.442695, %v5533_v57  ;;  %v5550_v58 = vmul.f32 1.442695, %v5545_v38 }
 0xacf   : > { %7399 = vpow2.f32 %v5538_v24  ;;  %v8510_v4 = vpop.permute.xlu1 %5828 }
 0xad0   : > { %7401 = vpow2.f32 %v5550_v58  ;;  %v5601_v9 = vpop.permute.xlu0 %5600 }
 0xad1   : > { %7222 = vmatpush3.msra.mxu0 %v5601_v9 }
 0xad2   : > { %7231 = vmatprep.subr.mxu0 %v8648_v36 }
 0xadc   : > { %v8502_v13 = vpop.eup %7399 }
 0xadd   : > { %v8504_v42 = vpop.eup %7401  ;;  %v5559_v62 = vsel %vm1507_vm3, %v8502_v13, 0.0 }
 0xade   : > { %5560 = vadd.xlane.f32.xlu0 %v5559_v62  ;;  %v5571_v12 = vsel %vm898_vm2, %v8504_v42, 0.0 }
 0xadf   : > { %5572 = vadd.xlane.f32.xlu1 %v5571_v12 }
 0xaea   : > { %v5524_v45 = vpop.xlane.xlu1 %5523 }
 0xaeb   : > { %v5530_v48 = vmax.f32 %v5512_v52, %v5524_v45  ;;  %v6284_v45 = vld [vmem:[%s8643_s6 + $0x18] sm:$0xff] }
 0xaed   : > { %v5534_v16 = vsub.f32 %v8457_v29, %v5530_v48  ;;  %v5546_v11 = vsub.f32 %v8462_v3, %v5530_v48  ;;  %v6283_v48 = vld [vmem:[%s8643_s6 + $0x10] sm:$0xff] }
 0xaee   : > { %v5527_v18 = vpop.xlane.xlu1 %5526 }
 0xaef   : > { %v5540_v20 = vmul.f32 1.442695, %v5534_v16  ;;  %v5552_v39 = vmul.f32 1.442695, %v5546_v11  ;;  %v5531_v63 = vmax.f32 %v5515_v55, %v5527_v18  ;;  %v6281_v18 = vld [vmem:[%s8643_s6] sm:$0xff] }
 0xaf1   : > { %7403 = vpow2.f32 %v5540_v20  ;;  %v5535_v41 = vsub.f32 %v8471_v49, %v5531_v63  ;;  %v5547_v8 = vsub.f32 %v8478_v37, %v5531_v63 }
 0xaf2   : > { %7405 = vpow2.f32 %v5552_v39  ;;  %v5986_v1 = vpop.permute.xlu1 %5985 }
 0xaf3   : > { %v5542_v43 = vmul.f32 1.442695, %v5535_v41  ;;  %v5554_v44 = vmul.f32 1.442695, %v5547_v8 }
 0xaf5   : > { %7407 = vpow2.f32 %v5542_v43 }
 0xaf6   : > { %7409 = vpow2.f32 %v5554_v44 }
 0xafe   : > { %v8515_v7 = vpop.eup %7403 }
 0xaff   : > { %v8517_v56 = vpop.eup %7405  ;;  %v5562_v5 = vsel %vm1507_vm3, %v8515_v7, 0.0 }
 0xb00   : > { %5563 = vadd.xlane.f32.xlu0 %v5562_v5  ;;  %v5574_v29 = vsel %vm898_vm2, %v8517_v56, 0.0 }
 0xb01   : > { %5575 = vadd.xlane.f32.xlu1 %v5574_v29 }
 0xb02   : > { %v8523_v3 = vpop.eup %7407 }
 0xb03   : > { %v5565_v49 = vsel %vm1507_vm3, %v8523_v3, 0.0 }
 0xb04   : > { %5566 = vadd.xlane.f32.xlu0 %v5565_v49 }
 0xb12   : > { %5983 = vrot.lane.b32.xlu1 %v7717_v23, %s7431_s21  ;;  %v4640_v23 = vadd.f32 %v8452_v60, %v8448_v10 }
 0xb1a   : > { %5904 = vrot.lane.b32.xlu0 %v7704_v19, %s7431_s21  ;;  %v8541_v19 = vpop.eup %7409 }
 0xb1e   : > { %6064 = vrot.lane.b32.xlu0 %v7723_v26, %s7431_s21  ;;  %v5577_v26 = vsel %vm898_vm2, %v8541_v19, 0.0 }
 0xb22   : > { %6062 = vrot.lane.b32.xlu0 %v7733_v28, %s7431_s21  ;;  %v5907_v28 = vpop.permute.xlu0 %5906 }
 0xb26   : > { %6224 = vrot.lane.b32.xlu0 %v3294_v40, %s7432_s22 }
 0xb2a   : > { %6240 = vrot.lane.b32.xlu0 %v4640_v23, %s7433_s23 }
 0xb2e   : > { %6228 = vrot.lane.b32.xlu0 %v8220_v50, %s7432_s22  ;;  %v3375_v50 = vadd.f32 %v8226_v61, %v8216_v47 }
 0xb32   : > { %6244 = vrot.lane.b32.xlu0 %v8454_v30, %s7433_s23  ;;  %v4719_v30 = vadd.f32 %v8460_v51, %v8450_v27 }
 0xb36   : > { %5578 = vadd.xlane.f32.xlu1 %v5577_v26 }
 0xb47   : > { %6143 = vrot.lane.b32.xlu1 %v7747_v31, %s7431_s21 }
 0xb4b   : > { %6141 = vrot.lane.b32.xlu1 %v7763_v34, %s7431_s21 }
 0xb4c   : > { %v5558_v2 = vpop.xlane.xlu0 %5557 }
 0xb4d   : > { %v5570_v10 = vpop.xlane.xlu1 %5569 }
 0xb4e   : > { %v5580_v60 = vadd.f32 %v5570_v10, %v5558_v2 }
 0xb4f   : > { %6226 = vrot.lane.b32.xlu1 %v3375_v50, %s7432_s22 }
 0xb50   : > { %7411 = vrcp.f32 %v5580_v60 }
 0xb53   : > { %6242 = vrot.lane.b32.xlu1 %v4719_v30, %s7433_s23 }
 0xb57   : > { %6230 = vrot.lane.b32.xlu1 %v8230_v54, %s7432_s22 }
 0xb5b   : > { %6246 = vrot.lane.b32.xlu1 %v8464_v46, %s7433_s23 }
 0xb5d   : > { %v7412_v31 = vpop.eup %7411 }
 0xb5e   : > { %v5596_v37 = vmul.f32 %v7412_v31, %v8495_v25  ;;  %v5592_v52 = vmul.f32 %v7412_v31, %v8493_v22 }
 0xb60   : > { %7224 = vmatmul.mubr.msk.f32.vlgmr.msra.gmra.mxu0 %vm898_vm2, %v5596_v37 }
 0xb61   : > { %7232 = vmatpush3.msra.mxu0 %v5753_v0  ;;  %7233 = vmatprep.mubr.msk.f32.mxu0 %vm7428_vm1, %v8648_v36 }
 0xb62   : > { %7241 = vmatprep.subr.mxu0 %v8648_v36 }
 0xb67   : > { %v5561_v34 = vpop.xlane.xlu0 %5560 }
 0xb68   : > { %v5573_v47 = vpop.xlane.xlu1 %5572 }
 0xb69   : > { %v5581_v61 = vadd.f32 %v5573_v47, %v5561_v34 }
 0xb6b   : > { %7413 = vrcp.f32 %v5581_v61 }
 0xb78   : > { %v7414_v27 = vpop.eup %7413 }
 0xb79   : > { %v5597_v54 = vmul.f32 %v7414_v27, %v8504_v42  ;;  %v5593_v9 = vmul.f32 %v7414_v27, %v8502_v13 }
 0xb7b   : > { %7229 = vmatmul.mubr.msk.f32.vlgmr.msra.gmra.mxu1 %vm898_vm2, %v5597_v54 }
 0xb7c   : > { %7237 = vmatpush3.msra.mxu1 %v8510_v4  ;;  %7238 = vmatprep.mubr.msk.f32.mxu1 %vm7428_vm1, %v8648_v36 }
 0xb7d   : > { %7248 = vmatprep.subr.mxu1 %v8648_v36 }
 0xb89   : > { %v5564_v51 = vpop.xlane.xlu0 %5563 }
 0xb8a   : > { %v5576_v46 = vpop.xlane.xlu1 %5575 }
 0xb8b   : > { %v5582_v15 = vadd.f32 %v5576_v46, %v5564_v51 }
 0xb8d   : > { %7415 = vrcp.f32 %v5582_v15  ;;  %v5567_v35 = vpop.xlane.xlu0 %5566  ;;  %v8649_v15 = vld [vmem:[#allocation2_spill] sm:$0xff] }
 0xb8e   : > { %v5984_v57 = vpop.permute.xlu1 %5983 }
 0xb91   : > { %v5905_v17 = vpop.permute.xlu0 %5904 }
 0xb95   : > { %v6065_v32 = vpop.permute.xlu0 %6064 }
 0xb99   : > { %v6063_v14 = vpop.permute.xlu0 %6062 }
 0xb9a   : > { %v7416_v25 = vpop.eup %7415 }
 0xb9b   : > { %v5598_v21 = vmul.f32 %v7416_v25, %v8517_v56  ;;  %v5594_v33 = vmul.f32 %v7416_v25, %v8515_v7 }
 0xb9d   : > { %7234 = vmatmul.mubr.msk.f32.vlgmr.msra.gmra.mxu0 %vm898_vm2, %v5598_v21  ;;  %v6225_v23 = vpop.permute.xlu0 %6224 }
 0xb9e   : > { %7242 = vmatpush3.msra.mxu0 %v5907_v28  ;;  %7245 = vmatprep.mubr.msk.f32.mxu0 %vm7428_vm1, %v8648_v36 }
 0xb9f   : > { %7243 = vmatprep.subr.mxu0 %v8648_v36 }
 0xba0   : > { %7244 = vmatpush3.msra.mxu0 %v5905_v17 }
 0xba1   : > { %7255 = vmatprep.subr.mxu0 %v8648_v36  ;;  %7246 = vmatmul.mubr.msk.f32.vlgmr.msra.gmra.mxu0 %vm1507_vm3, %v5592_v52 }
 0xba2   : > { %7256 = vmatpush3.msra.mxu0 %v6065_v32  ;;  %7259 = vmatprep.mubr.msk.f32.mxu0 %vm7428_vm1, %v8648_v36 }
 0xba3   : > { %7257 = vmatprep.subr.mxu0 %v8648_v36 }
 0xba4   : > { %7258 = vmatpush3.msra.mxu0 %v6063_v14 }
 0xba5   : > { %7260 = vmatmul.mubr.msk.f32.vlgmr.msra.gmra.mxu0 %vm1507_vm3, %v5594_v33  ;;  %7269 = vmatprep.subr.mxu0 %v6284_v45 }
 0xba6   : > { %7270 = vmatpush3.msra.mxu0 %v6284_v45 }
 0xba7   : > { %7271 = vmatprep.subr.mxu0 %v6283_v48 }
 0xba8   : > { %7272 = vmatpush3.msra.mxu0 %v6283_v48 }
 0xbbf   : > { %v5579_v38 = vpop.xlane.xlu1 %5578 }
 0xbc0   : > { %v5583_v22 = vadd.f32 %v5579_v38, %v5567_v35 }
 0xbc2   : > { %7417 = vrcp.f32 %v5583_v22 }
 0xbc3   : > { %v6144_v58 = vpop.permute.xlu1 %6143 }
 0xbc7   : > { %v6142_v42 = vpop.permute.xlu1 %6141 }
 0xbcb   : > { %v6227_v60 = vpop.permute.xlu1 %6226 }
 0xbcc   : > { %v6269_v34 = vsel %vm898_vm2, %v7992_v6, %v6227_v60 }
 0xbcf   : > { %v7418_v55 = vpop.eup %7417  ;;  %v6243_v30 = vpop.permute.xlu1 %6242 }
 0xbd0   : > { %v5599_v24 = vmul.f32 %v7418_v55, %v8541_v19  ;;  %v5595_v62 = vmul.f32 %v7418_v55, %v8523_v3  ;;  %v6241_v19 = vpop.permute.xlu0 %6240 }
 0xbd2   : > { %7239 = vmatmul.mubr.msk.f32.vlgmr.msra.gmra.mxu1 %vm898_vm2, %v5599_v24 }
 0xbd3   : > { %7249 = vmatpush3.msra.mxu1 %v5986_v1  ;;  %7252 = vmatprep.mubr.msk.f32.mxu1 %vm7428_vm1, %v8648_v36  ;;  %v6268_v1 = vsel %vm898_vm2, %v7984_v53, %v6225_v23  ;;  %v6231_v31 = vpop.permute.xlu1 %6230  ;;  %v6273_v53 = vsel %vm1507_vm3, %v6269_v34, %v6243_v30 }
 0xbd4   : > { %7250 = vmatprep.subr.mxu1 %v8648_v36  ;;  %v6229_v26 = vpop.permute.xlu0 %6228  ;;  %v6272_v2 = vsel %vm1507_vm3, %v6268_v1, %v6241_v19  ;;  %v6271_v35 = vsel %vm898_vm2, %v8649_v15, %v6231_v31 }
 0xbd5   : > { %7251 = vmatpush3.msra.mxu1 %v5984_v57  ;;  %v6270_v61 = vsel %vm898_vm2, %v7986_v59, %v6229_v26 }
 0xbd6   : > { %7262 = vmatprep.subr.mxu1 %v8648_v36  ;;  %7253 = vmatmul.mubr.msk.f32.vlgmr.msra.gmra.mxu1 %vm1507_vm3, %v5593_v9 }
 0xbd7   : > { %7263 = vmatpush3.msra.mxu1 %v6144_v58  ;;  %7266 = vmatprep.mubr.msk.f32.mxu1 %vm7428_vm1, %v8648_v36  ;;  %v6247_v37 = vpop.permute.xlu1 %6246 }
 0xbd8   : > { %7264 = vmatprep.subr.mxu1 %v8648_v36  ;;  %v6282_v36 = vld [vmem:[%s8643_s6 + $0x8] sm:$0xff]  ;;  %v6245_v28 = vpop.permute.xlu0 %6244  ;;  %v6275_v6 = vsel %vm1507_vm3, %v6271_v35, %v6247_v37 }
 0xbd9   : > { %7265 = vmatpush3.msra.mxu1 %v6142_v42  ;;  %7273 = vmatprep.subr.mxu0 %v6282_v36  ;;  %v6274_v54 = vsel %vm1507_vm3, %v6270_v61, %v6245_v28 }
 0xbda   : > { %7267 = vmatmul.mubr.msk.f32.vlgmr.msra.gmra.mxu1 %vm1507_vm3, %v5595_v62  ;;  %7274 = vmatpush3.msra.mxu0 %v6282_v36 }
 0xbdb   : > { %7275 = vmatprep.subr.mxu0 %v6281_v18 }
 0xbdc   : > { %7276 = vmatpush3.msra.mxu0 %v6281_v18 }
 0xc20   : > { %v5672_v12 = vpop.f32.mrf.mxu0 }
 0xc22   : > { %v7225_v0 = vpop.f32.mrf.mxu0 }
 0xc3b   : > { %v5748_v13 = vpop.f32.mrf.mxu1 }
 0xc3d   : > { %v7230_v4 = vpop.f32.mrf.mxu1 }
 0xc5d   : > { %v5824_v16 = vpop.f32.mrf.mxu0 }
 0xc5f   : > { %v7235_v11 = vpop.f32.mrf.mxu0 }
 0xc61   : > { %v5979_v20 = vpop.f32.mrf.mxu0 }
 0xc62   : > { %v5980_v39 = vadd.f32 %v5979_v20, %v5672_v12 }
 0xc63   : > { %v7247_v63 = vpop.f32.mrf.mxu0 }
 0xc64   : > { %6256 = vrot.lane.b32.xlu0 %v5980_v39, %s7434_s12 }
 0xc65   : > { %v6137_v41 = vpop.f32.mrf.mxu0 }
 0xc66   : > { %v6138_v43 = vadd.f32 %v6137_v41, %v5824_v16 }
 0xc67   : > { %v7261_v7 = vpop.f32.mrf.mxu0 }
 0xc68   : > { %6260 = vrot.lane.b32.xlu0 %v6138_v43, %s7434_s12 }
 0xc92   : > { %v5900_v56 = vpop.f32.mrf.mxu1 }
 0xc94   : > { %v7240_v5 = vpop.f32.mrf.mxu1 }
 0xc96   : > { %v6058_v29 = vpop.f32.mrf.mxu1 }
 0xc97   : > { %v6059_v3 = vadd.f32 %v6058_v29, %v5748_v13 }
 0xc98   : > { %v7254_v49 = vpop.f32.mrf.mxu1 }
 0xc99   : > { %6258 = vrot.lane.b32.xlu1 %v6059_v3, %s7434_s12 }
 0xc9a   : > { %v6216_v8 = vpop.f32.mrf.mxu1 }
 0xc9b   : > { %v6217_v44 = vadd.f32 %v6216_v8, %v5900_v56 }
 0xc9c   : > { %v7268_v40 = vpop.f32.mrf.mxu1 }
 0xc9d   : > { %6262 = vrot.lane.b32.xlu1 %v6217_v44, %s7434_s12 }
 0xcd6   : > { %v6257_v50 = vpop.permute.xlu0 %6256 }
 0xcd7   : > { %v6277_v10 = vsel %vm6276_vm4, %v6272_v2, %v6257_v50 }
 0xcd8   : > { %7277 = vmatprep.mubr.msk.f32.mxu0 %vm317_vm0, %v6277_v10 }
 0xcda   : > { %v6261_v47 = vpop.permute.xlu0 %6260 }
 0xcdb   : > { %v6279_v46 = vsel %vm6276_vm4, %v6274_v54, %v6261_v47 }
 0xd0b   : > { %v6259_v27 = vpop.permute.xlu1 %6258 }
 0xd0c   : > { %v6278_v51 = vsel %vm6276_vm4, %v6273_v53, %v6259_v27 }
 0xd0d   : > { %7278 = vmatmul.mubr.msk.f32.vlgmr.msra.gmra.mxu0 %vm317_vm0, %v6278_v51 }
 0xd0e   : > { %7280 = vmatprep.mubr.msk.f32.mxu0 %vm317_vm0, %v6279_v46 }
 0xd0f   : > { %v6263_v17 = vpop.permute.xlu1 %6262 }
 0xd10   : > { %v6280_v59 = vsel %vm6276_vm4, %v6275_v6, %v6263_v17 }
 0xd11   : > { %7281 = vmatmul.mubr.msk.f32.gmra.mxu0 %vm317_vm0, %v6280_v59 }
 0xdcd   : > { %v7279_v25 = vpop.f32.mrf.mxu0 }
 0xdce   : > { %6383 = vst.msk [vmem:[%s302_s15 + $0x8] sm:$0xff] %vm317_vm0, %v7279_v25 }
 0xdcf   : > { %v6363_v21 = vpop.f32.mrf.mxu0 }
 0xdd0   : > { %6382 = vst.msk [vmem:[%s302_s15] sm:$0xff] %vm317_vm0, %v6363_v21 }
 0xdd1   : > { %v7282_v32 = vpop.f32.mrf.mxu0 }
 0xdd2   : > { %6385 = vst.msk [vmem:[%s302_s15 + $0x18] sm:$0xff] %vm317_vm0, %v7282_v32 }
 0xdd3   : > { %v6373_v52 = vpop.f32.mrf.mxu0 }
 0xdd4   : > { %6384 = vst.msk [vmem:[%s302_s15 + $0x10] sm:$0xff] %vm317_vm0, %v6373_v52 }
 0xdd5 PF: > { %s17_s24 = sadd.s32 1, %s7425_s24  }
 0xdd6   : > { %p14_p5 = scmp.ge.s32.totalorder %s17_s24, 4  }
 0xdd8   :  { %16 = sbr.rel (!%p14_p5) target bundleno = 1 (0x1), region = 81 }

// kernel: tpu_custom_call.1
= control target key start
LH: loop header
LB: loop body
LE: loop exit
PB: predicated region body
PF: predicated region fallthrough
CT: control target
= control target key end

     0   :  { %s7475_s24 = smov 0   ;;  %s8637_s0 = inlined_call_operand.vmem [shape: f32[128,32], index: 0, kind: input, shape index: {}]   ;;  %s8638_s1 = inlined_call_operand.vmem [shape: f32[64,32], index: 1, kind: input, shape index: {}]   ;;  %s8639_s2 = inlined_call_operand.vmem [shape: f32[4,32], index: 2, kind: input, shape index: {}]   ;;  %s8640_s3 = inlined_call_operand.vmem [shape: f32[32,32], index: 3, kind: input, shape index: {}]   ;;  %s8641_s4 = inlined_call_operand.vmem [shape: f32[32,32], index: 4, kind: input, shape index: {}]   ;;  %s8642_s5 = inlined_call_operand.vmem [shape: f32[32,32], index: 5, kind: input, shape index: {}]   ;;  %s8643_s6 = inlined_call_operand.vmem [shape: f32[32,32], index: 6, kind: input, shape index: {}]   ;;  %s8644_s7 = inlined_call_operand.vmem [shape: f32[64,32], index: 7, kind: output, shape index: {}]  }
   0x1 LB: > { %s6454_s25 = sadd.s32 4294967295, %s7425_s24   ;;  %p6458_p0 = scmp.ge.s32.totalorder %s7425_s24, 1  ;;  %s7425_s24 = sphi %s7475_s24, %s17_s24  }
   0x2   : > { %p249_p1 = scmp.lt.s32.totalorder %s7425_s24, 3 }
   0x4   : > { %p250_p2 = pnand %p6458_p0, %p249_p1 }
   0x6   : > { %253 = sbr.rel (%p250_p2) target bundleno = 3541 (0xdd5), region = 48 }
   0xb   : > { %s6461_s26 = sshll.u32 %s6454_s25, 2  ;;  %s6459_s27 = sshll.u32 %s6454_s25, 3  ;;  %vm317_vm0 = vcmask 261120   ;;  %vm7428_vm1 = vmmov 0   ;;  %vm898_vm2 = vcmask 64512   ;;  %vm1507_vm3 = vcmask 130048  }
   0xc   : > { %p293_p3 = scmp.lt.s32.totalorder %s6461_s26, 7  ;;  %p287_p4 = scmp.lt.s32.totalorder %s6459_s27, 15  ;;  %vm6276_vm4 = vcmask 195584  }
   0xd   : > { %s7429_s19 = smov 120   ;;  %s7430_s20 = smov 112  }
   0xe   : > { %s8651_s26 = smov (!%p293_p3, %s6461_s26), 7  ;;  %s8653_s27 = smov (!%p287_p4, %s6459_s27), 15 }
   0xf   : > { %s6462_s28 = sshll.u32 %s8651_s26, 3  ;;  %s6460_s9 = sshll.u32 %s8653_s27, 3 }
  0x10   : > { %s296_s8 = scalar_lea.vmem %s8638_s1, %s6462_s28  ;;  %s290_s12 = scalar_lea.vmem %s8637_s0, %s6460_s9 }
  0x11   : > { %v312_v0 = vld [vmem:[%s296_s8] sm:$0xff]  ;;  %v314_v1 = vld [vmem:[%s296_s8 + $0x10] sm:$0xff]  ;;  %v313_v2 = vld [vmem:[%s296_s8 + $0x8] sm:$0xff]  ;;  %s7431_s21 = smov 104   ;;  %s7432_s22 = smov 8  }
  0x12   : > { %v447_v3 = vsel %vm317_vm0, %v312_v0, 0.0  ;;  %v453_v4 = vsel %vm317_vm0, %v314_v1, 0.0  ;;  %v315_v5 = vld [vmem:[%s296_s8 + $0x18] sm:$0xff]  ;;  %v450_v6 = vsel %vm317_vm0, %v313_v2, 0.0  ;;  %v304_v8 = vld [vmem:[%s290_s12] sm:$0xff]  ;;  %v305_v9 = vld [vmem:[%s290_s12 + $0x8] sm:$0xff]  ;;  %s302_s15 = scalar_lea.vmem %s8644_s7, %s6462_s28 }
  0x13   : > { %448 = vadd.xlane.f32.xlu0 %v447_v3  ;;  %454 = vadd.xlane.f32.xlu1 %v453_v4  ;;  %v456_v7 = vsel %vm317_vm0, %v315_v5, 0.0  ;;  %v318_v10 = vsel %vm317_vm0, %v304_v8, 0.0  ;;  %v321_v11 = vsel %vm317_vm0, %v305_v9, 0.0  ;;  %v306_v12 = vld [vmem:[%s290_s12 + $0x10] sm:$0xff]  ;;  %v307_v13 = vld [vmem:[%s290_s12 + $0x18] sm:$0xff]  ;;  %v308_v16 = vld [vmem:[%s290_s12 + $0x20] sm:$0xff] }
  0x14   : > { %v324_v14 = vsel %vm317_vm0, %v306_v12, 0.0  ;;  %v327_v15 = vsel %vm317_vm0, %v307_v13, 0.0  ;;  %v309_v17 = vld [vmem:[%s290_s12 + $0x28] sm:$0xff]  ;;  %v330_v18 = vsel %vm317_vm0, %v308_v16, 0.0  ;;  %v7504_v20 = vld [vmem:[%s290_s12 + $0x30] sm:$0xff]  ;;  %v7506_v21 = vld [vmem:[%s290_s12 + $0x38] sm:$0xff] }
  0x15   : > { %v333_v19 = vsel %vm317_vm0, %v309_v17, 0.0  ;;  %v336_v22 = vsel %vm317_vm0, %v7504_v20, 0.0  ;;  %v339_v23 = vsel %vm317_vm0, %v7506_v21, 0.0  ;;  %s7433_s23 = smov 16   ;;  %s7434_s12 = smov 24  }
  0x17   : > { %451 = vadd.xlane.f32.xlu0 %v450_v6  ;;  %457 = vadd.xlane.f32.xlu1 %v456_v7 }
  0x1b   : > { %319 = vadd.xlane.f32.xlu0 %v318_v10  ;;  %322 = vadd.xlane.f32.xlu1 %v321_v11 }
  0x1f   : > { %325 = vadd.xlane.f32.xlu0 %v324_v14  ;;  %328 = vadd.xlane.f32.xlu1 %v327_v15 }
  0x23   : > { %331 = vadd.xlane.f32.xlu0 %v330_v18  ;;  %334 = vadd.xlane.f32.xlu1 %v333_v19 }
  0x27   : > { %337 = vadd.xlane.f32.xlu0 %v336_v22  ;;  %340 = vadd.xlane.f32.xlu1 %v339_v23  ;;  %v516_v22 = vld [vmem:[%s8640_s3 + $0x8] sm:$0xff]  ;;  %v515_v23 = vld [vmem:[%s8640_s3] sm:$0xff] }
  0x9c   : > { %v449_v24 = vpop.xlane.xlu0 %448  ;;  %v455_v25 = vpop.xlane.xlu1 %454 }
  0x9d   : > { %v459_v26 = vmul.f32 0.03125, %v449_v24  ;;  %v461_v27 = vmul.f32 0.03125, %v455_v25  ;;  %v7589_v24 = vld [vmem:[%s8641_s4 + $0x18] sm:$0xff] }
  0x9e   : > { %v772_v25 = vld [vmem:[%s8642_s5 + $0x18] sm:$0xff] }
  0x9f   : > { %v7512_v28 = vsub.f32 %v312_v0, %v459_v26  ;;  %v7514_v29 = vsub.f32 %v314_v1, %v461_v27  ;;  %6859 = vmatprep.subr.mxu0 %v772_v25  ;;  %v771_v26 = vld [vmem:[%s8642_s5 + $0x10] sm:$0xff]  ;;  %v770_v27 = vld [vmem:[%s8642_s5 + $0x8] sm:$0xff] }
  0xa0   : > { %v452_v30 = vpop.xlane.xlu0 %451  ;;  %v458_v31 = vpop.xlane.xlu1 %457  ;;  %6860 = vmatpush3.msra.mxu0 %v772_v25 }
  0xa1   : > { %v460_v32 = vmul.f32 0.03125, %v452_v30  ;;  %v462_v33 = vmul.f32 0.03125, %v458_v31  ;;  %v467_v34 = vmul.f32 %v7512_v28, %v7512_v28  ;;  %v469_v35 = vmul.f32 %v7514_v29, %v7514_v29  ;;  %6861 = vmatprep.subr.mxu0 %v771_v26  ;;  %v769_v30 = vld [vmem:[%s8642_s5] sm:$0xff] }
  0xa2   : > { %6862 = vmatpush3.msra.mxu0 %v771_v26 }
  0xa3   : > { %v7520_v36 = vsub.f32 %v313_v2, %v460_v32  ;;  %v7522_v37 = vsub.f32 %v315_v5, %v462_v33  ;;  %v471_v38 = vsel %vm317_vm0, %v467_v34, 0.0  ;;  %v477_v41 = vsel %vm317_vm0, %v469_v35, 0.0  ;;  %6863 = vmatprep.subr.mxu0 %v770_v27 }
  0xa4   : > { %472 = vadd.xlane.f32.xlu0 %v471_v38  ;;  %v320_v39 = vpop.xlane.xlu0 %319  ;;  %v323_v40 = vpop.xlane.xlu1 %322  ;;  %6864 = vmatpush3.msra.mxu0 %v770_v27 }
  0xa5   : > { %v343_v42 = vmul.f32 0.03125, %v320_v39  ;;  %v468_v43 = vmul.f32 %v7520_v36, %v7520_v36  ;;  %v344_v44 = vmul.f32 0.03125, %v323_v40  ;;  %v470_v45 = vmul.f32 %v7522_v37, %v7522_v37  ;;  %6865 = vmatprep.subr.mxu0 %v769_v30 }
  0xa6   : > { %6866 = vmatpush3.msra.mxu0 %v769_v30  ;;  %v423_v40 = vlaneseq }
  0xa7   : > { %v7530_v46 = vsub.f32 %v304_v8, %v343_v42  ;;  %v474_v47 = vsel %vm317_vm0, %v468_v43, 0.0  ;;  %v7533_v48 = vsub.f32 %v305_v9, %v344_v44  ;;  %v480_v50 = vsel %vm317_vm0, %v470_v45, 0.0 }
  0xa8   : > { %475 = vadd.xlane.f32.xlu1 %v474_v47  ;;  %478 = vadd.xlane.f32.xlu0 %v477_v41  ;;  %v326_v49 = vpop.xlane.xlu0 %325  ;;  %v329_v51 = vpop.xlane.xlu1 %328 }
  0xa9   : > { %v345_v52 = vmul.f32 0.03125, %v326_v49  ;;  %v346_v53 = vmul.f32 0.03125, %v329_v51  ;;  %v359_v54 = vmul.f32 %v7530_v46, %v7530_v46  ;;  %v360_v55 = vmul.f32 %v7533_v48, %v7533_v48 }
  0xaa   : > { %v424_v49 = vshrl.u32 %v423_v40, 7 }
  0xab   : > { %v7540_v56 = vsub.f32 %v306_v12, %v345_v52  ;;  %v7542_v57 = vsub.f32 %v307_v13, %v346_v53  ;;  %v367_v58 = vsel %vm317_vm0, %v359_v54, 0.0  ;;  %v370_v60 = vsel %vm317_vm0, %v360_v55, 0.0 }
  0xac   : > { %481 = vadd.xlane.f32.xlu1 %v480_v50  ;;  %368 = vadd.xlane.f32.xlu0 %v367_v58  ;;  %v332_v59 = vpop.xlane.xlu0 %331  ;;  %v335_v61 = vpop.xlane.xlu1 %334  ;;  %v501_v58 = vsub.s32 2, %v424_v49  ;;  %v437_v27 = vsub.s32 1, %v424_v49 }
  0xad   : > { %v347_v62 = vmul.f32 0.03125, %v332_v59  ;;  %v348_v63 = vmul.f32 0.03125, %v335_v61  ;;  %v361_v0 = vmul.f32 %v7540_v56, %v7540_v56  ;;  %v362_v1 = vmul.f32 %v7542_v57, %v7542_v57  ;;  %v316_v59 = vld [vmem:[%s8639_s2] sm:$0xf] }
  0xae   : > { %v438_v40 = vrot.slane %v316_v59, %v437_v27 }
  0xaf   : > { %v7550_v2 = vsub.f32 %v308_v16, %v347_v62  ;;  %v7552_v3 = vsub.f32 %v309_v17, %v348_v63  ;;  %v373_v4 = vsel %vm317_vm0, %v361_v0, 0.0  ;;  %v376_v6 = vsel %vm317_vm0, %v362_v1, 0.0 }
  0xb0   : > { %371 = vadd.xlane.f32.xlu1 %v370_v60  ;;  %374 = vadd.xlane.f32.xlu0 %v373_v4  ;;  %v338_v5 = vpop.xlane.xlu0 %337  ;;  %v341_v7 = vpop.xlane.xlu1 %340  ;;  %v509_v62 = vsub.s32 3, %v424_v49 }
  0xb1   : > { %v349_v8 = vmul.f32 0.03125, %v338_v5  ;;  %v350_v9 = vmul.f32 0.03125, %v341_v7  ;;  %v363_v10 = vmul.f32 %v7550_v2, %v7550_v2  ;;  %v364_v11 = vmul.f32 %v7552_v3, %v7552_v3 }
  0xb2   : > { %v502_v5 = vrot.slane %v316_v59, %v501_v58 }
  0xb3   : > { %v7561_v12 = vsub.f32 %v7504_v20, %v349_v8  ;;  %v7564_v13 = vsub.f32 %v7506_v21, %v350_v9  ;;  %v379_v14 = vsel %vm317_vm0, %v363_v10, 0.0  ;;  %v382_v15 = vsel %vm317_vm0, %v364_v11, 0.0  ;;  %v518_v20 = vld [vmem:[%s8640_s3 + $0x18] sm:$0xff]  ;;  %v517_v21 = vld [vmem:[%s8640_s3 + $0x10] sm:$0xff] }
  0xb4   : > { %377 = vadd.xlane.f32.xlu1 %v376_v6  ;;  %380 = vadd.xlane.f32.xlu0 %v379_v14  ;;  %v510_v10 = vrot.slane %v316_v59, %v509_v62 }
  0xb5   : > { %v365_v16 = vmul.f32 %v7561_v12, %v7561_v12  ;;  %v366_v17 = vmul.f32 %v7564_v13, %v7564_v13  ;;  %6819 = vmatprep.subr.mxu1 %v518_v20 }
  0xb6   : > { %6820 = vmatpush3.msra.mxu1 %v518_v20 }
  0xb7   : > { %v385_v18 = vsel %vm317_vm0, %v365_v16, 0.0  ;;  %v388_v19 = vsel %vm317_vm0, %v366_v17, 0.0  ;;  %6821 = vmatprep.subr.mxu1 %v517_v21 }
  0xb8   : > { %383 = vadd.xlane.f32.xlu1 %v382_v15  ;;  %386 = vadd.xlane.f32.xlu0 %v385_v18 }
  0xb9   : > { %6822 = vmatpush3.msra.mxu1 %v517_v21 }
  0xba   : > { %6823 = vmatprep.subr.mxu1 %v516_v22 }
  0xbb   : > { %6824 = vmatpush3.msra.mxu1 %v516_v22 }
  0xbc   : > { %389 = vadd.xlane.f32.xlu1 %v388_v19  ;;  %6825 = vmatprep.subr.mxu1 %v515_v23  ;;  %v425_v19 = vsub.s32 0, %v424_v49 }
  0xbd   : > { %6826 = vmatpush3.msra.mxu1 %v515_v23 }
  0xbe   : > { %6833 = vmatprep.subr.mxu1 %v7589_v24 }
 0x12d   : > { %v473_v31 = vpop.xlane.xlu0 %472 }
 0x12e   : > { %v483_v32 = vmul.f32 0.03125, %v473_v31 }
 0x130   : > { %v487_v33 = vadd.f32 1e-05, %v483_v32 }
 0x131   : > { %v476_v34 = vpop.xlane.xlu1 %475  ;;  %v479_v35 = vpop.xlane.xlu0 %478 }
 0x132   : > { %7299 = vrsqrt.f32 %v487_v33  ;;  %v484_v38 = vmul.f32 0.03125, %v476_v34  ;;  %v485_v39 = vmul.f32 0.03125, %v479_v35  ;;  %v7614_v33 = vrot.slane %v316_v59, %v425_v19 }
 0x134   : > { %v488_v41 = vadd.f32 1e-05, %v484_v38  ;;  %v489_v42 = vadd.f32 1e-05, %v485_v39 }
 0x135   : > { %v482_v43 = vpop.xlane.xlu1 %481  ;;  %v369_v44 = vpop.xlane.xlu0 %368 }
 0x136   : > { %7301 = vrsqrt.f32 %v488_v41  ;;  %v486_v45 = vmul.f32 0.03125, %v482_v43  ;;  %v391_v47 = vmul.f32 0.03125, %v369_v44 }
 0x137   : > { %7303 = vrsqrt.f32 %v489_v42 }
 0x138   : > { %v490_v50 = vadd.f32 1e-05, %v486_v45  ;;  %v399_v51 = vadd.f32 1e-05, %v391_v47 }
 0x139   : > { %v372_v52 = vpop.xlane.xlu1 %371  ;;  %v375_v53 = vpop.xlane.xlu0 %374 }
 0x13a   : > { %7305 = vrsqrt.f32 %v490_v50  ;;  %v392_v54 = vmul.f32 0.03125, %v372_v52  ;;  %v393_v55 = vmul.f32 0.03125, %v375_v53 }
 0x13b   : > { %7307 = vrsqrt.f32 %v399_v51  ;;  %v616_v51 = vld [vmem:[%s8641_s4] sm:$0xff] }
 0x13c   : > { %v400_v60 = vadd.f32 1e-05, %v392_v54  ;;  %v401_v61 = vadd.f32 1e-05, %v393_v55 }
 0x13d   : > { %v378_v63 = vpop.xlane.xlu1 %377  ;;  %v381_v0 = vpop.xlane.xlu0 %380 }
 0x13e   : > { %7309 = vrsqrt.f32 %v400_v60  ;;  %v394_v1 = vmul.f32 0.03125, %v378_v63  ;;  %v395_v4 = vmul.f32 0.03125, %v381_v0 }
 0x13f   : > { %v7300_v6 = vpop.eup %7299  ;;  %7311 = vrsqrt.f32 %v401_v61 }
 0x140   : > { %v402_v7 = vadd.f32 1e-05, %v394_v1  ;;  %v403_v8 = vadd.f32 1e-05, %v395_v4  ;;  %v495_v9 = vmul.f32 %v7300_v6, %v7512_v28 }
 0x141   : > { %v384_v11 = vpop.xlane.xlu1 %383  ;;  %v387_v14 = vpop.xlane.xlu0 %386 }
 0x142   : > { %7313 = vrsqrt.f32 %v402_v7  ;;  %v396_v15 = vmul.f32 0.03125, %v384_v11  ;;  %v397_v16 = vmul.f32 0.03125, %v387_v14  ;;  %v503_v17 = vmul.f32 %v502_v5, %v495_v9 }
 0x143   : > { %v7302_v18 = vpop.eup %7301  ;;  %7315 = vrsqrt.f32 %v403_v8 }
 0x144   : > { %v7304_v20 = vpop.eup %7303  ;;  %v404_v21 = vadd.f32 1e-05, %v396_v15  ;;  %v405_v22 = vadd.f32 1e-05, %v397_v16  ;;  %v7608_v23 = vadd.f32 %v510_v10, %v503_v17  ;;  %v496_v25 = vmul.f32 %v7302_v18, %v7520_v36 }
 0x145   : > { %v390_v26 = vpop.xlane.xlu1 %389  ;;  %v497_v28 = vmul.f32 %v7304_v20, %v7514_v29  ;;  %v618_v29 = vld [vmem:[%s8641_s4 + $0x10] sm:$0xff] }
 0x146   : > { %7317 = vrsqrt.f32 %v404_v21  ;;  %v398_v30 = vmul.f32 0.03125, %v390_v26  ;;  %6827 = vmatprep.mubr.msk.f32.mxu1 %vm317_vm0, %v7608_v23  ;;  %v504_v31 = vmul.f32 %v502_v5, %v496_v25 }
 0x147   : > { %v7306_v32 = vpop.eup %7305  ;;  %7319 = vrsqrt.f32 %v405_v22  ;;  %v505_v34 = vmul.f32 %v502_v5, %v497_v28 }
 0x148   : > { %v7308_v35 = vpop.eup %7307  ;;  %v406_v38 = vadd.f32 1e-05, %v398_v30  ;;  %v7616_v39 = vadd.f32 %v510_v10, %v504_v31  ;;  %v498_v36 = vmul.f32 %v7306_v32, %v7522_v37  ;;  %v617_v37 = vld [vmem:[%s8641_s4 + $0x8] sm:$0xff] }
 0x149   : > { %v7619_v41 = vadd.f32 %v510_v10, %v505_v34  ;;  %v415_v42 = vmul.f32 %v7308_v35, %v7530_v46 }
 0x14a   : > { %7321 = vrsqrt.f32 %v406_v38  ;;  %6828 = vmatmul.mubr.msk.f32.vlgmr.msra.gmra.mxu1 %vm317_vm0, %v7616_v39  ;;  %v506_v43 = vmul.f32 %v502_v5, %v498_v36 }
 0x14b   : > { %v7310_v44 = vpop.eup %7309  ;;  %6830 = vmatprep.mubr.msk.f32.mxu1 %vm317_vm0, %v7619_v41  ;;  %6834 = vmatpush3.msra.mxu1 %v7589_v24  ;;  %v427_v45 = vmul.f32 %v7614_v33, %v415_v42 }
 0x14c   : > { %v7312_v47 = vpop.eup %7311  ;;  %v416_v46 = vmul.f32 %v7310_v44, %v7533_v48  ;;  %6835 = vmatprep.subr.mxu1 %v618_v29  ;;  %v514_v49 = vadd.f32 %v510_v10, %v506_v43 }
 0x14d   : > { %6836 = vmatpush3.msra.mxu1 %v618_v29  ;;  %v439_v50 = vadd.f32 %v438_v40, %v427_v45  ;;  %v417_v52 = vmul.f32 %v7312_v47, %v7540_v56 }
 0x14e   : > { %6831 = vmatmul.mubr.msk.f32.gmra.mxu1 %vm317_vm0, %v514_v49  ;;  %6837 = vmatprep.subr.mxu1 %v617_v37  ;;  %v428_v24 = vmul.f32 %v7614_v33, %v416_v46 }
 0x14f   : > { %v7314_v53 = vpop.eup %7313  ;;  %6867 = vmatprep.mubr.msk.f32.mxu0 %vm317_vm0, %v439_v50  ;;  %6838 = vmatpush3.msra.mxu1 %v617_v37  ;;  %v429_v48 = vmul.f32 %v7614_v33, %v417_v52 }
 0x150   : > { %v7316_v54 = vpop.eup %7315  ;;  %6841 = vmatprep.mubr.msk.f32.mxu1 %vm317_vm0, %v439_v50  ;;  %6839 = vmatprep.subr.mxu1 %v616_v51  ;;  %v440_v55 = vadd.f32 %v438_v40, %v428_v24  ;;  %v418_v58 = vmul.f32 %v7314_v53, %v7542_v57 }
 0x151   : > { %6840 = vmatpush3.msra.mxu1 %v616_v51  ;;  %v441_v56 = vadd.f32 %v438_v40, %v429_v48  ;;  %v419_v59 = vmul.f32 %v7316_v54, %v7550_v2 }
 0x152   : > { %6842 = vmatmul.mubr.msk.f32.vlgmr.msra.gmra.mxu1 %vm317_vm0, %v440_v55  ;;  %6868 = vmatmul.mubr.msk.f32.vlgmr.msra.gmra.mxu0 %vm317_vm0, %v440_v55  ;;  %v430_v60 = vmul.f32 %v7614_v33, %v418_v58 }
 0x153   : > { %v7318_v61 = vpop.eup %7317  ;;  %6844 = vmatprep.mubr.msk.f32.mxu1 %vm317_vm0, %v441_v56  ;;  %6870 = vmatprep.mubr.msk.f32.mxu0 %vm317_vm0, %v441_v56  ;;  %v431_v62 = vmul.f32 %v7614_v33, %v419_v59 }
 0x154   : > { %v7320_v63 = vpop.eup %7319  ;;  %v442_v0 = vadd.f32 %v438_v40, %v430_v60  ;;  %v420_v57 = vmul.f32 %v7318_v61, %v7552_v3 }
 0x155   : > { %v443_v1 = vadd.f32 %v438_v40, %v431_v62  ;;  %v421_v2 = vmul.f32 %v7320_v63, %v7561_v12 }
 0x156   : > { %6845 = vmatmul.mubr.msk.f32.gmra.mxu1 %vm317_vm0, %v442_v0  ;;  %6871 = vmatmul.mubr.msk.f32.gmra.mxu0 %vm317_vm0, %v442_v0  ;;  %v432_v4 = vmul.f32 %v7614_v33, %v420_v57 }
 0x157   : > { %v7322_v5 = vpop.eup %7321  ;;  %6847 = vmatprep.mubr.msk.f32.mxu1 %vm317_vm0, %v443_v1  ;;  %6873 = vmatprep.mubr.msk.f32.mxu0 %vm317_vm0, %v443_v1  ;;  %v433_v6 = vmul.f32 %v7614_v33, %v421_v2 }
 0x158   : > { %v444_v7 = vadd.f32 %v438_v40, %v432_v4  ;;  %v422_v8 = vmul.f32 %v7322_v5, %v7564_v13  ;;  %v8645_v13 = vmov 0.0  }
 0x159   : > { %v445_v3 = vadd.f32 %v438_v40, %v433_v6  ;;  %6885 = vmatprep.subr.mxu1 %v8645_v13  ;;  %6892 = vmatprep.subr.mxu0 %v8645_v13 }
 0x15a   : > { %6848 = vmatmul.mubr.msk.f32.gmra.mxu1 %vm317_vm0, %v444_v7  ;;  %6874 = vmatmul.mubr.msk.f32.gmra.mxu0 %vm317_vm0, %v444_v7  ;;  %v434_v12 = vmul.f32 %v7614_v33, %v422_v8 }
 0x15b   : > { %6850 = vmatprep.mubr.msk.f32.mxu1 %vm317_vm0, %v445_v3  ;;  %6876 = vmatprep.mubr.msk.f32.mxu0 %vm317_vm0, %v445_v3 }
 0x15c   : > { %v446_v9 = vadd.f32 %v438_v40, %v434_v12 }
 0x15e   : > { %6851 = vmatmul.mubr.msk.f32.gmra.mxu1 %vm317_vm0, %v446_v9  ;;  %6877 = vmatmul.mubr.msk.f32.gmra.mxu0 %vm317_vm0, %v446_v9 }
 0x15f   : > { %6853 = vmatprep.mubr.msk.f32.mxu1 %vm317_vm0, %v7608_v23  ;;  %6879 = vmatprep.mubr.msk.f32.mxu0 %vm317_vm0, %v7608_v23 }
 0x162   : > { %6854 = vmatmul.mubr.msk.f32.gmra.mxu1 %vm317_vm0, %v7616_v39  ;;  %6880 = vmatmul.mubr.msk.f32.gmra.mxu0 %vm317_vm0, %v7616_v39 }
 0x163   : > { %6856 = vmatprep.mubr.msk.f32.mxu1 %vm317_vm0, %v7619_v41  ;;  %6882 = vmatprep.mubr.msk.f32.mxu0 %vm317_vm0, %v7619_v41 }
 0x166   : > { %6857 = vmatmul.mubr.msk.f32.gmra.mxu1 %vm317_vm0, %v514_v49  ;;  %6883 = vmatmul.mubr.msk.f32.gmra.mxu0 %vm317_vm0, %v514_v49 }
 0x167   : > { %6889 = vmatprep.mubr.msk.f32.mxu1 %vm7428_vm1, %v8645_v13  ;;  %6896 = vmatprep.mubr.msk.f32.mxu0 %vm7428_vm1, %v8645_v13 }
 0x20a   : > { %v7688_v10 = vpop.f32.mrf.mxu1 }
 0x20c   : > { %v7690_v11 = vpop.f32.mrf.mxu1 }
 0x20e   : > { %v7692_v14 = vpop.f32.mrf.mxu1 }
 0x210   : > { %v7694_v15 = vpop.f32.mrf.mxu1 }
 0x212   : > { %v7696_v16 = vpop.f32.mrf.mxu1  ;;  %v7698_v17 = vpop.f32.mrf.mxu0 }
 0x213   : > { %6886 = vmatpush3.xpose.msk.msra.mxu1 %vm898_vm2, %v7696_v16 }
 0x214   : > { %v7702_v18 = vpop.f32.mrf.mxu1  ;;  %v7704_v19 = vpop.f32.mrf.mxu0  ;;  %6887 = vmatprep.subr.mxu1 %v8645_v13 }
 0x216   : > { %v7707_v20 = vpop.f32.mrf.mxu1  ;;  %v7709_v21 = vpop.f32.mrf.mxu0 }
 0x217   : > { %6888 = vmatpush3.xpose.msk.msra.mxu1 %vm898_vm2, %v7702_v18  ;;  %6893 = vmatpush3.xpose.msk.msra.mxu0 %vm898_vm2, %v7707_v20 }
 0x218   : > { %v7715_v22 = vpop.f32.mrf.mxu1  ;;  %v7717_v23 = vpop.f32.mrf.mxu0  ;;  %6894 = vmatprep.subr.mxu0 %v8645_v13  ;;  %6899 = vmatprep.subr.mxu1 %v8645_v13 }
 0x21a   : > { %v7721_v25 = vpop.f32.mrf.mxu1  ;;  %v7723_v26 = vpop.f32.mrf.mxu0  ;;  %6890 = vmatmul.mubr.msk.f32.vlgmr.msra.gmra.mxu1 %vm898_vm2, %v7690_v11 }
 0x21b   : > { %6895 = vmatpush3.xpose.msk.msra.mxu0 %vm898_vm2, %v7715_v22  ;;  %6900 = vmatpush3.xpose.msk.msra.mxu1 %vm898_vm2, %v7721_v25 }
 0x21c   : > { %v7731_v27 = vpop.f32.mrf.mxu1  ;;  %v7733_v28 = vpop.f32.mrf.mxu0  ;;  %6901 = vmatprep.subr.mxu1 %v8645_v13  ;;  %6906 = vmatprep.subr.mxu0 %v8645_v13 }
 0x21d   : > { %6903 = vmatprep.mubr.msk.f32.mxu1 %vm7428_vm1, %v8645_v13 }
 0x21e   : > { %v7739_v30 = vpop.f32.mrf.mxu1  ;;  %6897 = vmatmul.mubr.msk.f32.vlgmr.msra.gmra.mxu0 %vm898_vm2, %v7688_v10  ;;  %v7747_v31 = vpop.f32.mrf.mxu0 }
 0x21f   : > { %6902 = vmatpush3.xpose.msk.msra.mxu1 %vm898_vm2, %v7731_v27  ;;  %6907 = vmatpush3.xpose.msk.msra.mxu0 %vm898_vm2, %v7739_v30 }
 0x220   : > { %v7749_v32 = vpop.f32.mrf.mxu1  ;;  %6908 = vmatprep.subr.mxu0 %v8645_v13  ;;  %6913 = vmatprep.subr.mxu1 %v8645_v13  ;;  %v7763_v34 = vpop.f32.mrf.mxu0 }
 0x221   : > { %6910 = vmatprep.mubr.msk.f32.mxu0 %vm7428_vm1, %v8645_v13 }
 0x222   : > { %v7755_v33 = vpop.f32.mrf.mxu1  ;;  %6904 = vmatmul.mubr.msk.f32.vlgmr.msra.gmra.mxu1 %vm898_vm2, %v7694_v15  ;;  %v7777_v39 = vpop.f32.mrf.mxu0 }
 0x223   : > { %6909 = vmatpush3.xpose.msk.msra.mxu0 %vm898_vm2, %v7749_v32  ;;  %6915 = vmatprep.mubr.msk.f32.mxu1 %vm7428_vm1, %v8645_v13 }
 0x224   : > { %v7765_v35 = vpop.f32.mrf.mxu1  ;;  %6923 = vmatprep.subr.mxu0 %v8645_v13  ;;  %v7791_v40 = vpop.f32.mrf.mxu0 }
 0x225   : > { %6914 = vmatpush3.xpose.msk.msra.mxu1 %vm898_vm2, %v7765_v35 }
 0x226   : > { %v7770_v38 = vpop.f32.mrf.mxu1  ;;  %6911 = vmatmul.mubr.msk.f32.vlgmr.msra.gmra.mxu0 %vm898_vm2, %v7692_v14  ;;  %6918 = vmatprep.subr.mxu1 %v8645_v13  ;;  %v7812_v41 = vpop.f32.mrf.mxu0 }
 0x227   : > { %6925 = vmatprep.mubr.msk.f32.mxu0 %vm7428_vm1, %v8645_v13 }
 0x228   : > { %v7779_v36 = vpop.f32.mrf.mxu1  ;;  %6916 = vmatmul.mubr.msk.f32.vlgmr.msra.gmra.mxu1 %vm898_vm2, %v7690_v11  ;;  %v7815_v43 = vpop.f32.mrf.mxu0 }
 0x229   : > { %6919 = vmatpush3.xpose.msk.msra.mxu1 %vm898_vm2, %v7755_v33  ;;  %6924 = vmatpush3.xpose.msk.msra.mxu0 %vm898_vm2, %v7779_v36 }
 0x22a   : > { %6920 = vmatprep.mubr.msk.f32.mxu1 %vm7428_vm1, %v8645_v13  ;;  %6928 = vmatprep.subr.mxu1 %v8645_v13 }
 0x22b   : > { %6933 = vmatprep.subr.mxu0 %v8645_v13 }
 0x22c   : > { %6921 = vmatmul.mubr.msk.f32.vlgmr.msra.gmra.mxu1 %vm898_vm2, %v7688_v10  ;;  %6926 = vmatmul.mubr.msk.f32.vlgmr.msra.gmra.mxu0 %vm898_vm2, %v7694_v15 }
 0x22d   : > { %6929 = vmatpush3.xpose.msk.msra.mxu1 %vm898_vm2, %v7770_v38  ;;  %6934 = vmatpush3.msra.mxu0 %v7791_v40 }
 0x22e   : > { %6930 = vmatprep.mubr.msk.f32.mxu1 %vm7428_vm1, %v8645_v13  ;;  %6938 = vmatprep.subr.mxu1 %v8645_v13 }
 0x22f   : > { %6935 = vmatprep.mubr.msk.f32.mxu0 %vm7428_vm1, %v8645_v13  ;;  %6943 = vmatprep.subr.mxu0 %v8645_v13 }
 0x230   : > { %6931 = vmatmul.mubr.msk.f32.vlgmr.msra.gmra.mxu1 %vm898_vm2, %v7692_v14 }
 0x231   : > { %6939 = vmatpush3.msra.mxu1 %v7777_v39  ;;  %6940 = vmatprep.mubr.msk.f32.mxu1 %vm7428_vm1, %v8645_v13 }
 0x232   : > { %6948 = vmatprep.subr.mxu1 %v8645_v13 }
 0x2da   : > { %v974_v29 = vpop.f32.mrf.mxu1 }
 0x2db   : > { %v1508_v42 = vsel %vm1507_vm3, %v974_v29, -inf }
 0x2dc   : > { %1509 = vmax.xlane.f32.xlu0 %v1508_v42  ;;  %v6891_v44 = vpop.f32.mrf.mxu1 }
 0x2de   : > { %v1053_v37 = vpop.f32.mrf.mxu0 }
 0x2df   : > { %v1511_v45 = vsel %vm1507_vm3, %v1053_v37, -inf }
 0x2e0   : > { %v6898_v47 = vpop.f32.mrf.mxu0  ;;  %1512 = vmax.xlane.f32.xlu0 %v1511_v45 }
 0x2e2   : > { %v1132_v46 = vpop.f32.mrf.mxu1 }
 0x2e3   : > { %v1514_v49 = vsel %vm1507_vm3, %v1132_v46, -inf }
 0x2e4   : > { %1515 = vmax.xlane.f32.xlu0 %v1514_v49  ;;  %v6905_v50 = vpop.f32.mrf.mxu1 }
 0x2e6   : > { %v1211_v51 = vpop.f32.mrf.mxu0 }
 0x2e7   : > { %v1517_v52 = vsel %vm1507_vm3, %v1211_v51, -inf }
 0x2e8   : > { %v6912_v24 = vpop.f32.mrf.mxu0  ;;  %1518 = vmax.xlane.f32.xlu0 %v1517_v52  ;;  %v1284_v53 = vpop.f32.mrf.mxu1 }
 0x2e9   : > { %v1520_v48 = vsel %vm898_vm2, %v1284_v53, -inf }
 0x2ea   : > { %1521 = vmax.xlane.f32.xlu1 %v1520_v48  ;;  %v6917_v54 = vpop.f32.mrf.mxu1 }
 0x2ec   : > { %v1357_v55 = vpop.f32.mrf.mxu1  ;;  %v1430_v58 = vpop.f32.mrf.mxu0 }
 0x2ed   : > { %v1523_v56 = vsel %vm898_vm2, %v1357_v55, -inf  ;;  %v1526_v62 = vsel %vm898_vm2, %v1430_v58, -inf }
 0x2ee   : > { %v6927_v59 = vpop.f32.mrf.mxu0  ;;  %1524 = vmax.xlane.f32.xlu1 %v1523_v56  ;;  %v6922_v60 = vpop.f32.mrf.mxu1 }
 0x2f0   : > { %v7822_v61 = vpop.f32.mrf.mxu1 }
 0x2f1   : > { %v1529_v0 = vsel %vm898_vm2, %v7822_v61, -inf }
 0x2f2   : > { %1527 = vmax.xlane.f32.xlu1 %v1526_v62  ;;  %v6932_v63 = vpop.f32.mrf.mxu1 }
 0x2f6   : > { %1530 = vmax.xlane.f32.xlu1 %v1529_v0 }
 0x365   : > { %v1510_v57 = vpop.xlane.xlu0 %1509 }
 0x369   : > { %v1513_v1 = vpop.xlane.xlu0 %1512 }
 0x36d   : > { %v1516_v9 = vpop.xlane.xlu0 %1515 }
 0x371   : > { %v1519_v48 = vpop.xlane.xlu0 %1518 }
 0x373   : > { %v1522_v2 = vpop.xlane.xlu1 %1521 }
 0x374   : > { %v1532_v4 = vmax.f32 %v1510_v57, %v1522_v2 }
 0x376   : > { %v1536_v5 = vsub.f32 %v974_v29, %v1532_v4  ;;  %v1548_v6 = vsub.f32 %v1284_v53, %v1532_v4 }
 0x377   : > { %v1525_v7 = vpop.xlane.xlu1 %1524 }
 0x378   : > { %v1540_v8 = vmul.f32 1.442695, %v1536_v5  ;;  %v1552_v3 = vmul.f32 1.442695, %v1548_v6  ;;  %v1533_v12 = vmax.f32 %v1513_v1, %v1525_v7 }
 0x37a   : > { %7323 = vpow2.f32 %v1540_v8  ;;  %v1537_v42 = vsub.f32 %v1053_v37, %v1533_v12  ;;  %v1549_v44 = vsub.f32 %v1357_v55, %v1533_v12 }
 0x37b   : > { %7325 = vpow2.f32 %v1552_v3  ;;  %v1528_v45 = vpop.xlane.xlu1 %1527 }
 0x37c   : > { %v1542_v47 = vmul.f32 1.442695, %v1537_v42  ;;  %v1554_v49 = vmul.f32 1.442695, %v1549_v44  ;;  %v1534_v50 = vmax.f32 %v1516_v9, %v1528_v45 }
 0x37e   : > { %7327 = vpow2.f32 %v1542_v47  ;;  %v1538_v52 = vsub.f32 %v1132_v46, %v1534_v50  ;;  %v1550_v24 = vsub.f32 %v1430_v58, %v1534_v50 }
 0x37f   : > { %7329 = vpow2.f32 %v1554_v49  ;;  %v1531_v29 = vpop.xlane.xlu1 %1530 }
 0x380   : > { %v1544_v53 = vmul.f32 1.442695, %v1538_v52  ;;  %v1556_v54 = vmul.f32 1.442695, %v1550_v24  ;;  %v1535_v56 = vmax.f32 %v1519_v48, %v1531_v29 }
 0x382   : > { %7331 = vpow2.f32 %v1544_v53  ;;  %v1539_v59 = vsub.f32 %v1211_v51, %v1535_v56  ;;  %v1551_v7 = vsub.f32 %v7822_v61, %v1535_v56 }
 0x383   : > { %7333 = vpow2.f32 %v1556_v54 }
 0x384   : > { %v1546_v60 = vmul.f32 1.442695, %v1539_v59  ;;  %v1558_v8 = vmul.f32 1.442695, %v1551_v7 }
 0x386   : > { %7335 = vpow2.f32 %v1546_v60 }
 0x387   : > { %v7827_v37 = vpop.eup %7323  ;;  %7337 = vpow2.f32 %v1558_v8 }
 0x388   : > { %v7326_v55 = vpop.eup %7325  ;;  %v1560_v62 = vsel %vm1507_vm3, %v7827_v37, 0.0 }
 0x389   : > { %1561 = vadd.xlane.f32.xlu0 %v1560_v62  ;;  %v1572_v46 = vsel %vm898_vm2, %v7326_v55, 0.0 }
 0x38a   : > { %1573 = vadd.xlane.f32.xlu1 %v1572_v46 }
 0x38b   : > { %v7832_v58 = vpop.eup %7327 }
 0x38c   : > { %v7330_v63 = vpop.eup %7329  ;;  %v1563_v0 = vsel %vm1507_vm3, %v7832_v58, 0.0 }
 0x38d   : > { %1564 = vadd.xlane.f32.xlu0 %v1563_v0  ;;  %v1575_v51 = vsel %vm898_vm2, %v7330_v63, 0.0 }
 0x38e   : > { %1576 = vadd.xlane.f32.xlu1 %v1575_v51 }
 0x38f   : > { %v7837_v57 = vpop.eup %7331 }
 0x390   : > { %v7334_v1 = vpop.eup %7333  ;;  %v1566_v2 = vsel %vm1507_vm3, %v7837_v57, 0.0 }
 0x391   : > { %1567 = vadd.xlane.f32.xlu0 %v1566_v2  ;;  %v1578_v4 = vsel %vm898_vm2, %v7334_v1, 0.0 }
 0x392   : > { %1579 = vadd.xlane.f32.xlu1 %v1578_v4 }
 0x393   : > { %v7842_v5 = vpop.eup %7335 }
 0x394   : > { %v1569_v6 = vsel %vm1507_vm3, %v7842_v5, 0.0  ;;  %v7865_v3 = vpop.eup %7337 }
 0x395   : > { %1570 = vadd.xlane.f32.xlu0 %v1569_v6  ;;  %v1581_v61 = vsel %vm898_vm2, %v7865_v3, 0.0 }
 0x3a3   : > { %2274 = vrot.lane.b32.xlu1 %v7707_v20, %s7429_s19 }
 0x3a7   : > { %2190 = vrot.lane.b32.xlu1 %v7702_v18, %s7429_s19 }
 0x3ab   : > { %2192 = vrot.lane.b32.xlu0 %v7696_v16, %s7429_s19 }
 0x3af   : > { %2188 = vrot.lane.b32.xlu0 %v7690_v11, %s7429_s19 }
 0x3b3   : > { %2270 = vrot.lane.b32.xlu0 %v7688_v10, %s7429_s19 }
 0x3b7   : > { %2354 = vrot.lane.b32.xlu0 %v7731_v27, %s7429_s19 }
 0x3bb   : > { %2352 = vrot.lane.b32.xlu0 %v7694_v15, %s7429_s19 }
 0x3bf   : > { %2516 = vrot.lane.b32.xlu0 %v7765_v35, %s7429_s19 }
 0x3c3   : > { %2664 = vrot.lane.b32.xlu0 %v7779_v36, %s7429_s19 }
 0x3cb   : > { %1582 = vadd.xlane.f32.xlu1 %v1581_v61 }
 0x3dc   : > { %2272 = vrot.lane.b32.xlu1 %v7715_v22, %s7429_s19 }
 0x3e0   : > { %2356 = vrot.lane.b32.xlu1 %v7721_v25, %s7429_s19 }
 0x3e4   : > { %2438 = vrot.lane.b32.xlu1 %v7739_v30, %s7429_s19 }
 0x3e8   : > { %2436 = vrot.lane.b32.xlu1 %v7749_v32, %s7429_s19 }
 0x3ec   : > { %2434 = vrot.lane.b32.xlu1 %v7692_v14, %s7429_s19 }
 0x3f0   : > { %2590 = vrot.lane.b32.xlu1 %v7755_v33, %s7429_s19 }
 0x3f4   : > { %2738 = vrot.lane.b32.xlu1 %v7770_v38, %s7429_s19 }
 0x412   : > { %v1562_v12 = vpop.xlane.xlu0 %1561 }
 0x413   : > { %v1574_v9 = vpop.xlane.xlu1 %1573 }
 0x414   : > { %v1584_v42 = vadd.f32 %v1574_v9, %v1562_v12 }
 0x416   : > { %7339 = vrcp.f32 %v1584_v42  ;;  %v1565_v44 = vpop.xlane.xlu0 %1564 }
 0x417   : > { %v1577_v45 = vpop.xlane.xlu1 %1576 }
 0x418   : > { %v1585_v47 = vadd.f32 %v1577_v45, %v1565_v44 }
 0x41a   : > { %7341 = vrcp.f32 %v1585_v47  ;;  %v1568_v49 = vpop.xlane.xlu0 %1567 }
 0x41b   : > { %v1580_v50 = vpop.xlane.xlu1 %1579 }
 0x41c   : > { %v1586_v52 = vadd.f32 %v1580_v50, %v1568_v49 }
 0x41e   : > { %7343 = vrcp.f32 %v1586_v52  ;;  %v1571_v59 = vpop.xlane.xlu0 %1570 }
 0x422   : > { %v2193_v46 = vpop.permute.xlu0 %2192 }
 0x423   : > { %v7340_v24 = vpop.eup %7339 }
 0x424   : > { %v1600_v48 = vmul.f32 %v7340_v24, %v7326_v55  ;;  %v1596_v60 = vmul.f32 %v7340_v24, %v7827_v37  ;;  %v2275_v55 = vpop.permute.xlu1 %2274 }
 0x426   : > { %6936 = vmatmul.mubr.msk.f32.vlgmr.msra.gmra.mxu0 %vm898_vm2, %v1600_v48 }
 0x427   : > { %v7884_v29 = vpop.eup %7341  ;;  %6944 = vmatpush3.msra.mxu0 %v7815_v43  ;;  %6945 = vmatprep.mubr.msk.f32.mxu0 %vm7428_vm1, %v8645_v13 }
 0x428   : > { %v1601_v53 = vmul.f32 %v7884_v29, %v7330_v63  ;;  %6953 = vmatprep.subr.mxu0 %v8645_v13  ;;  %v2191_v37 = vpop.permute.xlu1 %2190  ;;  %v2189_v63 = vpop.permute.xlu0 %2188  ;;  %v1597_v9 = vmul.f32 %v7884_v29, %v7832_v58 }
 0x42a   : > { %6941 = vmatmul.mubr.msk.f32.vlgmr.msra.gmra.mxu1 %vm898_vm2, %v1601_v53 }
 0x42b   : > { %v7344_v54 = vpop.eup %7343  ;;  %6949 = vmatpush3.msra.mxu1 %v7812_v41  ;;  %6950 = vmatprep.mubr.msk.f32.mxu1 %vm7428_vm1, %v8645_v13 }
 0x42c   : > { %v1602_v56 = vmul.f32 %v7344_v54, %v7334_v1  ;;  %6960 = vmatprep.subr.mxu1 %v8645_v13  ;;  %v1598_v62 = vmul.f32 %v7344_v54, %v7837_v57  ;;  %v2271_v0 = vpop.permute.xlu0 %2270 }
 0x42e   : > { %6946 = vmatmul.mubr.msk.f32.vlgmr.msra.gmra.mxu0 %vm898_vm2, %v1602_v56 }
 0x42f   : > { %6954 = vmatpush3.msra.mxu0 %v7698_v17  ;;  %6957 = vmatprep.mubr.msk.f32.mxu0 %vm7428_vm1, %v8645_v13 }
 0x430   : > { %6955 = vmatprep.subr.mxu0 %v8645_v13  ;;  %v2355_v1 = vpop.permute.xlu0 %2354 }
 0x431   : > { %6956 = vmatpush3.msra.mxu0 %v7704_v19 }
 0x432   : > { %6967 = vmatprep.subr.mxu0 %v8645_v13  ;;  %6958 = vmatmul.mubr.msk.f32.vlgmr.msra.gmra.mxu0 %vm1507_vm3, %v1596_v60 }
 0x433   : > { %6968 = vmatpush3.msra.mxu0 %v7723_v26  ;;  %6971 = vmatprep.mubr.msk.f32.mxu0 %vm7428_vm1, %v8645_v13 }
 0x434   : > { %6969 = vmatprep.subr.mxu0 %v8645_v13  ;;  %v2353_v4 = vpop.permute.xlu0 %2352 }
 0x435   : > { %6970 = vmatpush3.msra.mxu0 %v7733_v28 }
 0x436   : > { %6981 = vmatprep.subr.mxu0 %v8645_v13  ;;  %6972 = vmatmul.mubr.msk.f32.vlgmr.msra.gmra.mxu0 %vm1507_vm3, %v1598_v62 }
 0x437   : > { %6982 = vmatpush3.xpose.msk.msra.mxu0 %vm898_vm2, %v2193_v46  ;;  %6985 = vmatprep.mubr.msk.f32.mxu0 %vm7428_vm1, %v8645_v13 }
 0x438   : > { %6983 = vmatprep.subr.mxu0 %v8645_v13  ;;  %v2517_v7 = vpop.permute.xlu0 %2516 }
 0x43b   : > { %6984 = vmatpush3.xpose.msk.msra.mxu0 %vm898_vm2, %v2191_v37 }
 0x43c   : > { %6995 = vmatprep.subr.mxu0 %v8645_v13  ;;  %v2665_v12 = vpop.permute.xlu0 %2664 }
 0x43e   : > { %6986 = vmatmul.mubr.msk.f32.vlgmr.msra.gmra.mxu0 %vm898_vm2, %v2189_v63 }
 0x43f   : > { %6999 = vmatprep.mubr.msk.f32.mxu0 %vm7428_vm1, %v8645_v13 }
 0x454   : > { %v1583_v51 = vpop.xlane.xlu1 %1582 }
 0x455   : > { %v1587_v57 = vadd.f32 %v1583_v51, %v1571_v59 }
 0x457   : > { %7345 = vrcp.f32 %v1587_v57 }
 0x458   : > { %v2273_v2 = vpop.permute.xlu1 %2272 }
 0x45c   : > { %v2357_v6 = vpop.permute.xlu1 %2356 }
 0x45d   : > { %6996 = vmatpush3.xpose.msk.msra.mxu0 %vm898_vm2, %v2357_v6 }
 0x45e   : > { %6997 = vmatprep.subr.mxu0 %v8645_v13 }
 0x461   : > { %6998 = vmatpush3.xpose.msk.msra.mxu0 %vm898_vm2, %v2355_v1 }
 0x462   : > { %7009 = vmatprep.subr.mxu0 %v8645_v13 }
 0x464   : > { %v7346_v8 = vpop.eup %7345  ;;  %7000 = vmatmul.mubr.msk.f32.vlgmr.msra.gmra.mxu0 %vm898_vm2, %v2353_v4 }
 0x465   : > { %7010 = vmatpush3.xpose.msk.msra.mxu0 %vm898_vm2, %v2517_v7  ;;  %v1603_v61 = vmul.f32 %v7346_v8, %v7865_v3  ;;  %7011 = vmatprep.mubr.msk.f32.mxu0 %vm7428_vm1, %v8645_v13  ;;  %v2439_v3 = vpop.permute.xlu1 %2438  ;;  %v1599_v58 = vmul.f32 %v7346_v8, %v7842_v5 }
 0x466   : > { %7019 = vmatprep.subr.mxu0 %v8645_v13 }
 0x467   : > { %6951 = vmatmul.mubr.msk.f32.vlgmr.msra.gmra.mxu1 %vm898_vm2, %v1603_v61 }
 0x468   : > { %6961 = vmatpush3.msra.mxu1 %v7709_v21  ;;  %7012 = vmatmul.mubr.msk.f32.vlgmr.msra.gmra.mxu0 %vm898_vm2, %v2189_v63 }
 0x469   : > { %6962 = vmatprep.subr.mxu1 %v8645_v13  ;;  %7020 = vmatpush3.xpose.msk.msra.mxu0 %vm898_vm2, %v2665_v12  ;;  %v2437_v42 = vpop.permute.xlu1 %2436 }
 0x46a   : > { %6963 = vmatpush3.msra.mxu1 %v7717_v23  ;;  %6964 = vmatprep.mubr.msk.f32.mxu1 %vm7428_vm1, %v8645_v13 }
 0x46b   : > { %6974 = vmatprep.subr.mxu1 %v8645_v13  ;;  %6965 = vmatmul.mubr.msk.f32.vlgmr.msra.gmra.mxu1 %vm1507_vm3, %v1597_v9 }
 0x46c   : > { %6975 = vmatpush3.msra.mxu1 %v7747_v31  ;;  %7021 = vmatprep.mubr.msk.f32.mxu0 %vm7428_vm1, %v8645_v13 }
 0x46d   : > { %6976 = vmatprep.subr.mxu1 %v8645_v13  ;;  %7022 = vmatmul.mubr.msk.f32.vlgmr.msra.gmra.mxu0 %vm898_vm2, %v2353_v4  ;;  %v2435_v5 = vpop.permute.xlu1 %2434 }
 0x46e   : > { %6977 = vmatpush3.msra.mxu1 %v7763_v34  ;;  %6978 = vmatprep.mubr.msk.f32.mxu1 %vm7428_vm1, %v8645_v13 }
 0x46f   : > { %6988 = vmatprep.subr.mxu1 %v8645_v13  ;;  %6979 = vmatmul.mubr.msk.f32.vlgmr.msra.gmra.mxu1 %vm1507_vm3, %v1599_v58 }
 0x470   : > { %6989 = vmatpush3.xpose.msk.msra.mxu1 %vm898_vm2, %v2275_v55  ;;  %6992 = vmatprep.mubr.msk.f32.mxu1 %vm7428_vm1, %v8645_v13 }
 0x471   : > { %6990 = vmatprep.subr.mxu1 %v8645_v13  ;;  %7029 = vmatprep.subr.mxu0 %v8645_v13  ;;  %v2591_v44 = vpop.permute.xlu1 %2590 }
 0x472   : > { %7031 = vmatprep.mubr.msk.f32.mxu0 %vm7428_vm1, %v8645_v13 }
 0x474   : > { %6991 = vmatpush3.xpose.msk.msra.mxu1 %vm898_vm2, %v2273_v2 }
 0x475   : > { %7002 = vmatprep.subr.mxu1 %v8645_v13  ;;  %v2739_v45 = vpop.permute.xlu1 %2738 }
 0x477   : > { %6993 = vmatmul.mubr.msk.f32.vlgmr.msra.gmra.mxu1 %vm898_vm2, %v2271_v0 }
 0x478   : > { %7003 = vmatpush3.xpose.msk.msra.mxu1 %vm898_vm2, %v2439_v3  ;;  %7006 = vmatprep.mubr.msk.f32.mxu1 %vm7428_vm1, %v8645_v13 }
 0x479   : > { %7004 = vmatprep.subr.mxu1 %v8645_v13 }
 0x47c   : > { %7005 = vmatpush3.xpose.msk.msra.mxu1 %vm898_vm2, %v2437_v42 }
 0x47d   : > { %7014 = vmatprep.subr.mxu1 %v8645_v13 }
 0x47f   : > { %7007 = vmatmul.mubr.msk.f32.vlgmr.msra.gmra.mxu1 %vm898_vm2, %v2435_v5 }
 0x480   : > { %7015 = vmatpush3.xpose.msk.msra.mxu1 %vm898_vm2, %v2591_v44  ;;  %7016 = vmatprep.mubr.msk.f32.mxu1 %vm7428_vm1, %v8645_v13 }
 0x481   : > { %7024 = vmatprep.subr.mxu1 %v8645_v13 }
 0x483   : > { %7017 = vmatmul.mubr.msk.f32.vlgmr.msra.gmra.mxu1 %vm898_vm2, %v2271_v0 }
 0x484   : > { %7025 = vmatpush3.xpose.msk.msra.mxu1 %vm898_vm2, %v2739_v45  ;;  %7026 = vmatprep.mubr.msk.f32.mxu1 %vm7428_vm1, %v8645_v13 }
 0x485   : > { %7034 = vmatprep.subr.mxu1 %v8645_v13 }
 0x487   : > { %7027 = vmatmul.mubr.msk.f32.vlgmr.msra.gmra.mxu1 %vm898_vm2, %v2435_v5 }
 0x488   : > { %7036 = vmatprep.mubr.msk.f32.mxu1 %vm7428_vm1, %v8645_v13 }
 0x4e6   : > { %v1673_v47 = vpop.f32.mrf.mxu0 }
 0x4e8   : > { %v6937_v49 = vpop.f32.mrf.mxu0 }
 0x4ea   : > { %v1746_v50 = vpop.f32.mrf.mxu1 }
 0x4ec   : > { %v6942_v52 = vpop.f32.mrf.mxu1 }
 0x4ee   : > { %v1819_v24 = vpop.f32.mrf.mxu0 }
 0x4f0   : > { %v6947_v48 = vpop.f32.mrf.mxu0 }
 0x4f2   : > { %v1965_v29 = vpop.f32.mrf.mxu0 }
 0x4f3   : > { %v7984_v53 = vadd.f32 %v1965_v29, %v1673_v47 }
 0x4f4   : > { %v6959_v54 = vpop.f32.mrf.mxu0 }
 0x4f6   : > { %v2111_v56 = vpop.f32.mrf.mxu0 }
 0x4f7   : > { %v7986_v59 = vadd.f32 %v2111_v56, %v1819_v24 }
 0x4f8   : > { %v6973_v60 = vpop.f32.mrf.mxu0 }
 0x4fe   : > { %v2266_v55 = vpop.f32.mrf.mxu0 }
 0x4ff   : > { %v2812_v62 = vsel %vm1507_vm3, %v2266_v55, -inf }
 0x500   : > { %2813 = vmax.xlane.f32.xlu0 %v2812_v62  ;;  %v6987_v46 = vpop.f32.mrf.mxu0 }
 0x524   : > { %v7989_v37 = vpop.f32.mrf.mxu0 }
 0x525   : > { %v2818_v44 = vsel %vm1507_vm3, %v7989_v37, -inf }
 0x526   : > { %v7001_v63 = vpop.f32.mrf.mxu0 }
 0x527   : > { %v1892_v0 = vpop.f32.mrf.mxu1 }
 0x528   : > { %v2586_v51 = vpop.f32.mrf.mxu0 }
 0x529   : > { %v6952_v57 = vpop.f32.mrf.mxu1  ;;  %v2824_v1 = vsel %vm898_vm2, %v2586_v51, -inf }
 0x52a   : > { %2825 = vmax.xlane.f32.xlu1 %v2824_v1  ;;  %v7013_v2 = vpop.f32.mrf.mxu0 }
 0x52b   : > { %v2038_v4 = vpop.f32.mrf.mxu1 }
 0x52c   : > { %v7992_v6 = vadd.f32 %v2038_v4, %v1746_v50 }
 0x52d   : > { %v7994_v7 = vpop.f32.mrf.mxu0  ;;  %v6966_v8 = vpop.f32.mrf.mxu1 }
 0x52e   : > { %v2830_v54 = vsel %vm898_vm2, %v7994_v7, -inf }
 0x52f   : > { %v7023_v61 = vpop.f32.mrf.mxu0  ;;  %v2184_v12 = vpop.f32.mrf.mxu1 }
 0x530   : > { %v7996_v9 = vadd.f32 %v2184_v12, %v1892_v0 }
 0x531   : > { %v6980_v3 = vpop.f32.mrf.mxu1 }
 0x532   : > { %8647 = vst [vmem:[#allocation2_spill] sm:$0xff] %v7996_v9 }
 0x537   : > { %v2348_v58 = vpop.f32.mrf.mxu1 }
 0x538   : > { %v2815_v42 = vsel %vm1507_vm3, %v2348_v58, -inf }
 0x539   : > { %2816 = vmax.xlane.f32.xlu0 %v2815_v42  ;;  %v6994_v5 = vpop.f32.mrf.mxu1 }
 0x53b   : > { %2986 = vrot.lane.b32.xlu1 %v7777_v39, %s7429_s19 }
 0x53d   : > { %2819 = vmax.xlane.f32.xlu0 %v2818_v44 }
 0x53f   : > { %v8003_v45 = vpop.f32.mrf.mxu1  ;;  %3063 = vrot.lane.b32.xlu1 %v7815_v43, %s7429_s19 }
 0x540   : > { %v2821_v48 = vsel %vm1507_vm3, %v8003_v45, -inf }
 0x541   : > { %v7008_v47 = vpop.f32.mrf.mxu1 }
 0x543   : > { %v2660_v49 = vpop.f32.mrf.mxu1  ;;  %3140 = vrot.lane.b32.xlu1 %v7812_v41, %s7429_s19 }
 0x544   : > { %v2827_v50 = vsel %vm898_vm2, %v2660_v49, -inf }
 0x545   : > { %2828 = vmax.xlane.f32.xlu0 %v2827_v50  ;;  %v7018_v52 = vpop.f32.mrf.mxu1 }
 0x547   : > { %v8010_v24 = vpop.f32.mrf.mxu1  ;;  %3301 = vrot.lane.b32.xlu1 %v7709_v21, %s7429_s19 }
 0x548   : > { %v2833_v56 = vsel %vm898_vm2, %v8010_v24, -inf }
 0x549   : > { %2822 = vmax.xlane.f32.xlu0 %v2821_v48  ;;  %v7028_v29 = vpop.f32.mrf.mxu1 }
 0x54b   : > { %3299 = vrot.lane.b32.xlu1 %v7717_v23, %s7429_s19 }
 0x54f   : > { %3463 = vrot.lane.b32.xlu1 %v7747_v31, %s7429_s19 }
 0x55f   : > { %2909 = vrot.lane.b32.xlu0 %v7791_v40, %s7429_s19 }
 0x563   : > { %3220 = vrot.lane.b32.xlu0 %v7698_v17, %s7429_s19 }
 0x567   : > { %3218 = vrot.lane.b32.xlu0 %v7704_v19, %s7429_s19 }
 0x56b   : > { %3382 = vrot.lane.b32.xlu0 %v7723_v26, %s7429_s19 }
 0x56f   : > { %3380 = vrot.lane.b32.xlu0 %v7733_v28, %s7429_s19 }
 0x573   : > { %2831 = vmax.xlane.f32.xlu1 %v2830_v54 }
 0x577   : > { %2834 = vmax.xlane.f32.xlu1 %v2833_v56 }
 0x588   : > { %3461 = vrot.lane.b32.xlu1 %v7763_v34, %s7429_s19 }
 0x589   : > { %v2814_v60 = vpop.xlane.xlu0 %2813 }
 0x5b3   : > { %v2826_v62 = vpop.xlane.xlu1 %2825 }
 0x5b4   : > { %v2836_v46 = vmax.f32 %v2814_v60, %v2826_v62 }
 0x5b6   : > { %v2840_v63 = vsub.f32 %v2266_v55, %v2836_v46  ;;  %v2852_v0 = vsub.f32 %v2586_v51, %v2836_v46 }
 0x5b7   : > { %v2987_v57 = vpop.permute.xlu1 %2986 }
 0x5b8   : > { %v2844_v1 = vmul.f32 1.442695, %v2840_v63  ;;  %v2856_v2 = vmul.f32 1.442695, %v2852_v0  ;;  %7035 = vmatpush3.msra.mxu1 %v2987_v57 }
 0x5b9   : > { %7044 = vmatprep.subr.mxu1 %v8645_v13 }
 0x5ba   : > { %7347 = vpow2.f32 %v2844_v1 }
 0x5bb   : > { %7349 = vpow2.f32 %v2856_v2  ;;  %v8046_v29 = vpop.permute.xlu1 %3063 }
 0x5c2   : > { %v2817_v4 = vpop.xlane.xlu0 %2816 }
 0x5c6   : > { %v2820_v51 = vpop.xlane.xlu0 %2819 }
 0x5c7   : > { %v8037_v8 = vpop.eup %7347 }
 0x5c8   : > { %v8039_v61 = vpop.eup %7349  ;;  %v2864_v12 = vsel %vm1507_vm3, %v8037_v8, 0.0 }
 0x5c9   : > { %2865 = vadd.xlane.f32.xlu0 %v2864_v12  ;;  %v2876_v55 = vsel %vm898_vm2, %v8039_v61, 0.0 }
 0x5ca   : > { %2877 = vadd.xlane.f32.xlu1 %v2876_v55 }
 0x5ce   : > { %v2829_v3 = vpop.xlane.xlu0 %2828 }
 0x5cf   : > { %v2837_v42 = vmax.f32 %v2817_v4, %v2829_v3 }
 0x5d1   : > { %v2841_v5 = vsub.f32 %v2348_v58, %v2837_v42  ;;  %v2853_v44 = vsub.f32 %v2660_v49, %v2837_v42  ;;  %v8056_v49 = vpop.permute.xlu1 %3140 }
 0x5d2   : > { %v2823_v47 = vpop.xlane.xlu0 %2822 }
 0x5d3   : > { %v2846_v50 = vmul.f32 1.442695, %v2841_v5  ;;  %v2858_v52 = vmul.f32 1.442695, %v2853_v44 }
 0x5d5   : > { %7351 = vpow2.f32 %v2846_v50  ;;  %v8058_v62 = vpop.permute.xlu1 %3301 }
 0x5d6   : > { %7353 = vpow2.f32 %v2858_v52  ;;  %v2910_v48 = vpop.permute.xlu0 %2909 }
 0x5d7   : > { %7030 = vmatpush3.msra.mxu0 %v2910_v48 }
 0x5d8   : > { %7039 = vmatprep.subr.mxu0 %v8645_v13 }
 0x5d9   : > { %v8060_v46 = vpop.permute.xlu1 %3299 }
 0x5da   : > { %v3221_v48 = vpop.permute.xlu0 %3220 }
 0x5dd   : > { %v8062_v63 = vpop.permute.xlu1 %3463 }
 0x5e2   : > { %v8048_v54 = vpop.eup %7351 }
 0x5e3   : > { %v8050_v56 = vpop.eup %7353  ;;  %v2867_v60 = vsel %vm1507_vm3, %v8048_v54, 0.0 }
 0x5e4   : > { %2868 = vadd.xlane.f32.xlu0 %v2867_v60  ;;  %v2879_v58 = vsel %vm898_vm2, %v8050_v56, 0.0  ;;  %v3219_v60 = vpop.permute.xlu0 %3218 }
 0x5e5   : > { %2880 = vadd.xlane.f32.xlu1 %v2879_v58 }
 0x5fc   : > { %v2832_v0 = vpop.xlane.xlu1 %2831 }
 0x5fd   : > { %v2838_v57 = vmax.f32 %v2820_v51, %v2832_v0  ;;  %v3383_v0 = vpop.permute.xlu0 %3382 }
 0x5ff   : > { %v2842_v1 = vsub.f32 %v7989_v37, %v2838_v57  ;;  %v2854_v2 = vsub.f32 %v7994_v7, %v2838_v57 }
 0x600   : > { %v2835_v4 = vpop.xlane.xlu1 %2834 }
 0x601   : > { %v2848_v12 = vmul.f32 1.442695, %v2842_v1  ;;  %v2860_v55 = vmul.f32 1.442695, %v2854_v2  ;;  %v2839_v3 = vmax.f32 %v2823_v47, %v2835_v4  ;;  %v3381_v57 = vpop.permute.xlu0 %3380 }
 0x603   : > { %7355 = vpow2.f32 %v2848_v12  ;;  %v2843_v42 = vsub.f32 %v8003_v45, %v2839_v3  ;;  %v2855_v45 = vsub.f32 %v8010_v24, %v2839_v3 }
 0x604   : > { %7357 = vpow2.f32 %v2860_v55  ;;  %v8099_v1 = vpop.permute.xlu1 %3461 }
 0x605   : > { %v2850_v5 = vmul.f32 1.442695, %v2843_v42  ;;  %v2862_v52 = vmul.f32 1.442695, %v2855_v45 }
 0x607   : > { %7359 = vpow2.f32 %v2850_v5 }
 0x608   : > { %7361 = vpow2.f32 %v2862_v52 }
 0x610   : > { %v8067_v44 = vpop.eup %7355 }
 0x611   : > { %v7358_v50 = vpop.eup %7357  ;;  %v2870_v51 = vsel %vm1507_vm3, %v8067_v44, 0.0 }
 0x612   : > { %2871 = vadd.xlane.f32.xlu0 %v2870_v51  ;;  %v2882_v37 = vsel %vm898_vm2, %v7358_v50, 0.0 }
 0x613   : > { %2883 = vadd.xlane.f32.xlu1 %v2882_v37 }
 0x614   : > { %v8072_v7 = vpop.eup %7359 }
 0x615   : > { %v2873_v47 = vsel %vm1507_vm3, %v8072_v7, 0.0  ;;  %v8091_v24 = vpop.eup %7361 }
 0x616   : > { %2874 = vadd.xlane.f32.xlu0 %v2873_v47  ;;  %v2885_v58 = vsel %vm898_vm2, %v8091_v24, 0.0 }
 0x624   : > { %3626 = vrot.lane.b32.xlu1 %v7707_v20, %s7430_s20 }
 0x62c   : > { %3544 = vrot.lane.b32.xlu0 %v7696_v16, %s7430_s20 }
 0x630   : > { %3542 = vrot.lane.b32.xlu0 %v7702_v18, %s7430_s20 }
 0x634   : > { %3540 = vrot.lane.b32.xlu0 %v7690_v11, %s7430_s20 }
 0x638   : > { %3622 = vrot.lane.b32.xlu0 %v7688_v10, %s7430_s20 }
 0x63c   : > { %3706 = vrot.lane.b32.xlu0 %v7731_v27, %s7430_s20 }
 0x640   : > { %3704 = vrot.lane.b32.xlu0 %v7694_v15, %s7430_s20 }
 0x644   : > { %3868 = vrot.lane.b32.xlu0 %v7765_v35, %s7430_s20 }
 0x648   : > { %2886 = vadd.xlane.f32.xlu1 %v2885_v58  ;;  %4016 = vrot.lane.b32.xlu0 %v7779_v36, %s7430_s20 }
 0x652   : > { %v2866_v2 = vpop.xlane.xlu0 %2865 }
 0x653   : > { %v2878_v4 = vpop.xlane.xlu1 %2877 }
 0x654   : > { %v2888_v12 = vadd.f32 %v2878_v4, %v2866_v2 }
 0x656   : > { %7363 = vrcp.f32 %v2888_v12 }
 0x659   : > { %3624 = vrot.lane.b32.xlu1 %v7715_v22, %s7430_s20 }
 0x65d   : > { %3708 = vrot.lane.b32.xlu1 %v7721_v25, %s7430_s20 }
 0x661   : > { %3790 = vrot.lane.b32.xlu1 %v7739_v30, %s7430_s20 }
 0x663   : > { %v7364_v55 = vpop.eup %7363 }
 0x664   : > { %v2904_v3 = vmul.f32 %v7364_v55, %v8039_v61 }
 0x665   : > { %3788 = vrot.lane.b32.xlu1 %v7749_v32, %s7430_s20 }
 0x666   : > { %7032 = vmatmul.mubr.msk.f32.vlgmr.msra.gmra.mxu0 %vm898_vm2, %v2904_v3 }
 0x667   : > { %7040 = vmatpush3.msra.mxu0 %v8046_v29  ;;  %7041 = vmatprep.mubr.msk.f32.mxu0 %vm7428_vm1, %v8645_v13 }
 0x668   : > { %7049 = vmatprep.subr.mxu0 %v8645_v13 }
 0x669   : > { %3786 = vrot.lane.b32.xlu1 %v7692_v14, %s7430_s20 }
 0x66d   : > { %v2869_v42 = vpop.xlane.xlu0 %2868  ;;  %3942 = vrot.lane.b32.xlu1 %v7755_v33, %s7430_s20 }
 0x66e   : > { %v2881_v61 = vpop.xlane.xlu1 %2880 }
 0x66f   : > { %v2889_v5 = vadd.f32 %v2881_v61, %v2869_v42 }
 0x671   : > { %7365 = vrcp.f32 %v2889_v5  ;;  %4090 = vrot.lane.b32.xlu1 %v7770_v38, %s7430_s20 }
 0x67e   : > { %v8121_v51 = vpop.eup %7365 }
 0x67f   : > { %v2905_v29 = vmul.f32 %v8121_v51, %v8050_v56  ;;  %v2900_v56 = vmul.f32 %v7364_v55, %v8037_v8 }
 0x681   : > { %7037 = vmatmul.mubr.msk.f32.vlgmr.msra.gmra.mxu1 %vm898_vm2, %v2905_v29 }
 0x682   : > { %7045 = vmatpush3.msra.mxu1 %v8056_v49  ;;  %7046 = vmatprep.mubr.msk.f32.mxu1 %vm7428_vm1, %v8645_v13 }
 0x683   : > { %7056 = vmatprep.subr.mxu1 %v8645_v13 }
 0x69b   : > { %v2872_v37 = vpop.xlane.xlu0 %2871 }
 0x69c   : > { %v2884_v47 = vpop.xlane.xlu1 %2883 }
 0x69d   : > { %v2890_v45 = vadd.f32 %v2884_v47, %v2872_v37  ;;  %v2901_v37 = vmul.f32 %v8121_v51, %v8048_v54 }
 0x69f   : > { %7367 = vrcp.f32 %v2890_v45  ;;  %v2875_v58 = vpop.xlane.xlu0 %2874 }
 0x6a3   : > { %v3545_v49 = vpop.permute.xlu0 %3544 }
 0x6a7   : > { %v3543_v8 = vpop.permute.xlu0 %3542 }
 0x6ac   : > { %v7368_v52 = vpop.eup %7367 }
 0x6ad   : > { %v2906_v2 = vmul.f32 %v7368_v52, %v7358_v50  ;;  %v2902_v50 = vmul.f32 %v7368_v52, %v8067_v44  ;;  %v3627_v44 = vpop.permute.xlu1 %3626 }
 0x6af   : > { %7042 = vmatmul.mubr.msk.f32.vlgmr.msra.gmra.mxu0 %vm898_vm2, %v2906_v2 }
 0x6b0   : > { %7050 = vmatpush3.msra.mxu0 %v3221_v48  ;;  %7053 = vmatprep.mubr.msk.f32.mxu0 %vm7428_vm1, %v8645_v13  ;;  %v3541_v48 = vpop.permute.xlu0 %3540 }
 0x6b1   : > { %7051 = vmatprep.subr.mxu0 %v8645_v13 }
 0x6b2   : > { %7052 = vmatpush3.msra.mxu0 %v3219_v60 }
 0x6b3   : > { %7063 = vmatprep.subr.mxu0 %v8645_v13  ;;  %7054 = vmatmul.mubr.msk.f32.vlgmr.msra.gmra.mxu0 %vm1507_vm3, %v2900_v56 }
 0x6b4   : > { %7064 = vmatpush3.msra.mxu0 %v3383_v0  ;;  %7067 = vmatprep.mubr.msk.f32.mxu0 %vm7428_vm1, %v8645_v13  ;;  %v3623_v60 = vpop.permute.xlu0 %3622 }
 0x6b5   : > { %7065 = vmatprep.subr.mxu0 %v8645_v13 }
 0x6b6   : > { %7066 = vmatpush3.msra.mxu0 %v3381_v57 }
 0x6b7   : > { %7077 = vmatprep.subr.mxu0 %v8645_v13  ;;  %7068 = vmatmul.mubr.msk.f32.vlgmr.msra.gmra.mxu0 %vm1507_vm3, %v2902_v50 }
 0x6b8   : > { %7078 = vmatpush3.xpose.msk.msra.mxu0 %vm898_vm2, %v3545_v49  ;;  %7081 = vmatprep.mubr.msk.f32.mxu0 %vm7428_vm1, %v8645_v13  ;;  %v3707_v4 = vpop.permute.xlu0 %3706 }
 0x6b9   : > { %7079 = vmatprep.subr.mxu0 %v8645_v13 }
 0x6bc   : > { %7080 = vmatpush3.xpose.msk.msra.mxu0 %vm898_vm2, %v3543_v8  ;;  %v3705_v55 = vpop.permute.xlu0 %3704 }
 0x6bd   : > { %7091 = vmatprep.subr.mxu0 %v8645_v13 }
 0x6bf   : > { %7082 = vmatmul.mubr.msk.f32.vlgmr.msra.gmra.mxu0 %vm898_vm2, %v3541_v48 }
 0x6c0   : > { %7095 = vmatprep.mubr.msk.f32.mxu0 %vm7428_vm1, %v8645_v13  ;;  %v3869_v42 = vpop.permute.xlu0 %3868 }
 0x6c4   : > { %v4017_v29 = vpop.permute.xlu0 %4016 }
 0x6d1   : > { %v2887_v0 = vpop.xlane.xlu1 %2886 }
 0x6d2   : > { %v2891_v57 = vadd.f32 %v2887_v0, %v2875_v58 }
 0x6d4   : > { %7369 = vrcp.f32 %v2891_v57 }
 0x6d5   : > { %v3625_v12 = vpop.permute.xlu1 %3624 }
 0x6d9   : > { %v3709_v3 = vpop.permute.xlu1 %3708 }
 0x6da   : > { %7092 = vmatpush3.xpose.msk.msra.mxu0 %vm898_vm2, %v3709_v3 }
 0x6db   : > { %7093 = vmatprep.subr.mxu0 %v8645_v13 }
 0x6de   : > { %7094 = vmatpush3.xpose.msk.msra.mxu0 %vm898_vm2, %v3707_v4 }
 0x6df   : > { %7105 = vmatprep.subr.mxu0 %v8645_v13 }
 0x6e1   : > { %v7370_v61 = vpop.eup %7369  ;;  %7096 = vmatmul.mubr.msk.f32.vlgmr.msra.gmra.mxu0 %vm898_vm2, %v3705_v55 }
 0x6e2   : > { %7106 = vmatpush3.xpose.msk.msra.mxu0 %vm898_vm2, %v3869_v42  ;;  %v2907_v5 = vmul.f32 %v7370_v61, %v8091_v24  ;;  %7107 = vmatprep.mubr.msk.f32.mxu0 %vm7428_vm1, %v8645_v13  ;;  %v3791_v24 = vpop.permute.xlu1 %3790  ;;  %v2903_v54 = vmul.f32 %v7370_v61, %v8072_v7 }
 0x6e3   : > { %7115 = vmatprep.subr.mxu0 %v8645_v13 }
 0x6e4   : > { %7047 = vmatmul.mubr.msk.f32.vlgmr.msra.gmra.mxu1 %vm898_vm2, %v2907_v5 }
 0x6e5   : > { %7057 = vmatpush3.msra.mxu1 %v8058_v62  ;;  %7108 = vmatmul.mubr.msk.f32.vlgmr.msra.gmra.mxu0 %vm898_vm2, %v3541_v48 }
 0x6e6   : > { %7058 = vmatprep.subr.mxu1 %v8645_v13  ;;  %7116 = vmatpush3.xpose.msk.msra.mxu0 %vm898_vm2, %v4017_v29  ;;  %v3789_v62 = vpop.permute.xlu1 %3788 }
 0x6e7   : > { %7059 = vmatpush3.msra.mxu1 %v8060_v46  ;;  %7060 = vmatprep.mubr.msk.f32.mxu1 %vm7428_vm1, %v8645_v13 }
 0x6e8   : > { %7070 = vmatprep.subr.mxu1 %v8645_v13  ;;  %7061 = vmatmul.mubr.msk.f32.vlgmr.msra.gmra.mxu1 %vm1507_vm3, %v2901_v37 }
 0x6e9   : > { %7071 = vmatpush3.msra.mxu1 %v8062_v63  ;;  %7117 = vmatprep.mubr.msk.f32.mxu0 %vm7428_vm1, %v8645_v13 }
 0x6ea   : > { %7072 = vmatprep.subr.mxu1 %v8645_v13  ;;  %7118 = vmatmul.mubr.msk.f32.vlgmr.msra.gmra.mxu0 %vm898_vm2, %v3705_v55  ;;  %v3787_v46 = vpop.permute.xlu1 %3786 }
 0x6eb   : > { %7073 = vmatpush3.msra.mxu1 %v8099_v1  ;;  %7074 = vmatprep.mubr.msk.f32.mxu1 %vm7428_vm1, %v8645_v13 }
 0x6ec   : > { %7084 = vmatprep.subr.mxu1 %v8645_v13  ;;  %7075 = vmatmul.mubr.msk.f32.vlgmr.msra.gmra.mxu1 %vm1507_vm3, %v2903_v54 }
 0x6ed   : > { %7085 = vmatpush3.xpose.msk.msra.mxu1 %vm898_vm2, %v3627_v44  ;;  %7088 = vmatprep.mubr.msk.f32.mxu1 %vm7428_vm1, %v8645_v13 }
 0x6ee   : > { %7086 = vmatprep.subr.mxu1 %v8645_v13  ;;  %7125 = vmatprep.subr.mxu0 %v8645_v13  ;;  %v3943_v63 = vpop.permute.xlu1 %3942 }
 0x6ef   : > { %7127 = vmatprep.mubr.msk.f32.mxu0 %vm7428_vm1, %v8645_v13 }
 0x6f1   : > { %7087 = vmatpush3.xpose.msk.msra.mxu1 %vm898_vm2, %v3625_v12 }
 0x6f2   : > { %7098 = vmatprep.subr.mxu1 %v8645_v13  ;;  %v4091_v7 = vpop.permute.xlu1 %4090 }
 0x6f4   : > { %7089 = vmatmul.mubr.msk.f32.vlgmr.msra.gmra.mxu1 %vm898_vm2, %v3623_v60 }
 0x6f5   : > { %7099 = vmatpush3.xpose.msk.msra.mxu1 %vm898_vm2, %v3791_v24  ;;  %7102 = vmatprep.mubr.msk.f32.mxu1 %vm7428_vm1, %v8645_v13 }
 0x6f6   : > { %7100 = vmatprep.subr.mxu1 %v8645_v13 }
 0x6f9   : > { %7101 = vmatpush3.xpose.msk.msra.mxu1 %vm898_vm2, %v3789_v62 }
 0x6fa   : > { %7110 = vmatprep.subr.mxu1 %v8645_v13 }
 0x6fc   : > { %7103 = vmatmul.mubr.msk.f32.vlgmr.msra.gmra.mxu1 %vm898_vm2, %v3787_v46 }
 0x6fd   : > { %7111 = vmatpush3.xpose.msk.msra.mxu1 %vm898_vm2, %v3943_v63  ;;  %7112 = vmatprep.mubr.msk.f32.mxu1 %vm7428_vm1, %v8645_v13 }
 0x6fe   : > { %7120 = vmatprep.subr.mxu1 %v8645_v13 }
 0x700   : > { %7113 = vmatmul.mubr.msk.f32.vlgmr.msra.gmra.mxu1 %vm898_vm2, %v3623_v60 }
 0x701   : > { %7121 = vmatpush3.xpose.msk.msra.mxu1 %vm898_vm2, %v4091_v7  ;;  %7122 = vmatprep.mubr.msk.f32.mxu1 %vm7428_vm1, %v8645_v13 }
 0x702   : > { %7130 = vmatprep.subr.mxu1 %v8645_v13 }
 0x704   : > { %7123 = vmatmul.mubr.msk.f32.vlgmr.msra.gmra.mxu1 %vm898_vm2, %v3787_v46 }
 0x705   : > { %7132 = vmatprep.mubr.msk.f32.mxu1 %vm7428_vm1, %v8645_v13 }
 0x726   : > { %v8214_v1 = vpop.f32.mrf.mxu0 }
 0x728   : > { %v7033_v51 = vpop.f32.mrf.mxu0 }
 0x741   : > { %v8216_v47 = vpop.f32.mrf.mxu1 }
 0x743   : > { %v7038_v45 = vpop.f32.mrf.mxu1 }
 0x76f   : > { %v3135_v52 = vpop.f32.mrf.mxu0 }
 0x771   : > { %v7043_v58 = vpop.f32.mrf.mxu0 }
 0x773   : > { %v8218_v2 = vpop.f32.mrf.mxu0 }
 0x775   : > { %v7055_v56 = vpop.f32.mrf.mxu0 }
 0x777   : > { %v3455_v49 = vpop.f32.mrf.mxu0 }
 0x778   : > { %v8220_v50 = vadd.f32 %v3455_v49, %v3135_v52 }
 0x779   : > { %v7069_v8 = vpop.f32.mrf.mxu0 }
 0x77f   : > { %v3618_v48 = vpop.f32.mrf.mxu0 }
 0x780   : > { %v4164_v44 = vsel %vm1507_vm3, %v3618_v48, -inf }
 0x781   : > { %4165 = vmax.xlane.f32.xlu0 %v4164_v44  ;;  %v7083_v60 = vpop.f32.mrf.mxu0 }
 0x7a1   : > { %v8223_v0 = vpop.f32.mrf.mxu0 }
 0x7a2   : > { %v4170_v51 = vsel %vm1507_vm3, %v8223_v0, -inf }
 0x7a3   : > { %v7097_v57 = vpop.f32.mrf.mxu0 }
 0x7a4   : > { %v3212_v4 = vpop.f32.mrf.mxu1 }
 0x7a5   : > { %v3938_v12 = vpop.f32.mrf.mxu0 }
 0x7a6   : > { %v7048_v55 = vpop.f32.mrf.mxu1  ;;  %v4176_v3 = vsel %vm898_vm2, %v3938_v12, -inf }
 0x7a7   : > { %4177 = vmax.xlane.f32.xlu1 %v4176_v3  ;;  %v7109_v42 = vpop.f32.mrf.mxu0 }
 0x7a8   : > { %v8226_v61 = vpop.f32.mrf.mxu1 }
 0x7aa   : > { %v8228_v5 = vpop.f32.mrf.mxu0  ;;  %v7062_v29 = vpop.f32.mrf.mxu1 }
 0x7ab   : > { %v4182_v57 = vsel %vm898_vm2, %v8228_v5, -inf }
 0x7ac   : > { %v7119_v37 = vpop.f32.mrf.mxu0  ;;  %v3536_v24 = vpop.f32.mrf.mxu1 }
 0x7ad   : > { %v8230_v54 = vadd.f32 %v3536_v24, %v3212_v4 }
 0x7ae   : > { %v7076_v62 = vpop.f32.mrf.mxu1 }
 0x7b4   : > { %v3700_v46 = vpop.f32.mrf.mxu1 }
 0x7b5   : > { %v4167_v63 = vsel %vm1507_vm3, %v3700_v46, -inf }
 0x7b6   : > { %4168 = vmax.xlane.f32.xlu0 %v4167_v63  ;;  %v7090_v7 = vpop.f32.mrf.mxu1 }
 0x7b8   : > { %4336 = vrot.lane.b32.xlu1 %v7777_v39, %s7430_s20 }
 0x7ba   : > { %4171 = vmax.xlane.f32.xlu0 %v4170_v51 }
 0x7bc   : > { %v8237_v45 = vpop.f32.mrf.mxu1  ;;  %4412 = vrot.lane.b32.xlu1 %v7815_v43, %s7430_s20 }
 0x7bd   : > { %v4173_v44 = vsel %vm1507_vm3, %v8237_v45, -inf }
 0x7be   : > { %v7104_v52 = vpop.f32.mrf.mxu1 }
 0x7c0   : > { %v4012_v58 = vpop.f32.mrf.mxu1  ;;  %4488 = vrot.lane.b32.xlu1 %v7812_v41, %s7430_s20 }
 0x7c1   : > { %v4179_v56 = vsel %vm898_vm2, %v4012_v58, -inf }
 0x7c2   : > { %4180 = vmax.xlane.f32.xlu0 %v4179_v56  ;;  %v7114_v49 = vpop.f32.mrf.mxu1 }
 0x7c4   : > { %v8244_v8 = vpop.f32.mrf.mxu1  ;;  %4645 = vrot.lane.b32.xlu1 %v7709_v21, %s7430_s20 }
 0x7c5   : > { %v4185_v4 = vsel %vm898_vm2, %v8244_v8, -inf }
 0x7c6   : > { %4174 = vmax.xlane.f32.xlu0 %v4173_v44  ;;  %v7124_v60 = vpop.f32.mrf.mxu1 }
 0x7c8   : > { %4643 = vrot.lane.b32.xlu1 %v7717_v23, %s7430_s20 }
 0x7cc   : > { %4803 = vrot.lane.b32.xlu1 %v7747_v31, %s7430_s20 }
 0x7dc   : > { %4260 = vrot.lane.b32.xlu0 %v7791_v40, %s7430_s20 }
 0x7e0   : > { %4566 = vrot.lane.b32.xlu0 %v7698_v17, %s7430_s20 }
 0x7e4   : > { %4564 = vrot.lane.b32.xlu0 %v7704_v19, %s7430_s20 }
 0x7e8   : > { %4724 = vrot.lane.b32.xlu0 %v7723_v26, %s7430_s20 }
 0x7ec   : > { %4722 = vrot.lane.b32.xlu0 %v7733_v28, %s7430_s20 }
 0x7f0   : > { %4183 = vmax.xlane.f32.xlu1 %v4182_v57 }
 0x7f4   : > { %4186 = vmax.xlane.f32.xlu1 %v4185_v4 }
 0x805   : > { %4801 = vrot.lane.b32.xlu1 %v7763_v34, %s7430_s20 }
 0x80a   : > { %v4166_v55 = vpop.xlane.xlu0 %4165 }
 0x830   : > { %v4178_v3 = vpop.xlane.xlu1 %4177 }
 0x831   : > { %v4188_v42 = vmax.f32 %v4166_v55, %v4178_v3 }
 0x833   : > { %v4192_v29 = vsub.f32 %v3618_v48, %v4188_v42  ;;  %v4204_v37 = vsub.f32 %v3938_v12, %v4188_v42 }
 0x834   : > { %v4337_v24 = vpop.permute.xlu1 %4336 }
 0x835   : > { %v4196_v62 = vmul.f32 1.442695, %v4192_v29  ;;  %v4208_v63 = vmul.f32 1.442695, %v4204_v37  ;;  %7131 = vmatpush3.msra.mxu1 %v4337_v24 }
 0x836   : > { %7140 = vmatprep.subr.mxu1 %v8645_v13 }
 0x837   : > { %7371 = vpow2.f32 %v4196_v62 }
 0x838   : > { %7373 = vpow2.f32 %v4208_v63  ;;  %v8280_v29 = vpop.permute.xlu1 %4412 }
 0x83f   : > { %v4169_v7 = vpop.xlane.xlu0 %4168 }
 0x843   : > { %v4172_v12 = vpop.xlane.xlu0 %4171 }
 0x844   : > { %v8271_v51 = vpop.eup %7371 }
 0x845   : > { %v8273_v52 = vpop.eup %7373  ;;  %v4216_v56 = vsel %vm1507_vm3, %v8271_v51, 0.0 }
 0x846   : > { %4217 = vadd.xlane.f32.xlu0 %v4216_v56  ;;  %v4228_v48 = vsel %vm898_vm2, %v8273_v52, 0.0 }
 0x847   : > { %4229 = vadd.xlane.f32.xlu1 %v4228_v48 }
 0x84b   : > { %v4181_v49 = vpop.xlane.xlu0 %4180 }
 0x84c   : > { %v4189_v44 = vmax.f32 %v4169_v7, %v4181_v49 }
 0x84e   : > { %v4193_v60 = vsub.f32 %v3700_v46, %v4189_v44  ;;  %v4205_v57 = vsub.f32 %v4012_v58, %v4189_v44  ;;  %v8290_v58 = vpop.permute.xlu1 %4488 }
 0x84f   : > { %v4175_v4 = vpop.xlane.xlu0 %4174 }
 0x850   : > { %v4198_v55 = vmul.f32 1.442695, %v4193_v60  ;;  %v4210_v3 = vmul.f32 1.442695, %v4205_v57 }
 0x852   : > { %7375 = vpow2.f32 %v4198_v55  ;;  %v8292_v63 = vpop.permute.xlu1 %4645 }
 0x853   : > { %7377 = vpow2.f32 %v4210_v3  ;;  %v4261_v42 = vpop.permute.xlu0 %4260 }
 0x854   : > { %7126 = vmatpush3.msra.mxu0 %v4261_v42 }
 0x855   : > { %7135 = vmatprep.subr.mxu0 %v8645_v13 }
 0x856   : > { %v8294_v7 = vpop.permute.xlu1 %4643 }
 0x85a   : > { %v8296_v56 = vpop.permute.xlu1 %4803 }
 0x85f   : > { %v8282_v37 = vpop.eup %7375 }
 0x860   : > { %v8284_v24 = vpop.eup %7377  ;;  %v4219_v62 = vsel %vm1507_vm3, %v8282_v37, 0.0 }
 0x861   : > { %4220 = vadd.xlane.f32.xlu0 %v4219_v62  ;;  %v4231_v46 = vsel %vm898_vm2, %v8284_v24, 0.0 }
 0x862   : > { %4232 = vadd.xlane.f32.xlu1 %v4231_v46 }
 0x879   : > { %v4184_v48 = vpop.xlane.xlu1 %4183 }
 0x87a   : > { %v4190_v49 = vmax.f32 %v4172_v12, %v4184_v48 }
 0x87c   : > { %v4194_v44 = vsub.f32 %v8223_v0, %v4190_v49  ;;  %v4206_v60 = vsub.f32 %v8228_v5, %v4190_v49  ;;  %v4567_v49 = vpop.permute.xlu0 %4566 }
 0x87d   : > { %v4187_v57 = vpop.xlane.xlu1 %4186 }
 0x87e   : > { %v4200_v55 = vmul.f32 1.442695, %v4194_v44  ;;  %v4212_v3 = vmul.f32 1.442695, %v4206_v60  ;;  %v4191_v42 = vmax.f32 %v4175_v4, %v4187_v57 }
 0x880   : > { %7379 = vpow2.f32 %v4200_v55  ;;  %v4195_v62 = vsub.f32 %v8237_v45, %v4191_v42  ;;  %v4207_v45 = vsub.f32 %v8244_v8, %v4191_v42 }
 0x881   : > { %7381 = vpow2.f32 %v4212_v3  ;;  %v8333_v8 = vpop.permute.xlu1 %4801 }
 0x882   : > { %v4202_v46 = vmul.f32 1.442695, %v4195_v62  ;;  %v4214_v48 = vmul.f32 1.442695, %v4207_v45 }
 0x884   : > { %7383 = vpow2.f32 %v4202_v46 }
 0x885   : > { %7385 = vpow2.f32 %v4214_v48 }
 0x88d   : > { %v8301_v13 = vpop.eup %7379 }
 0x88e   : > { %v7382_v9 = vpop.eup %7381  ;;  %v4222_v12 = vsel %vm1507_vm3, %v8301_v13, 0.0 }
 0x88f   : > { %4223 = vadd.xlane.f32.xlu0 %v4222_v12  ;;  %v4234_v0 = vsel %vm898_vm2, %v7382_v9, 0.0 }
 0x890   : > { %4235 = vadd.xlane.f32.xlu1 %v4234_v0 }
 0x891   : > { %v8306_v5 = vpop.eup %7383 }
 0x892   : > { %v4225_v4 = vsel %vm1507_vm3, %v8306_v5, 0.0 }
 0x893   : > { %4226 = vadd.xlane.f32.xlu0 %v4225_v4 }
 0x8a1   : > { %4966 = vrot.lane.b32.xlu1 %v7707_v20, %s7431_s21  ;;  %v8325_v20 = vpop.eup %7385 }
 0x8a9   : > { %4884 = vrot.lane.b32.xlu0 %v7696_v16, %s7431_s21  ;;  %v4565_v16 = vpop.permute.xlu0 %4564 }
 0x8ad   : > { %4882 = vrot.lane.b32.xlu0 %v7702_v18, %s7431_s21  ;;  %v4725_v18 = vpop.permute.xlu0 %4724 }
 0x8b1   : > { %4880 = vrot.lane.b32.xlu0 %v7690_v11, %s7431_s21  ;;  %v4237_v11 = vsel %vm898_vm2, %v8325_v20, 0.0 }
 0x8b5   : > { %4962 = vrot.lane.b32.xlu0 %v7688_v10, %s7431_s21  ;;  %v4723_v10 = vpop.permute.xlu0 %4722 }
 0x8b9   : > { %5046 = vrot.lane.b32.xlu0 %v7731_v27, %s7431_s21 }
 0x8bd   : > { %5044 = vrot.lane.b32.xlu0 %v7694_v15, %s7431_s21 }
 0x8c1   : > { %5208 = vrot.lane.b32.xlu0 %v7765_v35, %s7431_s21 }
 0x8c5   : > { %4238 = vadd.xlane.f32.xlu1 %v4237_v11  ;;  %5356 = vrot.lane.b32.xlu0 %v7779_v36, %s7431_s21  ;;  %v8648_v36 = vmov 0.0  }
 0x8cf   : > { %v4218_v27 = vpop.xlane.xlu0 %4217 }
 0x8d0   : > { %v4230_v44 = vpop.xlane.xlu1 %4229 }
 0x8d1   : > { %v4240_v15 = vadd.f32 %v4230_v44, %v4218_v27 }
 0x8d3   : > { %7387 = vrcp.f32 %v4240_v15 }
 0x8d6   : > { %4964 = vrot.lane.b32.xlu1 %v7715_v22, %s7431_s21 }
 0x8da   : > { %5048 = vrot.lane.b32.xlu1 %v7721_v25, %s7431_s21 }
 0x8de   : > { %5130 = vrot.lane.b32.xlu1 %v7739_v30, %s7431_s21 }
 0x8e0   : > { %v7388_v35 = vpop.eup %7387 }
 0x8e1   : > { %v4256_v60 = vmul.f32 %v7388_v35, %v8273_v52 }
 0x8e2   : > { %5128 = vrot.lane.b32.xlu1 %v7749_v32, %s7431_s21 }
 0x8e3   : > { %7128 = vmatmul.mubr.msk.f32.vlgmr.msra.gmra.mxu0 %vm898_vm2, %v4256_v60 }
 0x8e4   : > { %7136 = vmatpush3.msra.mxu0 %v8280_v29  ;;  %7137 = vmatprep.mubr.msk.f32.mxu0 %vm7428_vm1, %v8648_v36 }
 0x8e5   : > { %7145 = vmatprep.subr.mxu0 %v8648_v36 }
 0x8e6   : > { %5126 = vrot.lane.b32.xlu1 %v7692_v14, %s7431_s21 }
 0x8ea   : > { %v4221_v22 = vpop.xlane.xlu0 %4220  ;;  %5282 = vrot.lane.b32.xlu1 %v7755_v33, %s7431_s21 }
 0x8eb   : > { %v4233_v25 = vpop.xlane.xlu1 %4232 }
 0x8ec   : > { %v4241_v30 = vadd.f32 %v4233_v25, %v4221_v22 }
 0x8ee   : > { %7389 = vrcp.f32 %v4241_v30  ;;  %5430 = vrot.lane.b32.xlu1 %v7770_v38, %s7431_s21 }
 0x8fb   : > { %v8355_v32 = vpop.eup %7389 }
 0x8fc   : > { %v4257_v52 = vmul.f32 %v8355_v32, %v8284_v24  ;;  %v4252_v24 = vmul.f32 %v7388_v35, %v8271_v51 }
 0x8fe   : > { %7133 = vmatmul.mubr.msk.f32.vlgmr.msra.gmra.mxu1 %vm898_vm2, %v4257_v52 }
 0x8ff   : > { %7141 = vmatpush3.msra.mxu1 %v8290_v58  ;;  %7142 = vmatprep.mubr.msk.f32.mxu1 %vm7428_vm1, %v8648_v36 }
 0x900   : > { %7152 = vmatprep.subr.mxu1 %v8648_v36 }
 0x918   : > { %v4224_v14 = vpop.xlane.xlu0 %4223 }
 0x919   : > { %v4236_v33 = vpop.xlane.xlu1 %4235 }
 0x91a   : > { %v4242_v29 = vadd.f32 %v4236_v33, %v4224_v14 }
 0x91c   : > { %7391 = vrcp.f32 %v4242_v29  ;;  %v4227_v38 = vpop.xlane.xlu0 %4226 }
 0x920   : > { %v4885_v58 = vpop.permute.xlu0 %4884 }
 0x924   : > { %v4883_v51 = vpop.permute.xlu0 %4882 }
 0x928   : > { %v4881_v3 = vpop.permute.xlu0 %4880 }
 0x929   : > { %v7392_v57 = vpop.eup %7391 }
 0x92a   : > { %v4258_v55 = vmul.f32 %v7392_v57, %v7382_v9  ;;  %v4254_v9 = vmul.f32 %v7392_v57, %v8301_v13  ;;  %v4967_v13 = vpop.permute.xlu1 %4966 }
 0x92c   : > { %7138 = vmatmul.mubr.msk.f32.vlgmr.msra.gmra.mxu0 %vm898_vm2, %v4258_v55  ;;  %v4963_v42 = vpop.permute.xlu0 %4962 }
 0x92d   : > { %7146 = vmatpush3.msra.mxu0 %v4567_v49  ;;  %7149 = vmatprep.mubr.msk.f32.mxu0 %vm7428_vm1, %v8648_v36 }
 0x92e   : > { %7147 = vmatprep.subr.mxu0 %v8648_v36 }
 0x92f   : > { %7148 = vmatpush3.msra.mxu0 %v4565_v16 }
 0x930   : > { %7159 = vmatprep.subr.mxu0 %v8648_v36  ;;  %7150 = vmatmul.mubr.msk.f32.vlgmr.msra.gmra.mxu0 %vm1507_vm3, %v4252_v24  ;;  %v5047_v12 = vpop.permute.xlu0 %5046 }
 0x931   : > { %7160 = vmatpush3.msra.mxu0 %v4725_v18  ;;  %7163 = vmatprep.mubr.msk.f32.mxu0 %vm7428_vm1, %v8648_v36  ;;  %v4253_v18 = vmul.f32 %v8355_v32, %v8282_v37 }
 0x932   : > { %7161 = vmatprep.subr.mxu0 %v8648_v36 }
 0x933   : > { %7162 = vmatpush3.msra.mxu0 %v4723_v10 }
 0x934   : > { %7173 = vmatprep.subr.mxu0 %v8648_v36  ;;  %7164 = vmatmul.mubr.msk.f32.vlgmr.msra.gmra.mxu0 %vm1507_vm3, %v4254_v9  ;;  %v5045_v4 = vpop.permute.xlu0 %5044 }
 0x935   : > { %7174 = vmatpush3.xpose.msk.msra.mxu0 %vm898_vm2, %v4885_v58  ;;  %7177 = vmatprep.mubr.msk.f32.mxu0 %vm7428_vm1, %v8648_v36 }
 0x936   : > { %7175 = vmatprep.subr.mxu0 %v8648_v36 }
 0x938   : > { %v5209_v48 = vpop.permute.xlu0 %5208 }
 0x939   : > { %7176 = vmatpush3.xpose.msk.msra.mxu0 %vm898_vm2, %v4883_v51 }
 0x93a   : > { %7187 = vmatprep.subr.mxu0 %v8648_v36 }
 0x93c   : > { %7178 = vmatmul.mubr.msk.f32.vlgmr.msra.gmra.mxu0 %vm898_vm2, %v4881_v3  ;;  %v5357_v11 = vpop.permute.xlu0 %5356 }
 0x93d   : > { %7191 = vmatprep.mubr.msk.f32.mxu0 %vm7428_vm1, %v8648_v36 }
 0x94e   : > { %v4239_v62 = vpop.xlane.xlu1 %4238 }
 0x94f   : > { %v4243_v46 = vadd.f32 %v4239_v62, %v4227_v38 }
 0x951   : > { %7393 = vrcp.f32 %v4243_v46 }
 0x952   : > { %v4965_v0 = vpop.permute.xlu1 %4964 }
 0x956   : > { %v5049_v45 = vpop.permute.xlu1 %5048 }
 0x957   : > { %7188 = vmatpush3.xpose.msk.msra.mxu0 %vm898_vm2, %v5049_v45 }
 0x958   : > { %7189 = vmatprep.subr.mxu0 %v8648_v36 }
 0x95b   : > { %7190 = vmatpush3.xpose.msk.msra.mxu0 %vm898_vm2, %v5047_v12 }
 0x95c   : > { %7201 = vmatprep.subr.mxu0 %v8648_v36 }
 0x95e   : > { %v7394_v49 = vpop.eup %7393  ;;  %7192 = vmatmul.mubr.msk.f32.vlgmr.msra.gmra.mxu0 %vm898_vm2, %v5045_v4 }
 0x95f   : > { %7202 = vmatpush3.xpose.msk.msra.mxu0 %vm898_vm2, %v5209_v48  ;;  %v4259_v16 = vmul.f32 %v7394_v49, %v8325_v20  ;;  %7203 = vmatprep.mubr.msk.f32.mxu0 %vm7428_vm1, %v8648_v36  ;;  %v5131_v20 = vpop.permute.xlu1 %5130  ;;  %v4255_v37 = vmul.f32 %v7394_v49, %v8306_v5 }
 0x960   : > { %7211 = vmatprep.subr.mxu0 %v8648_v36 }
 0x961   : > { %7143 = vmatmul.mubr.msk.f32.vlgmr.msra.gmra.mxu1 %vm898_vm2, %v4259_v16 }
 0x962   : > { %7153 = vmatpush3.msra.mxu1 %v8292_v63  ;;  %7204 = vmatmul.mubr.msk.f32.vlgmr.msra.gmra.mxu0 %vm898_vm2, %v4881_v3 }
 0x963   : > { %7154 = vmatprep.subr.mxu1 %v8648_v36  ;;  %7212 = vmatpush3.xpose.msk.msra.mxu0 %vm898_vm2, %v5357_v11  ;;  %v5129_v63 = vpop.permute.xlu1 %5128 }
 0x964   : > { %7155 = vmatpush3.msra.mxu1 %v8294_v7  ;;  %7156 = vmatprep.mubr.msk.f32.mxu1 %vm7428_vm1, %v8648_v36 }
 0x965   : > { %7166 = vmatprep.subr.mxu1 %v8648_v36  ;;  %7157 = vmatmul.mubr.msk.f32.vlgmr.msra.gmra.mxu1 %vm1507_vm3, %v4253_v18 }
 0x966   : > { %7167 = vmatpush3.msra.mxu1 %v8296_v56  ;;  %7213 = vmatprep.mubr.msk.f32.mxu0 %vm7428_vm1, %v8648_v36 }
 0x967   : > { %7168 = vmatprep.subr.mxu1 %v8648_v36  ;;  %7214 = vmatmul.mubr.msk.f32.vlgmr.msra.gmra.mxu0 %vm898_vm2, %v5045_v4  ;;  %v5127_v7 = vpop.permute.xlu1 %5126 }
 0x968   : > { %7169 = vmatpush3.msra.mxu1 %v8333_v8  ;;  %7170 = vmatprep.mubr.msk.f32.mxu1 %vm7428_vm1, %v8648_v36 }
 0x969   : > { %7180 = vmatprep.subr.mxu1 %v8648_v36  ;;  %7171 = vmatmul.mubr.msk.f32.vlgmr.msra.gmra.mxu1 %vm1507_vm3, %v4255_v37 }
 0x96a   : > { %7181 = vmatpush3.xpose.msk.msra.mxu1 %vm898_vm2, %v4967_v13  ;;  %7184 = vmatprep.mubr.msk.f32.mxu1 %vm7428_vm1, %v8648_v36 }
 0x96b   : > { %7182 = vmatprep.subr.mxu1 %v8648_v36  ;;  %7221 = vmatprep.subr.mxu0 %v8648_v36  ;;  %v5283_v56 = vpop.permute.xlu1 %5282 }
 0x96c   : > { %7223 = vmatprep.mubr.msk.f32.mxu0 %vm7428_vm1, %v8648_v36 }
 0x96e   : > { %7183 = vmatpush3.xpose.msk.msra.mxu1 %vm898_vm2, %v4965_v0 }
 0x96f   : > { %7194 = vmatprep.subr.mxu1 %v8648_v36  ;;  %v5431_v5 = vpop.permute.xlu1 %5430 }
 0x971   : > { %7185 = vmatmul.mubr.msk.f32.vlgmr.msra.gmra.mxu1 %vm898_vm2, %v4963_v42 }
 0x972   : > { %7195 = vmatpush3.xpose.msk.msra.mxu1 %vm898_vm2, %v5131_v20  ;;  %7198 = vmatprep.mubr.msk.f32.mxu1 %vm7428_vm1, %v8648_v36 }
 0x973   : > { %7196 = vmatprep.subr.mxu1 %v8648_v36 }
 0x976   : > { %7197 = vmatpush3.xpose.msk.msra.mxu1 %vm898_vm2, %v5129_v63 }
 0x977   : > { %7206 = vmatprep.subr.mxu1 %v8648_v36 }
 0x979   : > { %7199 = vmatmul.mubr.msk.f32.vlgmr.msra.gmra.mxu1 %vm898_vm2, %v5127_v7 }
 0x97a   : > { %7207 = vmatpush3.xpose.msk.msra.mxu1 %vm898_vm2, %v5283_v56  ;;  %7208 = vmatprep.mubr.msk.f32.mxu1 %vm7428_vm1, %v8648_v36 }
 0x97b   : > { %7216 = vmatprep.subr.mxu1 %v8648_v36 }
 0x97d   : > { %7209 = vmatmul.mubr.msk.f32.vlgmr.msra.gmra.mxu1 %vm898_vm2, %v4963_v42 }
 0x97e   : > { %7217 = vmatpush3.xpose.msk.msra.mxu1 %vm898_vm2, %v5431_v5  ;;  %7218 = vmatprep.mubr.msk.f32.mxu1 %vm7428_vm1, %v8648_v36 }
 0x97f   : > { %7226 = vmatprep.subr.mxu1 %v8648_v36 }
 0x981   : > { %7219 = vmatmul.mubr.msk.f32.vlgmr.msra.gmra.mxu1 %vm898_vm2, %v5127_v7 }
 0x982   : > { %7228 = vmatprep.mubr.msk.f32.mxu1 %vm7428_vm1, %v8648_v36 }
 0x9a3   : > { %v8448_v10 = vpop.f32.mrf.mxu0 }
 0x9a5   : > { %v7129_v8 = vpop.f32.mrf.mxu0 }
 0x9be   : > { %v8450_v27 = vpop.f32.mrf.mxu1 }
 0x9c0   : > { %v7134_v44 = vpop.f32.mrf.mxu1 }
 0x9ec   : > { %v4484_v15 = vpop.f32.mrf.mxu0 }
 0x9ee   : > { %v7139_v35 = vpop.f32.mrf.mxu0 }
 0x9f0   : > { %v8452_v60 = vpop.f32.mrf.mxu0 }
 0x9f2   : > { %v7151_v22 = vpop.f32.mrf.mxu0 }
 0x9f4   : > { %v4797_v25 = vpop.f32.mrf.mxu0 }
 0x9f5   : > { %v8454_v30 = vadd.f32 %v4797_v25, %v4484_v15 }
 0x9f6   : > { %v7165_v32 = vpop.f32.mrf.mxu0 }
 0x9fc   : > { %v4958_v52 = vpop.f32.mrf.mxu0 }
 0x9fd   : > { %v5504_v14 = vsel %vm1507_vm3, %v4958_v52, -inf }
 0x9fe   : > { %5505 = vmax.xlane.f32.xlu0 %v5504_v14  ;;  %v7179_v33 = vpop.f32.mrf.mxu0 }
 0xa1e   : > { %v8457_v29 = vpop.f32.mrf.mxu0 }
 0xa1f   : > { %v5510_v48 = vsel %vm1507_vm3, %v8457_v29, -inf }
 0xa20   : > { %v7193_v57 = vpop.f32.mrf.mxu0 }
 0xa21   : > { %v4560_v38 = vpop.f32.mrf.mxu1 }
 0xa22   : > { %v5278_v55 = vpop.f32.mrf.mxu0 }
 0xa23   : > { %v7144_v24 = vpop.f32.mrf.mxu1  ;;  %v5516_v58 = vsel %vm898_vm2, %v5278_v55, -inf }
 0xa24   : > { %5517 = vmax.xlane.f32.xlu1 %v5516_v58  ;;  %v7205_v9 = vpop.f32.mrf.mxu0 }
 0xa25   : > { %v8460_v51 = vpop.f32.mrf.mxu1 }
 0xa27   : > { %v8462_v3 = vpop.f32.mrf.mxu0  ;;  %v7158_v13 = vpop.f32.mrf.mxu1 }
 0xa29   : > { %v7215_v42 = vpop.f32.mrf.mxu0  ;;  %v4876_v62 = vpop.f32.mrf.mxu1 }
 0xa2a   : > { %v8464_v46 = vadd.f32 %v4876_v62, %v4560_v38 }
 0xa2b   : > { %v7172_v12 = vpop.f32.mrf.mxu1 }
 0xa31   : > { %v5040_v0 = vpop.f32.mrf.mxu1 }
 0xa32   : > { %v5507_v4 = vsel %vm1507_vm3, %v5040_v0, -inf }
 0xa33   : > { %5508 = vmax.xlane.f32.xlu0 %v5507_v4  ;;  %v7186_v45 = vpop.f32.mrf.mxu1 }
 0xa35   : > { %5676 = vrot.lane.b32.xlu1 %v7777_v39, %s7431_s21 }
 0xa37   : > { %5511 = vmax.xlane.f32.xlu0 %v5510_v48 }
 0xa39   : > { %v8471_v49 = vpop.f32.mrf.mxu1  ;;  %5752 = vrot.lane.b32.xlu1 %v7815_v43, %s7431_s21 }
 0xa3a   : > { %v5513_v39 = vsel %vm1507_vm3, %v8471_v49, -inf }
 0xa3b   : > { %v7200_v16 = vpop.f32.mrf.mxu1 }
 0xa3d   : > { %v5352_v11 = vpop.f32.mrf.mxu1  ;;  %5828 = vrot.lane.b32.xlu1 %v7812_v41, %s7431_s21  ;;  %v5522_v41 = vsel %vm898_vm2, %v8462_v3, -inf }
 0xa3e   : > { %v5519_v18 = vsel %vm898_vm2, %v5352_v11, -inf }
 0xa3f   : > { %5520 = vmax.xlane.f32.xlu0 %v5519_v18  ;;  %v7210_v20 = vpop.f32.mrf.mxu1 }
 0xa41   : > { %v8478_v37 = vpop.f32.mrf.mxu1 }
 0xa42   : > { %v5525_v43 = vsel %vm898_vm2, %v8478_v37, -inf }
 0xa43   : > { %5514 = vmax.xlane.f32.xlu0 %v5513_v39  ;;  %v7220_v63 = vpop.f32.mrf.mxu1 }
 0xa59   : > { %5600 = vrot.lane.b32.xlu0 %v7791_v40, %s7431_s21 }
 0xa5d   : > { %5906 = vrot.lane.b32.xlu0 %v7698_v17, %s7431_s21 }
 0xa61   : > { %5523 = vmax.xlane.f32.xlu1 %v5522_v41 }
 0xa65   : > { %5526 = vmax.xlane.f32.xlu1 %v5525_v43 }
 0xa76   : > { %5985 = vrot.lane.b32.xlu1 %v7709_v21, %s7431_s21 }
 0xa87   : > { %v5506_v7 = vpop.xlane.xlu0 %5505 }
 0xaad   : > { %v5518_v56 = vpop.xlane.xlu1 %5517 }
 0xaae   : > { %v5528_v5 = vmax.f32 %v5506_v7, %v5518_v56 }
 0xab0   : > { %v5532_v8 = vsub.f32 %v4958_v52, %v5528_v5  ;;  %v5544_v44 = vsub.f32 %v5278_v55, %v5528_v5 }
 0xab1   : > { %v5677_v40 = vpop.permute.xlu1 %5676 }
 0xab2   : > { %v5536_v15 = vmul.f32 1.442695, %v5532_v8  ;;  %v5548_v35 = vmul.f32 1.442695, %v5544_v44  ;;  %7227 = vmatpush3.msra.mxu1 %v5677_v40  ;;  %v3294_v40 = vadd.f32 %v8218_v2, %v8214_v1 }
 0xab3   : > { %7236 = vmatprep.subr.mxu1 %v8648_v36 }
 0xab4   : > { %7395 = vpow2.f32 %v5536_v15 }
 0xab5   : > { %7397 = vpow2.f32 %v5548_v35 }
 0xabc   : > { %v5509_v17 = vpop.xlane.xlu0 %5508 }
 0xac0   : > { %v5512_v52 = vpop.xlane.xlu0 %5511 }
 0xac1   : > { %v8493_v22 = vpop.eup %7395 }
 0xac2   : > { %v8495_v25 = vpop.eup %7397  ;;  %v5556_v21 = vsel %vm1507_vm3, %v8493_v22, 0.0 }
 0xac3   : > { %5557 = vadd.xlane.f32.xlu0 %v5556_v21  ;;  %v5568_v32 = vsel %vm898_vm2, %v8495_v25, 0.0 }
 0xac4   : > { %5569 = vadd.xlane.f32.xlu1 %v5568_v32 }
 0xac8   : > { %v5521_v14 = vpop.xlane.xlu0 %5520 }
 0xac9   : > { %v5529_v33 = vmax.f32 %v5509_v17, %v5521_v14 }
 0xacb   : > { %v5533_v57 = vsub.f32 %v5040_v0, %v5529_v33  ;;  %v5545_v38 = vsub.f32 %v5352_v11, %v5529_v33  ;;  %v5753_v0 = vpop.permute.xlu1 %5752 }
 0xacc   : > { %v5515_v55 = vpop.xlane.xlu0 %5514 }
 0xacd   : > { %v5538_v24 = vmul.f32 1.442695, %v5533_v57  ;;  %v5550_v58 = vmul.f32 1.442695, %v5545_v38 }
 0xacf   : > { %7399 = vpow2.f32 %v5538_v24  ;;  %v8510_v4 = vpop.permute.xlu1 %5828 }
 0xad0   : > { %7401 = vpow2.f32 %v5550_v58  ;;  %v5601_v9 = vpop.permute.xlu0 %5600 }
 0xad1   : > { %7222 = vmatpush3.msra.mxu0 %v5601_v9 }
 0xad2   : > { %7231 = vmatprep.subr.mxu0 %v8648_v36 }
 0xadc   : > { %v8502_v13 = vpop.eup %7399 }
 0xadd   : > { %v8504_v42 = vpop.eup %7401  ;;  %v5559_v62 = vsel %vm1507_vm3, %v8502_v13, 0.0 }
 0xade   : > { %5560 = vadd.xlane.f32.xlu0 %v5559_v62  ;;  %v5571_v12 = vsel %vm898_vm2, %v8504_v42, 0.0 }
 0xadf   : > { %5572 = vadd.xlane.f32.xlu1 %v5571_v12 }
 0xaea   : > { %v5524_v45 = vpop.xlane.xlu1 %5523 }
 0xaeb   : > { %v5530_v48 = vmax.f32 %v5512_v52, %v5524_v45  ;;  %v6284_v45 = vld [vmem:[%s8643_s6 + $0x18] sm:$0xff] }
 0xaed   : > { %v5534_v16 = vsub.f32 %v8457_v29, %v5530_v48  ;;  %v5546_v11 = vsub.f32 %v8462_v3, %v5530_v48  ;;  %v6283_v48 = vld [vmem:[%s8643_s6 + $0x10] sm:$0xff] }
 0xaee   : > { %v5527_v18 = vpop.xlane.xlu1 %5526 }
 0xaef   : > { %v5540_v20 = vmul.f32 1.442695, %v5534_v16  ;;  %v5552_v39 = vmul.f32 1.442695, %v5546_v11  ;;  %v5531_v63 = vmax.f32 %v5515_v55, %v5527_v18  ;;  %v6281_v18 = vld [vmem:[%s8643_s6] sm:$0xff] }
 0xaf1   : > { %7403 = vpow2.f32 %v5540_v20  ;;  %v5535_v41 = vsub.f32 %v8471_v49, %v5531_v63  ;;  %v5547_v8 = vsub.f32 %v8478_v37, %v5531_v63 }
 0xaf2   : > { %7405 = vpow2.f32 %v5552_v39  ;;  %v5986_v1 = vpop.permute.xlu1 %5985 }
 0xaf3   : > { %v5542_v43 = vmul.f32 1.442695, %v5535_v41  ;;  %v5554_v44 = vmul.f32 1.442695, %v5547_v8 }
 0xaf5   : > { %7407 = vpow2.f32 %v5542_v43 }
 0xaf6   : > { %7409 = vpow2.f32 %v5554_v44 }
 0xafe   : > { %v8515_v7 = vpop.eup %7403 }
 0xaff   : > { %v8517_v56 = vpop.eup %7405  ;;  %v5562_v5 = vsel %vm1507_vm3, %v8515_v7, 0.0 }
 0xb00   : > { %5563 = vadd.xlane.f32.xlu0 %v5562_v5  ;;  %v5574_v29 = vsel %vm898_vm2, %v8517_v56, 0.0 }
 0xb01   : > { %5575 = vadd.xlane.f32.xlu1 %v5574_v29 }
 0xb02   : > { %v8523_v3 = vpop.eup %7407 }
 0xb03   : > { %v5565_v49 = vsel %vm1507_vm3, %v8523_v3, 0.0 }
 0xb04   : > { %5566 = vadd.xlane.f32.xlu0 %v5565_v49 }
 0xb12   : > { %5983 = vrot.lane.b32.xlu1 %v7717_v23, %s7431_s21  ;;  %v4640_v23 = vadd.f32 %v8452_v60, %v8448_v10 }
 0xb1a   : > { %5904 = vrot.lane.b32.xlu0 %v7704_v19, %s7431_s21  ;;  %v8541_v19 = vpop.eup %7409 }
 0xb1e   : > { %6064 = vrot.lane.b32.xlu0 %v7723_v26, %s7431_s21  ;;  %v5577_v26 = vsel %vm898_vm2, %v8541_v19, 0.0 }
 0xb22   : > { %6062 = vrot.lane.b32.xlu0 %v7733_v28, %s7431_s21  ;;  %v5907_v28 = vpop.permute.xlu0 %5906 }
 0xb26   : > { %6224 = vrot.lane.b32.xlu0 %v3294_v40, %s7432_s22 }
 0xb2a   : > { %6240 = vrot.lane.b32.xlu0 %v4640_v23, %s7433_s23 }
 0xb2e   : > { %6228 = vrot.lane.b32.xlu0 %v8220_v50, %s7432_s22  ;;  %v3375_v50 = vadd.f32 %v8226_v61, %v8216_v47 }
 0xb32   : > { %6244 = vrot.lane.b32.xlu0 %v8454_v30, %s7433_s23  ;;  %v4719_v30 = vadd.f32 %v8460_v51, %v8450_v27 }
 0xb36   : > { %5578 = vadd.xlane.f32.xlu1 %v5577_v26 }
 0xb47   : > { %6143 = vrot.lane.b32.xlu1 %v7747_v31, %s7431_s21 }
 0xb4b   : > { %6141 = vrot.lane.b32.xlu1 %v7763_v34, %s7431_s21 }
 0xb4c   : > { %v5558_v2 = vpop.xlane.xlu0 %5557 }
 0xb4d   : > { %v5570_v10 = vpop.xlane.xlu1 %5569 }
 0xb4e   : > { %v5580_v60 = vadd.f32 %v5570_v10, %v5558_v2 }
 0xb4f   : > { %6226 = vrot.lane.b32.xlu1 %v3375_v50, %s7432_s22 }
 0xb50   : > { %7411 = vrcp.f32 %v5580_v60 }
 0xb53   : > { %6242 = vrot.lane.b32.xlu1 %v4719_v30, %s7433_s23 }
 0xb57   : > { %6230 = vrot.lane.b32.xlu1 %v8230_v54, %s7432_s22 }
 0xb5b   : > { %6246 = vrot.lane.b32.xlu1 %v8464_v46, %s7433_s23 }
 0xb5d   : > { %v7412_v31 = vpop.eup %7411 }
 0xb5e   : > { %v5596_v37 = vmul.f32 %v7412_v31, %v8495_v25  ;;  %v5592_v52 = vmul.f32 %v7412_v31, %v8493_v22 }
 0xb60   : > { %7224 = vmatmul.mubr.msk.f32.vlgmr.msra.gmra.mxu0 %vm898_vm2, %v5596_v37 }
 0xb61   : > { %7232 = vmatpush3.msra.mxu0 %v5753_v0  ;;  %7233 = vmatprep.mubr.msk.f32.mxu0 %vm7428_vm1, %v8648_v36 }
 0xb62   : > { %7241 = vmatprep.subr.mxu0 %v8648_v36 }
 0xb67   : > { %v5561_v34 = vpop.xlane.xlu0 %5560 }
 0xb68   : > { %v5573_v47 = vpop.xlane.xlu1 %5572 }
 0xb69   : > { %v5581_v61 = vadd.f32 %v5573_v47, %v5561_v34 }
 0xb6b   : > { %7413 = vrcp.f32 %v5581_v61 }
 0xb78   : > { %v7414_v27 = vpop.eup %7413 }
 0xb79   : > { %v5597_v54 = vmul.f32 %v7414_v27, %v8504_v42  ;;  %v5593_v9 = vmul.f32 %v7414_v27, %v8502_v13 }
 0xb7b   : > { %7229 = vmatmul.mubr.msk.f32.vlgmr.msra.gmra.mxu1 %vm898_vm2, %v5597_v54 }
 0xb7c   : > { %7237 = vmatpush3.msra.mxu1 %v8510_v4  ;;  %7238 = vmatprep.mubr.msk.f32.mxu1 %vm7428_vm1, %v8648_v36 }
 0xb7d   : > { %7248 = vmatprep.subr.mxu1 %v8648_v36 }
 0xb89   : > { %v5564_v51 = vpop.xlane.xlu0 %5563 }
 0xb8a   : > { %v5576_v46 = vpop.xlane.xlu1 %5575 }
 0xb8b   : > { %v5582_v15 = vadd.f32 %v5576_v46, %v5564_v51 }
 0xb8d   : > { %7415 = vrcp.f32 %v5582_v15  ;;  %v5567_v35 = vpop.xlane.xlu0 %5566  ;;  %v8649_v15 = vld [vmem:[#allocation2_spill] sm:$0xff] }
 0xb8e   : > { %v5984_v57 = vpop.permute.xlu1 %5983 }
 0xb91   : > { %v5905_v17 = vpop.permute.xlu0 %5904 }
 0xb95   : > { %v6065_v32 = vpop.permute.xlu0 %6064 }
 0xb99   : > { %v6063_v14 = vpop.permute.xlu0 %6062 }
 0xb9a   : > { %v7416_v25 = vpop.eup %7415 }
 0xb9b   : > { %v5598_v21 = vmul.f32 %v7416_v25, %v8517_v56  ;;  %v5594_v33 = vmul.f32 %v7416_v25, %v8515_v7 }
 0xb9d   : > { %7234 = vmatmul.mubr.msk.f32.vlgmr.msra.gmra.mxu0 %vm898_vm2, %v5598_v21  ;;  %v6225_v23 = vpop.permute.xlu0 %6224 }
 0xb9e   : > { %7242 = vmatpush3.msra.mxu0 %v5907_v28  ;;  %7245 = vmatprep.mubr.msk.f32.mxu0 %vm7428_vm1, %v8648_v36 }
 0xb9f   : > { %7243 = vmatprep.subr.mxu0 %v8648_v36 }
 0xba0   : > { %7244 = vmatpush3.msra.mxu0 %v5905_v17 }
 0xba1   : > { %7255 = vmatprep.subr.mxu0 %v8648_v36  ;;  %7246 = vmatmul.mubr.msk.f32.vlgmr.msra.gmra.mxu0 %vm1507_vm3, %v5592_v52 }
 0xba2   : > { %7256 = vmatpush3.msra.mxu0 %v6065_v32  ;;  %7259 = vmatprep.mubr.msk.f32.mxu0 %vm7428_vm1, %v8648_v36 }
 0xba3   : > { %7257 = vmatprep.subr.mxu0 %v8648_v36 }
 0xba4   : > { %7258 = vmatpush3.msra.mxu0 %v6063_v14 }
 0xba5   : > { %7260 = vmatmul.mubr.msk.f32.vlgmr.msra.gmra.mxu0 %vm1507_vm3, %v5594_v33  ;;  %7269 = vmatprep.subr.mxu0 %v6284_v45 }
 0xba6   : > { %7270 = vmatpush3.msra.mxu0 %v6284_v45 }
 0xba7   : > { %7271 = vmatprep.subr.mxu0 %v6283_v48 }
 0xba8   : > { %7272 = vmatpush3.msra.mxu0 %v6283_v48 }
 0xbbf   : > { %v5579_v38 = vpop.xlane.xlu1 %5578 }
 0xbc0   : > { %v5583_v22 = vadd.f32 %v5579_v38, %v5567_v35 }
 0xbc2   : > { %7417 = vrcp.f32 %v5583_v22 }
 0xbc3   : > { %v6144_v58 = vpop.permute.xlu1 %6143 }
 0xbc7   : > { %v6142_v42 = vpop.permute.xlu1 %6141 }
 0xbcb   : > { %v6227_v60 = vpop.permute.xlu1 %6226 }
 0xbcc   : > { %v6269_v34 = vsel %vm898_vm2, %v7992_v6, %v6227_v60 }
 0xbcf   : > { %v7418_v55 = vpop.eup %7417  ;;  %v6243_v30 = vpop.permute.xlu1 %6242 }
 0xbd0   : > { %v5599_v24 = vmul.f32 %v7418_v55, %v8541_v19  ;;  %v5595_v62 = vmul.f32 %v7418_v55, %v8523_v3  ;;  %v6241_v19 = vpop.permute.xlu0 %6240 }
 0xbd2   : > { %7239 = vmatmul.mubr.msk.f32.vlgmr.msra.gmra.mxu1 %vm898_vm2, %v5599_v24 }
 0xbd3   : > { %7249 = vmatpush3.msra.mxu1 %v5986_v1  ;;  %7252 = vmatprep.mubr.msk.f32.mxu1 %vm7428_vm1, %v8648_v36  ;;  %v6268_v1 = vsel %vm898_vm2, %v7984_v53, %v6225_v23  ;;  %v6231_v31 = vpop.permute.xlu1 %6230  ;;  %v6273_v53 = vsel %vm1507_vm3, %v6269_v34, %v6243_v30 }
 0xbd4   : > { %7250 = vmatprep.subr.mxu1 %v8648_v36  ;;  %v6229_v26 = vpop.permute.xlu0 %6228  ;;  %v6272_v2 = vsel %vm1507_vm3, %v6268_v1, %v6241_v19  ;;  %v6271_v35 = vsel %vm898_vm2, %v8649_v15, %v6231_v31 }
 0xbd5   : > { %7251 = vmatpush3.msra.mxu1 %v5984_v57  ;;  %v6270_v61 = vsel %vm898_vm2, %v7986_v59, %v6229_v26 }
 0xbd6   : > { %7262 = vmatprep.subr.mxu1 %v8648_v36  ;;  %7253 = vmatmul.mubr.msk.f32.vlgmr.msra.gmra.mxu1 %vm1507_vm3, %v5593_v9 }
 0xbd7   : > { %7263 = vmatpush3.msra.mxu1 %v6144_v58  ;;  %7266 = vmatprep.mubr.msk.f32.mxu1 %vm7428_vm1, %v8648_v36  ;;  %v6247_v37 = vpop.permute.xlu1 %6246 }
 0xbd8   : > { %7264 = vmatprep.subr.mxu1 %v8648_v36  ;;  %v6282_v36 = vld [vmem:[%s8643_s6 + $0x8] sm:$0xff]  ;;  %v6245_v28 = vpop.permute.xlu0 %6244  ;;  %v6275_v6 = vsel %vm1507_vm3, %v6271_v35, %v6247_v37 }
 0xbd9   : > { %7265 = vmatpush3.msra.mxu1 %v6142_v42  ;;  %7273 = vmatprep.subr.mxu0 %v6282_v36  ;;  %v6274_v54 = vsel %vm1507_vm3, %v6270_v61, %v6245_v28 }
 0xbda   : > { %7267 = vmatmul.mubr.msk.f32.vlgmr.msra.gmra.mxu1 %vm1507_vm3, %v5595_v62  ;;  %7274 = vmatpush3.msra.mxu0 %v6282_v36 }
 0xbdb   : > { %7275 = vmatprep.subr.mxu0 %v6281_v18 }
 0xbdc   : > { %7276 = vmatpush3.msra.mxu0 %v6281_v18 }
 0xc20   : > { %v5672_v12 = vpop.f32.mrf.mxu0 }
 0xc22   : > { %v7225_v0 = vpop.f32.mrf.mxu0 }
 0xc3b   : > { %v5748_v13 = vpop.f32.mrf.mxu1 }
 0xc3d   : > { %v7230_v4 = vpop.f32.mrf.mxu1 }
 0xc5d   : > { %v5824_v16 = vpop.f32.mrf.mxu0 }
 0xc5f   : > { %v7235_v11 = vpop.f32.mrf.mxu0 }
 0xc61   : > { %v5979_v20 = vpop.f32.mrf.mxu0 }
 0xc62   : > { %v5980_v39 = vadd.f32 %v5979_v20, %v5672_v12 }
 0xc63   : > { %v7247_v63 = vpop.f32.mrf.mxu0 }
 0xc64   : > { %6256 = vrot.lane.b32.xlu0 %v5980_v39, %s7434_s12 }
 0xc65   : > { %v6137_v41 = vpop.f32.mrf.mxu0 }
 0xc66   : > { %v6138_v43 = vadd.f32 %v6137_v41, %v5824_v16 }
 0xc67   : > { %v7261_v7 = vpop.f32.mrf.mxu0 }
 0xc68   : > { %6260 = vrot.lane.b32.xlu0 %v6138_v43, %s7434_s12 }
 0xc92   : > { %v5900_v56 = vpop.f32.mrf.mxu1 }
 0xc94   : > { %v7240_v5 = vpop.f32.mrf.mxu1 }
 0xc96   : > { %v6058_v29 = vpop.f32.mrf.mxu1 }
 0xc97   : > { %v6059_v3 = vadd.f32 %v6058_v29, %v5748_v13 }
 0xc98   : > { %v7254_v49 = vpop.f32.mrf.mxu1 }
 0xc99   : > { %6258 = vrot.lane.b32.xlu1 %v6059_v3, %s7434_s12 }
 0xc9a   : > { %v6216_v8 = vpop.f32.mrf.mxu1 }
 0xc9b   : > { %v6217_v44 = vadd.f32 %v6216_v8, %v5900_v56 }
 0xc9c   : > { %v7268_v40 = vpop.f32.mrf.mxu1 }
 0xc9d   : > { %6262 = vrot.lane.b32.xlu1 %v6217_v44, %s7434_s12 }
 0xcd6   : > { %v6257_v50 = vpop.permute.xlu0 %6256 }
 0xcd7   : > { %v6277_v10 = vsel %vm6276_vm4, %v6272_v2, %v6257_v50 }
 0xcd8   : > { %7277 = vmatprep.mubr.msk.f32.mxu0 %vm317_vm0, %v6277_v10 }
 0xcda   : > { %v6261_v47 = vpop.permute.xlu0 %6260 }
 0xcdb   : > { %v6279_v46 = vsel %vm6276_vm4, %v6274_v54, %v6261_v47 }
 0xd0b   : > { %v6259_v27 = vpop.permute.xlu1 %6258 }
 0xd0c   : > { %v6278_v51 = vsel %vm6276_vm4, %v6273_v53, %v6259_v27 }
 0xd0d   : > { %7278 = vmatmul.mubr.msk.f32.vlgmr.msra.gmra.mxu0 %vm317_vm0, %v6278_v51 }
 0xd0e   : > { %7280 = vmatprep.mubr.msk.f32.mxu0 %vm317_vm0, %v6279_v46 }
 0xd0f   : > { %v6263_v17 = vpop.permute.xlu1 %6262 }
 0xd10   : > { %v6280_v59 = vsel %vm6276_vm4, %v6275_v6, %v6263_v17 }
 0xd11   : > { %7281 = vmatmul.mubr.msk.f32.gmra.mxu0 %vm317_vm0, %v6280_v59 }
 0xdcd   : > { %v7279_v25 = vpop.f32.mrf.mxu0 }
 0xdce   : > { %6383 = vst.msk [vmem:[%s302_s15 + $0x8] sm:$0xff] %vm317_vm0, %v7279_v25 }
 0xdcf   : > { %v6363_v21 = vpop.f32.mrf.mxu0 }
 0xdd0   : > { %6382 = vst.msk [vmem:[%s302_s15] sm:$0xff] %vm317_vm0, %v6363_v21 }
 0xdd1   : > { %v7282_v32 = vpop.f32.mrf.mxu0 }
 0xdd2   : > { %6385 = vst.msk [vmem:[%s302_s15 + $0x18] sm:$0xff] %vm317_vm0, %v7282_v32 }
 0xdd3   : > { %v6373_v52 = vpop.f32.mrf.mxu0 }
 0xdd4   : > { %6384 = vst.msk [vmem:[%s302_s15 + $0x10] sm:$0xff] %vm317_vm0, %v6373_v52 }
 0xdd5 PF: > { %s17_s24 = sadd.s32 1, %s7425_s24  }
 0xdd6   : > { %p14_p5 = scmp.ge.s32.totalorder %s17_s24, 4  }
 0xdd8   :  { %16 = sbr.rel (!%p14_p5) target bundleno = 1 (0x1), region = 81 }

</bundles_post_ra>
